<compile_context>
chip_gen: v6e
topology: v6e:2x2x1
jax: 0.10.0
libtpu: 0.0.40
codegen_flags: <defaults>
</compile_context>

<pallas_src>
import functools

import jax
import jax.numpy as jnp
from jax import lax
from jax.experimental import pallas as pl
from jax.experimental.pallas import tpu as pltpu

EPS = 1e-5  # PyTorch InstanceNorm3d default eps


# ---------------------------------------------------------------------------
# Fused kernel: expand -> IN -> ReLU -> depthwise -> IN -> ReLU -> project -> IN (+res)
# Per grid step: nb batch samples.  Activations are (C, S), channels on sublanes,
# flattened spatial S on lanes.
# ---------------------------------------------------------------------------
def _fused_inverted_residual_kernel(
    x_ref,      # (nb, Cin, S)
    w1_ref,     # (hidden, Cin)
    g1_ref,     # (hidden, 1)
    b1_ref,     # (hidden, 1)
    wdw_ref,    # (hidden, 27)   depthwise taps, per-channel weights
    g2_ref,     # (hidden, 1)
    b2_ref,     # (hidden, 1)
    w3_ref,     # (out_ch, hidden)
    g3_ref,     # (out_ch, 1)
    b3_ref,     # (out_ch, 1)
    o_ref,      # (nb, out_ch, S)
    wm_ref,     # VMEM scratch (27, hidden, S): masked per-tap weight planes
    *,
    D, H, W, nb, add_residual,
):
    S = D * H * W
    HW = H * W
    inv_s = jnp.float32(1.0 / S)

    # ---- per-grid-step: build masked depthwise weight planes ----------------
    # flat spatial index -> (d, h, w) coordinates, computed in-kernel (no mask DMA)
    pos = lax.broadcasted_iota(jnp.int32, (1, S), 1)
    if (HW & (HW - 1)) == 0 and (W & (W - 1)) == 0:
        d = pos >> (HW.bit_length() - 1)
        rem = pos & (HW - 1)
        hh = rem >> (W.bit_length() - 1)
        ww = rem & (W - 1)
    else:
        d = pos // HW
        rem = pos - d * HW
        hh = rem // W
        ww = rem - hh * W

    valid = {
        ("d", -1): d >= 1,  ("d", 1): d <= D - 2,
        ("h", -1): hh >= 1, ("h", 1): hh <= H - 2,
        ("w", -1): ww >= 1, ("w", 1): ww <= W - 2,
    }

    t = 0
    for od in (-1, 0, 1):
        for oh in (-1, 0, 1):
            for ow in (-1, 0, 1):
                if od == 0 and oh == 0 and ow == 0:
                    t += 1
                    continue  # center tap uses the raw weight column (mask == 1)
                m = None
                for ax, off in (("d", od), ("h", oh), ("w", ow)):
                    if off != 0:
                        f = valid[(ax, off)]
                        m = f if m is None else (m & f)
                mf = m.astype(jnp.float32)                         # (1, S)
                w_col = wdw_ref[:, t:t + 1].astype(jnp.float32)    # (hidden, 1)
                wm_ref[t] = w_col * mf                             # (hidden, S)
                t += 1

    w_center = wdw_ref[:, 13:14].astype(jnp.float32)               # (hidden, 1)

    # ---- per-grid-step: load tiny weights/affine params once ----------------
    w1 = w1_ref[...].astype(jnp.float32)                           # (hidden, Cin)
    w3 = w3_ref[...].astype(jnp.float32)                           # (out_ch, hidden)
    g1 = g1_ref[...].astype(jnp.float32); b1 = b1_ref[...].astype(jnp.float32)
    g2 = g2_ref[...].astype(jnp.float32); b2 = b2_ref[...].astype(jnp.float32)
    g3 = g3_ref[...].astype(jnp.float32); b3 = b3_ref[...].astype(jnp.float32)

    def instance_norm(v, g, b, relu):
        # two-pass variance (numerically safe), gamma folded into the scale
        mean = jnp.sum(v, axis=1, keepdims=True) * inv_s           # (C, 1)
        c = v - mean
        var = jnp.sum(c * c, axis=1, keepdims=True) * inv_s        # (C, 1)
        scale = g * lax.rsqrt(var + EPS)
        y = c * scale + b
        if relu:
            y = jnp.maximum(y, 0.0)
        return y

    def per_sample(i):
        x = x_ref[i].astype(jnp.float32)                           # (Cin, S)

        # expand 1x1x1 conv + IN + ReLU (S on the MXU N dimension)
        h = jnp.dot(w1, x, preferred_element_type=jnp.float32)     # (hidden, S)
        h = instance_norm(h, g1, b1, relu=True)

        # depthwise 3x3x3 (stride 1, pad 1): 27 lane-rolled taps.
        # acc initialized with the (unmasked) center tap; the other 26 taps are
        # roll (XLU slot) + mul + add against the pre-masked weight planes.
        acc = h * w_center
        t = 0
        for od in (-1, 0, 1):
            for oh in (-1, 0, 1):
                for ow in (-1, 0, 1):
                    if not (od == 0 and oh == 0 and ow == 0):
                        delta = od * HW + oh * W + ow
                        tap = pltpu.roll(h, shift=(-delta) % S, axis=1)
                        acc = acc + tap * wm_ref[t]
                    t += 1
        h2 = instance_norm(acc, g2, b2, relu=True)                 # (hidden, S)

        # project 1x1x1 conv + IN (+ residual)
        out = jnp.dot(w3, h2, preferred_element_type=jnp.float32)  # (out_ch, S)
        out = instance_norm(out, g3, b3, relu=False)
        if add_residual:
            out = out + x
        o_ref[i] = out.astype(o_ref.dtype)

    if nb == 1:
        per_sample(0)
    else:
        def body(i, carry):
            per_sample(i)
            return carry
        lax.fori_loop(0, nb, body, 0)


# ---------------------------------------------------------------------------
# Full module forward.  Input layout is NCDHW (exactly what the PyTorch module
# takes), so all wrapper reshapes are free — no host-side transposes / HBM
# round trips.
# ---------------------------------------------------------------------------
def inverted_residual_3d(x, params, *, stride=1, samples_per_step=None):
    """x: (N, Cin, D, H, W). Returns (N, Cout, D, H, W)."""
    if stride != 1:
        raise NotImplementedError("stride > 1 not implemented")  # TODO(synk)
    N, Cin, D, H, W = x.shape
    S = D * H * W
    hidden = params["w1"].shape[1]
    out_ch = params["w3"].shape[1]
    use_res_connect = (stride == 1) and (Cin == out_ch)

    # Free reshape: channels already major, spatial flattens onto the lane axis.
    x_cs = x.reshape(N, Cin, S)

    # Samples per grid step: amortize the ~0.35us per-step overhead and the MXU
    # weight push, while keeping >= 2 grid steps so both v7x TensorCores get work.
    if samples_per_step is None:
        nb = 1
        for cand in (8, 4, 2):
            if N % cand == 0 and N // cand >= 2:
                nb = cand
                break
    else:
        nb = samples_per_step
        assert N % nb == 0, "samples_per_step must divide the batch size"
    grid = (N // nb,)

    w1T = jnp.asarray(params["w1"]).T                              # (hidden, Cin)
    w3T = jnp.asarray(params["w3"]).T                              # (out_ch, hidden)
    wdwT = jnp.asarray(params["w_dw"]).T                           # (hidden, 27)
    g1 = params["g1"].reshape(hidden, 1); b1 = params["b1"].reshape(hidden, 1)
    g2 = params["g2"].reshape(hidden, 1); b2 = params["b2"].reshape(hidden, 1)
    g3 = params["g3"].reshape(out_ch, 1); b3 = params["b3"].reshape(out_ch, 1)

    kernel = functools.partial(
        _fused_inverted_residual_kernel,
        D=D, H=H, W=W, nb=nb, add_residual=use_res_connect,
    )

    rep = lambda n: (0, 0)  # constant-index weight blocks

    out_cs = pl.pallas_call(
        kernel,
        out_shape=jax.ShapeDtypeStruct((N, out_ch, S), x.dtype),
        grid=grid,
        in_specs=[
            pl.BlockSpec((nb, Cin, S), lambda n: (n, 0, 0)),
            pl.BlockSpec((hidden, Cin), rep),
            pl.BlockSpec((hidden, 1), rep),
            pl.BlockSpec((hidden, 1), rep),
            pl.BlockSpec((hidden, 27), rep),
            pl.BlockSpec((hidden, 1), rep),
            pl.BlockSpec((hidden, 1), rep),
            pl.BlockSpec((out_ch, hidden), rep),
            pl.BlockSpec((out_ch, 1), rep),
            pl.BlockSpec((out_ch, 1), rep),
        ],
        out_specs=pl.BlockSpec((nb, out_ch, S), lambda n: (n, 0, 0)),
        scratch_shapes=[pltpu.VMEM((27, hidden, S), jnp.float32)],  # masked tap weights
        compiler_params=pltpu.CompilerParams(
            dimension_semantics=("parallel",),
            vmem_limit_bytes=32 * 1024 * 1024,
        ),
    )(x_cs, w1T, g1, b1, wdwT, g2, b2, w3T, g3, b3)

    return out_cs.reshape(N, out_ch, D, H, W)


# ---------------------------------------------------------------------------
# Pure-JAX reference (for correctness check), NCDHW in / NCDHW out
# ---------------------------------------------------------------------------
def _ref_instance_norm(x, g, b):
    mean = jnp.mean(x, axis=(1, 2, 3), keepdims=True)
    var = jnp.mean((x - mean) ** 2, axis=(1, 2, 3), keepdims=True)
    return (x - mean) * lax.rsqrt(var + EPS) * g + b


def ref_forward(x_ncdhw, params):
    x = jnp.transpose(x_ncdhw, (0, 2, 3, 4, 1))                     # NDHWC
    h = jnp.einsum("ndhwc,ce->ndhwe", x, params["w1"])
    h = jax.nn.relu(_ref_instance_norm(h, params["g1"], params["b1"]))
    N, D, H, W, C = h.shape
    xp = jnp.pad(h, ((0, 0), (1, 1), (1, 1), (1, 1), (0, 0)))
    acc = jnp.zeros_like(h)
    for kd in range(3):
        for kh in range(3):
            for kw in range(3):
                acc = acc + xp[:, kd:kd + D, kh:kh + H, kw:kw + W, :] * params["w_dw"][kd * 9 + kh * 3 + kw]
    h = jax.nn.relu(_ref_instance_norm(acc, params["g2"], params["b2"]))
    out = jnp.einsum("ndhwc,ce->ndhwe", h, params["w3"])
    out = _ref_instance_norm(out, params["g3"], params["b3"])
    if x.shape[-1] == out.shape[-1]:
        out = out + x
    return jnp.transpose(out, (0, 4, 1, 2, 3))


# ---------------------------------------------------------------------------
if __name__ == "__main__":
    # Module config: in_ch=4, out_ch=4, stride=1, expand_ratio=4 -> hidden=16, residual used.
    N, D, H, W = 4, 8, 8, 8                 # N=4 -> nb=2, grid=(2,)
    in_ch, out_ch, expand_ratio = 4, 4, 4
    hidden = in_ch * expand_ratio

    key = jax.random.PRNGKey(0)
    ks = jax.random.split(key, 10)
    params = {
        # 1x1x1 expand conv: PyTorch weight (hidden, in_ch, 1,1,1) -> (in_ch, hidden)
        "w1": 0.2 * jax.random.normal(ks[0], (in_ch, hidden), jnp.float32),
        "g1": 1.0 + 0.1 * jax.random.normal(ks[1], (hidden,), jnp.float32),
        "b1": 0.1 * jax.random.normal(ks[2], (hidden,), jnp.float32),
        # depthwise 3x3x3 conv: PyTorch weight (hidden, 1, 3,3,3) -> (27, hidden)
        "w_dw": 0.2 * jax.random.normal(ks[3], (27, hidden), jnp.float32),
        "g2": 1.0 + 0.1 * jax.random.normal(ks[4], (hidden,), jnp.float32),
        "b2": 0.1 * jax.random.normal(ks[5], (hidden,), jnp.float32),
        # 1x1x1 project conv: PyTorch weight (out_ch, hidden, 1,1,1) -> (hidden, out_ch)
        "w3": 0.2 * jax.random.normal(ks[6], (hidden, out_ch), jnp.float32),
        "g3": 1.0 + 0.1 * jax.random.normal(ks[7], (out_ch,), jnp.float32),
        "b3": 0.1 * jax.random.normal(ks[8], (out_ch,), jnp.float32),
    }

    x = jax.random.normal(ks[9], (N, in_ch, D, H, W), jnp.float32)  # NCDHW, like the PyTorch module

    out = jax.block_until_ready(inverted_residual_3d(x, params))

    ref = jax.block_until_ready(ref_forward(x, params))
    assert out.shape == (N, out_ch, D, H, W)
    err = float(jnp.max(jnp.abs(out - ref)))
    assert jnp.allclose(out, ref, atol=1e-3, rtol=1e-3), err

    print("KERNEL_OK")
</pallas_src>

<mosaic_0001>
module attributes {stable_mosaic.version = 11 : i64} {
  func.func @_fused_inverted_residual_kernel(%arg0: i32, %arg1: memref<2x4x512xf32, #tpu.memory_space<vmem>>, %arg2: memref<16x4xf32, #tpu.memory_space<vmem>>, %arg3: memref<16x1xf32, #tpu.memory_space<vmem>>, %arg4: memref<16x1xf32, #tpu.memory_space<vmem>>, %arg5: memref<16x27xf32, #tpu.memory_space<vmem>>, %arg6: memref<16x1xf32, #tpu.memory_space<vmem>>, %arg7: memref<16x1xf32, #tpu.memory_space<vmem>>, %arg8: memref<4x16xf32, #tpu.memory_space<vmem>>, %arg9: memref<4x1xf32, #tpu.memory_space<vmem>>, %arg10: memref<4x1xf32, #tpu.memory_space<vmem>>, %arg11: memref<2x4x512xf32, #tpu.memory_space<vmem>>, %arg12: memref<27x16x512xf32, #tpu.memory_space<vmem>>) attributes {dimension_semantics = [#tpu.dimension_semantics<parallel>], iteration_bounds = array<i64: 2>, scalar_prefetch = 0 : i64, scratch_operands = 1 : i64, tpu.core_type = #tpu.core_type<tc>, window_params = [{transform_indices = @transform_0, window_bounds = array<i64: 2, 4, 512>}, {pipeline_mode = #tpu.pipeline_mode<synchronous>, transform_indices = @transform_1, window_bounds = array<i64: 16, 4>}, {pipeline_mode = #tpu.pipeline_mode<synchronous>, transform_indices = @transform_2, window_bounds = array<i64: 16, 1>}, {pipeline_mode = #tpu.pipeline_mode<synchronous>, transform_indices = @transform_3, window_bounds = array<i64: 16, 1>}, {pipeline_mode = #tpu.pipeline_mode<synchronous>, transform_indices = @transform_4, window_bounds = array<i64: 16, 27>}, {pipeline_mode = #tpu.pipeline_mode<synchronous>, transform_indices = @transform_5, window_bounds = array<i64: 16, 1>}, {pipeline_mode = #tpu.pipeline_mode<synchronous>, transform_indices = @transform_6, window_bounds = array<i64: 16, 1>}, {pipeline_mode = #tpu.pipeline_mode<synchronous>, transform_indices = @transform_7, window_bounds = array<i64: 4, 16>}, {pipeline_mode = #tpu.pipeline_mode<synchronous>, transform_indices = @transform_8, window_bounds = array<i64: 4, 1>}, {pipeline_mode = #tpu.pipeline_mode<synchronous>, transform_indices = @transform_9, window_bounds = array<i64: 4, 1>}, {transform_indices = @transform_10, window_bounds = array<i64: 2, 4, 512>}]} {
    %0 = tpu.iota {dimensions = array<i32: 1>} : vector<1x512xi32>
    %c6_i32 = arith.constant 6 : i32
    %1 = vector.broadcast %c6_i32 : i32 to vector<1x512xi32>
    %2 = arith.shrsi %0, %1 : vector<1x512xi32>
    %c63_i32 = arith.constant 63 : i32
    %3 = vector.broadcast %c63_i32 : i32 to vector<1x512xi32>
    %4 = arith.andi %0, %3 : vector<1x512xi32>
    %c3_i32 = arith.constant 3 : i32
    %5 = vector.broadcast %c3_i32 : i32 to vector<1x512xi32>
    %6 = arith.shrsi %4, %5 : vector<1x512xi32>
    %c7_i32 = arith.constant 7 : i32
    %7 = vector.broadcast %c7_i32 : i32 to vector<1x512xi32>
    %8 = arith.andi %4, %7 : vector<1x512xi32>
    %c1_i32 = arith.constant 1 : i32
    %9 = vector.broadcast %c1_i32 : i32 to vector<1x512xi32>
    %10 = arith.cmpi sge, %2, %9 : vector<1x512xi32>
    %c6_i32_0 = arith.constant 6 : i32
    %11 = vector.broadcast %c6_i32_0 : i32 to vector<1x512xi32>
    %12 = arith.cmpi sle, %2, %11 : vector<1x512xi32>
    %c1_i32_1 = arith.constant 1 : i32
    %13 = vector.broadcast %c1_i32_1 : i32 to vector<1x512xi32>
    %14 = arith.cmpi sge, %6, %13 : vector<1x512xi32>
    %c6_i32_2 = arith.constant 6 : i32
    %15 = vector.broadcast %c6_i32_2 : i32 to vector<1x512xi32>
    %16 = arith.cmpi sle, %6, %15 : vector<1x512xi32>
    %c1_i32_3 = arith.constant 1 : i32
    %17 = vector.broadcast %c1_i32_3 : i32 to vector<1x512xi32>
    %18 = arith.cmpi sge, %8, %17 : vector<1x512xi32>
    %c6_i32_4 = arith.constant 6 : i32
    %19 = vector.broadcast %c6_i32_4 : i32 to vector<1x512xi32>
    %20 = arith.cmpi sle, %8, %19 : vector<1x512xi32>
    %21 = arith.andi %10, %14 : vector<1x512xi1>
    %22 = arith.andi %21, %18 : vector<1x512xi1>
    %23 = arith.extui %22 : vector<1x512xi1> to vector<1x512xi32>
    %24 = arith.sitofp %23 : vector<1x512xi32> to vector<1x512xf32>
    %c0 = arith.constant 0 : index
    %c0_5 = arith.constant 0 : index
    %25 = vector.load %arg5[%c0, %c0_5] : memref<16x27xf32, #tpu.memory_space<vmem>>, vector<16x1xf32>
    %26 = vector.broadcast %25 : vector<16x1xf32> to vector<16x512xf32>
    %27 = vector.broadcast %24 : vector<1x512xf32> to vector<16x512xf32>
    %28 = arith.mulf %26, %27 : vector<16x512xf32>
    %c0_6 = arith.constant 0 : index
    %c0_7 = arith.constant 0 : index
    %c0_8 = arith.constant 0 : index
    %29 = vector.load %arg12[%c0_6, %c0_7, %c0_8] : memref<27x16x512xf32, #tpu.memory_space<vmem>>, vector<1x16x512xf32>
    %30 = vector.shape_cast %29 : vector<1x16x512xf32> to vector<16x512xf32>
    %31 = vector.shape_cast %28 : vector<16x512xf32> to vector<1x16x512xf32>
    tpu.vector_store %arg12[%c0_6, %c0_7, %c0_8], %31 {strides = array<i32>} : memref<27x16x512xf32, #tpu.memory_space<vmem>>, vector<1x16x512xf32>,
    %32 = arith.andi %10, %14 : vector<1x512xi1>
    %33 = arith.extui %32 : vector<1x512xi1> to vector<1x512xi32>
    %34 = arith.sitofp %33 : vector<1x512xi32> to vector<1x512xf32>
    %c0_9 = arith.constant 0 : index
    %c1 = arith.constant 1 : index
    %35 = vector.load %arg5[%c0_9, %c1] : memref<16x27xf32, #tpu.memory_space<vmem>>, vector<16x1xf32>
    %36 = vector.broadcast %35 : vector<16x1xf32> to vector<16x512xf32>
    %37 = vector.broadcast %34 : vector<1x512xf32> to vector<16x512xf32>
    %38 = arith.mulf %36, %37 : vector<16x512xf32>
    %c1_10 = arith.constant 1 : index
    %c0_11 = arith.constant 0 : index
    %c0_12 = arith.constant 0 : index
    %39 = vector.load %arg12[%c1_10, %c0_11, %c0_12] : memref<27x16x512xf32, #tpu.memory_space<vmem>>, vector<1x16x512xf32>
    %40 = vector.shape_cast %39 : vector<1x16x512xf32> to vector<16x512xf32>
    %41 = vector.shape_cast %38 : vector<16x512xf32> to vector<1x16x512xf32>
    tpu.vector_store %arg12[%c1_10, %c0_11, %c0_12], %41 {strides = array<i32>} : memref<27x16x512xf32, #tpu.memory_space<vmem>>, vector<1x16x512xf32>,
    %42 = arith.andi %10, %14 : vector<1x512xi1>
    %43 = arith.andi %42, %20 : vector<1x512xi1>
    %44 = arith.extui %43 : vector<1x512xi1> to vector<1x512xi32>
    %45 = arith.sitofp %44 : vector<1x512xi32> to vector<1x512xf32>
    %c0_13 = arith.constant 0 : index
    %c2 = arith.constant 2 : index
    %46 = vector.load %arg5[%c0_13, %c2] : memref<16x27xf32, #tpu.memory_space<vmem>>, vector<16x1xf32>
    %47 = vector.broadcast %46 : vector<16x1xf32> to vector<16x512xf32>
    %48 = vector.broadcast %45 : vector<1x512xf32> to vector<16x512xf32>
    %49 = arith.mulf %47, %48 : vector<16x512xf32>
    %c2_14 = arith.constant 2 : index
    %c0_15 = arith.constant 0 : index
    %c0_16 = arith.constant 0 : index
    %50 = vector.load %arg12[%c2_14, %c0_15, %c0_16] : memref<27x16x512xf32, #tpu.memory_space<vmem>>, vector<1x16x512xf32>
    %51 = vector.shape_cast %50 : vector<1x16x512xf32> to vector<16x512xf32>
    %52 = vector.shape_cast %49 : vector<16x512xf32> to vector<1x16x512xf32>
    tpu.vector_store %arg12[%c2_14, %c0_15, %c0_16], %52 {strides = array<i32>} : memref<27x16x512xf32, #tpu.memory_space<vmem>>, vector<1x16x512xf32>,
    %53 = arith.andi %10, %18 : vector<1x512xi1>
    %54 = arith.extui %53 : vector<1x512xi1> to vector<1x512xi32>
    %55 = arith.sitofp %54 : vector<1x512xi32> to vector<1x512xf32>
    %c0_17 = arith.constant 0 : index
    %c3 = arith.constant 3 : index
    %56 = vector.load %arg5[%c0_17, %c3] : memref<16x27xf32, #tpu.memory_space<vmem>>, vector<16x1xf32>
    %57 = vector.broadcast %56 : vector<16x1xf32> to vector<16x512xf32>
    %58 = vector.broadcast %55 : vector<1x512xf32> to vector<16x512xf32>
    %59 = arith.mulf %57, %58 : vector<16x512xf32>
    %c3_18 = arith.constant 3 : index
    %c0_19 = arith.constant 0 : index
    %c0_20 = arith.constant 0 : index
    %60 = vector.load %arg12[%c3_18, %c0_19, %c0_20] : memref<27x16x512xf32, #tpu.memory_space<vmem>>, vector<1x16x512xf32>
    %61 = vector.shape_cast %60 : vector<1x16x512xf32> to vector<16x512xf32>
    %62 = vector.shape_cast %59 : vector<16x512xf32> to vector<1x16x512xf32>
    tpu.vector_store %arg12[%c3_18, %c0_19, %c0_20], %62 {strides = array<i32>} : memref<27x16x512xf32, #tpu.memory_space<vmem>>, vector<1x16x512xf32>,
    %63 = arith.extui %10 : vector<1x512xi1> to vector<1x512xi32>
    %64 = arith.sitofp %63 : vector<1x512xi32> to vector<1x512xf32>
    %c0_21 = arith.constant 0 : index
    %c4 = arith.constant 4 : index
    %65 = vector.load %arg5[%c0_21, %c4] : memref<16x27xf32, #tpu.memory_space<vmem>>, vector<16x1xf32>
    %66 = vector.broadcast %65 : vector<16x1xf32> to vector<16x512xf32>
    %67 = vector.broadcast %64 : vector<1x512xf32> to vector<16x512xf32>
    %68 = arith.mulf %66, %67 : vector<16x512xf32>
    %c4_22 = arith.constant 4 : index
    %c0_23 = arith.constant 0 : index
    %c0_24 = arith.constant 0 : index
    %69 = vector.load %arg12[%c4_22, %c0_23, %c0_24] : memref<27x16x512xf32, #tpu.memory_space<vmem>>, vector<1x16x512xf32>
    %70 = vector.shape_cast %69 : vector<1x16x512xf32> to vector<16x512xf32>
    %71 = vector.shape_cast %68 : vector<16x512xf32> to vector<1x16x512xf32>
    tpu.vector_store %arg12[%c4_22, %c0_23, %c0_24], %71 {strides = array<i32>} : memref<27x16x512xf32, #tpu.memory_space<vmem>>, vector<1x16x512xf32>,
    %72 = arith.andi %10, %20 : vector<1x512xi1>
    %73 = arith.extui %72 : vector<1x512xi1> to vector<1x512xi32>
    %74 = arith.sitofp %73 : vector<1x512xi32> to vector<1x512xf32>
    %c0_25 = arith.constant 0 : index
    %c5 = arith.constant 5 : index
    %75 = vector.load %arg5[%c0_25, %c5] : memref<16x27xf32, #tpu.memory_space<vmem>>, vector<16x1xf32>
    %76 = vector.broadcast %75 : vector<16x1xf32> to vector<16x512xf32>
    %77 = vector.broadcast %74 : vector<1x512xf32> to vector<16x512xf32>
    %78 = arith.mulf %76, %77 : vector<16x512xf32>
    %c5_26 = arith.constant 5 : index
    %c0_27 = arith.constant 0 : index
    %c0_28 = arith.constant 0 : index
    %79 = vector.load %arg12[%c5_26, %c0_27, %c0_28] : memref<27x16x512xf32, #tpu.memory_space<vmem>>, vector<1x16x512xf32>
    %80 = vector.shape_cast %79 : vector<1x16x512xf32> to vector<16x512xf32>
    %81 = vector.shape_cast %78 : vector<16x512xf32> to vector<1x16x512xf32>
    tpu.vector_store %arg12[%c5_26, %c0_27, %c0_28], %81 {strides = array<i32>} : memref<27x16x512xf32, #tpu.memory_space<vmem>>, vector<1x16x512xf32>,
    %82 = arith.andi %10, %16 : vector<1x512xi1>
    %83 = arith.andi %82, %18 : vector<1x512xi1>
    %84 = arith.extui %83 : vector<1x512xi1> to vector<1x512xi32>
    %85 = arith.sitofp %84 : vector<1x512xi32> to vector<1x512xf32>
    %c0_29 = arith.constant 0 : index
    %c6 = arith.constant 6 : index
    %86 = vector.load %arg5[%c0_29, %c6] : memref<16x27xf32, #tpu.memory_space<vmem>>, vector<16x1xf32>
    %87 = vector.broadcast %86 : vector<16x1xf32> to vector<16x512xf32>
    %88 = vector.broadcast %85 : vector<1x512xf32> to vector<16x512xf32>
    %89 = arith.mulf %87, %88 : vector<16x512xf32>
    %c6_30 = arith.constant 6 : index
    %c0_31 = arith.constant 0 : index
    %c0_32 = arith.constant 0 : index
    %90 = vector.load %arg12[%c6_30, %c0_31, %c0_32] : memref<27x16x512xf32, #tpu.memory_space<vmem>>, vector<1x16x512xf32>
    %91 = vector.shape_cast %90 : vector<1x16x512xf32> to vector<16x512xf32>
    %92 = vector.shape_cast %89 : vector<16x512xf32> to vector<1x16x512xf32>
    tpu.vector_store %arg12[%c6_30, %c0_31, %c0_32], %92 {strides = array<i32>} : memref<27x16x512xf32, #tpu.memory_space<vmem>>, vector<1x16x512xf32>,
    %93 = arith.andi %10, %16 : vector<1x512xi1>
    %94 = arith.extui %93 : vector<1x512xi1> to vector<1x512xi32>
    %95 = arith.sitofp %94 : vector<1x512xi32> to vector<1x512xf32>
    %c0_33 = arith.constant 0 : index
    %c7 = arith.constant 7 : index
    %96 = vector.load %arg5[%c0_33, %c7] : memref<16x27xf32, #tpu.memory_space<vmem>>, vector<16x1xf32>
    %97 = vector.broadcast %96 : vector<16x1xf32> to vector<16x512xf32>
    %98 = vector.broadcast %95 : vector<1x512xf32> to vector<16x512xf32>
    %99 = arith.mulf %97, %98 : vector<16x512xf32>
    %c7_34 = arith.constant 7 : index
    %c0_35 = arith.constant 0 : index
    %c0_36 = arith.constant 0 : index
    %100 = vector.load %arg12[%c7_34, %c0_35, %c0_36] : memref<27x16x512xf32, #tpu.memory_space<vmem>>, vector<1x16x512xf32>
    %101 = vector.shape_cast %100 : vector<1x16x512xf32> to vector<16x512xf32>
    %102 = vector.shape_cast %99 : vector<16x512xf32> to vector<1x16x512xf32>
    tpu.vector_store %arg12[%c7_34, %c0_35, %c0_36], %102 {strides = array<i32>} : memref<27x16x512xf32, #tpu.memory_space<vmem>>, vector<1x16x512xf32>,
    %103 = arith.andi %10, %16 : vector<1x512xi1>
    %104 = arith.andi %103, %20 : vector<1x512xi1>
    %105 = arith.extui %104 : vector<1x512xi1> to vector<1x512xi32>
    %106 = arith.sitofp %105 : vector<1x512xi32> to vector<1x512xf32>
    %c0_37 = arith.constant 0 : index
    %c8 = arith.constant 8 : index
    %107 = vector.load %arg5[%c0_37, %c8] : memref<16x27xf32, #tpu.memory_space<vmem>>, vector<16x1xf32>
    %108 = vector.broadcast %107 : vector<16x1xf32> to vector<16x512xf32>
    %109 = vector.broadcast %106 : vector<1x512xf32> to vector<16x512xf32>
    %110 = arith.mulf %108, %109 : vector<16x512xf32>
    %c8_38 = arith.constant 8 : index
    %c0_39 = arith.constant 0 : index
    %c0_40 = arith.constant 0 : index
    %111 = vector.load %arg12[%c8_38, %c0_39, %c0_40] : memref<27x16x512xf32, #tpu.memory_space<vmem>>, vector<1x16x512xf32>
    %112 = vector.shape_cast %111 : vector<1x16x512xf32> to vector<16x512xf32>
    %113 = vector.shape_cast %110 : vector<16x512xf32> to vector<1x16x512xf32>
    tpu.vector_store %arg12[%c8_38, %c0_39, %c0_40], %113 {strides = array<i32>} : memref<27x16x512xf32, #tpu.memory_space<vmem>>, vector<1x16x512xf32>,
    %114 = arith.andi %14, %18 : vector<1x512xi1>
    %115 = arith.extui %114 : vector<1x512xi1> to vector<1x512xi32>
    %116 = arith.sitofp %115 : vector<1x512xi32> to vector<1x512xf32>
    %c0_41 = arith.constant 0 : index
    %c9 = arith.constant 9 : index
    %117 = vector.load %arg5[%c0_41, %c9] : memref<16x27xf32, #tpu.memory_space<vmem>>, vector<16x1xf32>
    %118 = vector.broadcast %117 : vector<16x1xf32> to vector<16x512xf32>
    %119 = vector.broadcast %116 : vector<1x512xf32> to vector<16x512xf32>
    %120 = arith.mulf %118, %119 : vector<16x512xf32>
    %c9_42 = arith.constant 9 : index
    %c0_43 = arith.constant 0 : index
    %c0_44 = arith.constant 0 : index
    %121 = vector.load %arg12[%c9_42, %c0_43, %c0_44] : memref<27x16x512xf32, #tpu.memory_space<vmem>>, vector<1x16x512xf32>
    %122 = vector.shape_cast %121 : vector<1x16x512xf32> to vector<16x512xf32>
    %123 = vector.shape_cast %120 : vector<16x512xf32> to vector<1x16x512xf32>
    tpu.vector_store %arg12[%c9_42, %c0_43, %c0_44], %123 {strides = array<i32>} : memref<27x16x512xf32, #tpu.memory_space<vmem>>, vector<1x16x512xf32>,
    %124 = arith.extui %14 : vector<1x512xi1> to vector<1x512xi32>
    %125 = arith.sitofp %124 : vector<1x512xi32> to vector<1x512xf32>
    %c0_45 = arith.constant 0 : index
    %c10 = arith.constant 10 : index
    %126 = vector.load %arg5[%c0_45, %c10] : memref<16x27xf32, #tpu.memory_space<vmem>>, vector<16x1xf32>
    %127 = vector.broadcast %126 : vector<16x1xf32> to vector<16x512xf32>
    %128 = vector.broadcast %125 : vector<1x512xf32> to vector<16x512xf32>
    %129 = arith.mulf %127, %128 : vector<16x512xf32>
    %c10_46 = arith.constant 10 : index
    %c0_47 = arith.constant 0 : index
    %c0_48 = arith.constant 0 : index
    %130 = vector.load %arg12[%c10_46, %c0_47, %c0_48] : memref<27x16x512xf32, #tpu.memory_space<vmem>>, vector<1x16x512xf32>
    %131 = vector.shape_cast %130 : vector<1x16x512xf32> to vector<16x512xf32>
    %132 = vector.shape_cast %129 : vector<16x512xf32> to vector<1x16x512xf32>
    tpu.vector_store %arg12[%c10_46, %c0_47, %c0_48], %132 {strides = array<i32>} : memref<27x16x512xf32, #tpu.memory_space<vmem>>, vector<1x16x512xf32>,
    %133 = arith.andi %14, %20 : vector<1x512xi1>
    %134 = arith.extui %133 : vector<1x512xi1> to vector<1x512xi32>
    %135 = arith.sitofp %134 : vector<1x512xi32> to vector<1x512xf32>
    %c0_49 = arith.constant 0 : index
    %c11 = arith.constant 11 : index
    %136 = vector.load %arg5[%c0_49, %c11] : memref<16x27xf32, #tpu.memory_space<vmem>>, vector<16x1xf32>
    %137 = vector.broadcast %136 : vector<16x1xf32> to vector<16x512xf32>
    %138 = vector.broadcast %135 : vector<1x512xf32> to vector<16x512xf32>
    %139 = arith.mulf %137, %138 : vector<16x512xf32>
    %c11_50 = arith.constant 11 : index
    %c0_51 = arith.constant 0 : index
    %c0_52 = arith.constant 0 : index
    %140 = vector.load %arg12[%c11_50, %c0_51, %c0_52] : memref<27x16x512xf32, #tpu.memory_space<vmem>>, vector<1x16x512xf32>
    %141 = vector.shape_cast %140 : vector<1x16x512xf32> to vector<16x512xf32>
    %142 = vector.shape_cast %139 : vector<16x512xf32> to vector<1x16x512xf32>
    tpu.vector_store %arg12[%c11_50, %c0_51, %c0_52], %142 {strides = array<i32>} : memref<27x16x512xf32, #tpu.memory_space<vmem>>, vector<1x16x512xf32>,
    %143 = arith.extui %18 : vector<1x512xi1> to vector<1x512xi32>
    %144 = arith.sitofp %143 : vector<1x512xi32> to vector<1x512xf32>
    %c0_53 = arith.constant 0 : index
    %c12 = arith.constant 12 : index
    %145 = vector.load %arg5[%c0_53, %c12] : memref<16x27xf32, #tpu.memory_space<vmem>>, vector<16x1xf32>
    %146 = vector.broadcast %145 : vector<16x1xf32> to vector<16x512xf32>
    %147 = vector.broadcast %144 : vector<1x512xf32> to vector<16x512xf32>
    %148 = arith.mulf %146, %147 : vector<16x512xf32>
    %c12_54 = arith.constant 12 : index
    %c0_55 = arith.constant 0 : index
    %c0_56 = arith.constant 0 : index
    %149 = vector.load %arg12[%c12_54, %c0_55, %c0_56] : memref<27x16x512xf32, #tpu.memory_space<vmem>>, vector<1x16x512xf32>
    %150 = vector.shape_cast %149 : vector<1x16x512xf32> to vector<16x512xf32>
    %151 = vector.shape_cast %148 : vector<16x512xf32> to vector<1x16x512xf32>
    tpu.vector_store %arg12[%c12_54, %c0_55, %c0_56], %151 {strides = array<i32>} : memref<27x16x512xf32, #tpu.memory_space<vmem>>, vector<1x16x512xf32>,
    %152 = arith.extui %20 : vector<1x512xi1> to vector<1x512xi32>
    %153 = arith.sitofp %152 : vector<1x512xi32> to vector<1x512xf32>
    %c0_57 = arith.constant 0 : index
    %c14 = arith.constant 14 : index
    %154 = vector.load %arg5[%c0_57, %c14] : memref<16x27xf32, #tpu.memory_space<vmem>>, vector<16x1xf32>
    %155 = vector.broadcast %154 : vector<16x1xf32> to vector<16x512xf32>
    %156 = vector.broadcast %153 : vector<1x512xf32> to vector<16x512xf32>
    %157 = arith.mulf %155, %156 : vector<16x512xf32>
    %c14_58 = arith.constant 14 : index
    %c0_59 = arith.constant 0 : index
    %c0_60 = arith.constant 0 : index
    %158 = vector.load %arg12[%c14_58, %c0_59, %c0_60] : memref<27x16x512xf32, #tpu.memory_space<vmem>>, vector<1x16x512xf32>
    %159 = vector.shape_cast %158 : vector<1x16x512xf32> to vector<16x512xf32>
    %160 = vector.shape_cast %157 : vector<16x512xf32> to vector<1x16x512xf32>
    tpu.vector_store %arg12[%c14_58, %c0_59, %c0_60], %160 {strides = array<i32>} : memref<27x16x512xf32, #tpu.memory_space<vmem>>, vector<1x16x512xf32>,
    %161 = arith.andi %16, %18 : vector<1x512xi1>
    %162 = arith.extui %161 : vector<1x512xi1> to vector<1x512xi32>
    %163 = arith.sitofp %162 : vector<1x512xi32> to vector<1x512xf32>
    %c0_61 = arith.constant 0 : index
    %c15 = arith.constant 15 : index
    %164 = vector.load %arg5[%c0_61, %c15] : memref<16x27xf32, #tpu.memory_space<vmem>>, vector<16x1xf32>
    %165 = vector.broadcast %164 : vector<16x1xf32> to vector<16x512xf32>
    %166 = vector.broadcast %163 : vector<1x512xf32> to vector<16x512xf32>
    %167 = arith.mulf %165, %166 : vector<16x512xf32>
    %c15_62 = arith.constant 15 : index
    %c0_63 = arith.constant 0 : index
    %c0_64 = arith.constant 0 : index
    %168 = vector.load %arg12[%c15_62, %c0_63, %c0_64] : memref<27x16x512xf32, #tpu.memory_space<vmem>>, vector<1x16x512xf32>
    %169 = vector.shape_cast %168 : vector<1x16x512xf32> to vector<16x512xf32>
    %170 = vector.shape_cast %167 : vector<16x512xf32> to vector<1x16x512xf32>
    tpu.vector_store %arg12[%c15_62, %c0_63, %c0_64], %170 {strides = array<i32>} : memref<27x16x512xf32, #tpu.memory_space<vmem>>, vector<1x16x512xf32>,
    %171 = arith.extui %16 : vector<1x512xi1> to vector<1x512xi32>
    %172 = arith.sitofp %171 : vector<1x512xi32> to vector<1x512xf32>
    %c0_65 = arith.constant 0 : index
    %c16 = arith.constant 16 : index
    %173 = vector.load %arg5[%c0_65, %c16] : memref<16x27xf32, #tpu.memory_space<vmem>>, vector<16x1xf32>
    %174 = vector.broadcast %173 : vector<16x1xf32> to vector<16x512xf32>
    %175 = vector.broadcast %172 : vector<1x512xf32> to vector<16x512xf32>
    %176 = arith.mulf %174, %175 : vector<16x512xf32>
    %c16_66 = arith.constant 16 : index
    %c0_67 = arith.constant 0 : index
    %c0_68 = arith.constant 0 : index
    %177 = vector.load %arg12[%c16_66, %c0_67, %c0_68] : memref<27x16x512xf32, #tpu.memory_space<vmem>>, vector<1x16x512xf32>
    %178 = vector.shape_cast %177 : vector<1x16x512xf32> to vector<16x512xf32>
    %179 = vector.shape_cast %176 : vector<16x512xf32> to vector<1x16x512xf32>
    tpu.vector_store %arg12[%c16_66, %c0_67, %c0_68], %179 {strides = array<i32>} : memref<27x16x512xf32, #tpu.memory_space<vmem>>, vector<1x16x512xf32>,
    %180 = arith.andi %16, %20 : vector<1x512xi1>
    %181 = arith.extui %180 : vector<1x512xi1> to vector<1x512xi32>
    %182 = arith.sitofp %181 : vector<1x512xi32> to vector<1x512xf32>
    %c0_69 = arith.constant 0 : index
    %c17 = arith.constant 17 : index
    %183 = vector.load %arg5[%c0_69, %c17] : memref<16x27xf32, #tpu.memory_space<vmem>>, vector<16x1xf32>
    %184 = vector.broadcast %183 : vector<16x1xf32> to vector<16x512xf32>
    %185 = vector.broadcast %182 : vector<1x512xf32> to vector<16x512xf32>
    %186 = arith.mulf %184, %185 : vector<16x512xf32>
    %c17_70 = arith.constant 17 : index
    %c0_71 = arith.constant 0 : index
    %c0_72 = arith.constant 0 : index
    %187 = vector.load %arg12[%c17_70, %c0_71, %c0_72] : memref<27x16x512xf32, #tpu.memory_space<vmem>>, vector<1x16x512xf32>
    %188 = vector.shape_cast %187 : vector<1x16x512xf32> to vector<16x512xf32>
    %189 = vector.shape_cast %186 : vector<16x512xf32> to vector<1x16x512xf32>
    tpu.vector_store %arg12[%c17_70, %c0_71, %c0_72], %189 {strides = array<i32>} : memref<27x16x512xf32, #tpu.memory_space<vmem>>, vector<1x16x512xf32>,
    %190 = arith.andi %12, %14 : vector<1x512xi1>
    %191 = arith.andi %190, %18 : vector<1x512xi1>
    %192 = arith.extui %191 : vector<1x512xi1> to vector<1x512xi32>
    %193 = arith.sitofp %192 : vector<1x512xi32> to vector<1x512xf32>
    %c0_73 = arith.constant 0 : index
    %c18 = arith.constant 18 : index
    %194 = vector.load %arg5[%c0_73, %c18] : memref<16x27xf32, #tpu.memory_space<vmem>>, vector<16x1xf32>
    %195 = vector.broadcast %194 : vector<16x1xf32> to vector<16x512xf32>
    %196 = vector.broadcast %193 : vector<1x512xf32> to vector<16x512xf32>
    %197 = arith.mulf %195, %196 : vector<16x512xf32>
    %c18_74 = arith.constant 18 : index
    %c0_75 = arith.constant 0 : index
    %c0_76 = arith.constant 0 : index
    %198 = vector.load %arg12[%c18_74, %c0_75, %c0_76] : memref<27x16x512xf32, #tpu.memory_space<vmem>>, vector<1x16x512xf32>
    %199 = vector.shape_cast %198 : vector<1x16x512xf32> to vector<16x512xf32>
    %200 = vector.shape_cast %197 : vector<16x512xf32> to vector<1x16x512xf32>
    tpu.vector_store %arg12[%c18_74, %c0_75, %c0_76], %200 {strides = array<i32>} : memref<27x16x512xf32, #tpu.memory_space<vmem>>, vector<1x16x512xf32>,
    %201 = arith.andi %12, %14 : vector<1x512xi1>
    %202 = arith.extui %201 : vector<1x512xi1> to vector<1x512xi32>
    %203 = arith.sitofp %202 : vector<1x512xi32> to vector<1x512xf32>
    %c0_77 = arith.constant 0 : index
    %c19 = arith.constant 19 : index
    %204 = vector.load %arg5[%c0_77, %c19] : memref<16x27xf32, #tpu.memory_space<vmem>>, vector<16x1xf32>
    %205 = vector.broadcast %204 : vector<16x1xf32> to vector<16x512xf32>
    %206 = vector.broadcast %203 : vector<1x512xf32> to vector<16x512xf32>
    %207 = arith.mulf %205, %206 : vector<16x512xf32>
    %c19_78 = arith.constant 19 : index
    %c0_79 = arith.constant 0 : index
    %c0_80 = arith.constant 0 : index
    %208 = vector.load %arg12[%c19_78, %c0_79, %c0_80] : memref<27x16x512xf32, #tpu.memory_space<vmem>>, vector<1x16x512xf32>
    %209 = vector.shape_cast %208 : vector<1x16x512xf32> to vector<16x512xf32>
    %210 = vector.shape_cast %207 : vector<16x512xf32> to vector<1x16x512xf32>
    tpu.vector_store %arg12[%c19_78, %c0_79, %c0_80], %210 {strides = array<i32>} : memref<27x16x512xf32, #tpu.memory_space<vmem>>, vector<1x16x512xf32>,
    %211 = arith.andi %12, %14 : vector<1x512xi1>
    %212 = arith.andi %211, %20 : vector<1x512xi1>
    %213 = arith.extui %212 : vector<1x512xi1> to vector<1x512xi32>
    %214 = arith.sitofp %213 : vector<1x512xi32> to vector<1x512xf32>
    %c0_81 = arith.constant 0 : index
    %c20 = arith.constant 20 : index
    %215 = vector.load %arg5[%c0_81, %c20] : memref<16x27xf32, #tpu.memory_space<vmem>>, vector<16x1xf32>
    %216 = vector.broadcast %215 : vector<16x1xf32> to vector<16x512xf32>
    %217 = vector.broadcast %214 : vector<1x512xf32> to vector<16x512xf32>
    %218 = arith.mulf %216, %217 : vector<16x512xf32>
    %c20_82 = arith.constant 20 : index
    %c0_83 = arith.constant 0 : index
    %c0_84 = arith.constant 0 : index
    %219 = vector.load %arg12[%c20_82, %c0_83, %c0_84] : memref<27x16x512xf32, #tpu.memory_space<vmem>>, vector<1x16x512xf32>
    %220 = vector.shape_cast %219 : vector<1x16x512xf32> to vector<16x512xf32>
    %221 = vector.shape_cast %218 : vector<16x512xf32> to vector<1x16x512xf32>
    tpu.vector_store %arg12[%c20_82, %c0_83, %c0_84], %221 {strides = array<i32>} : memref<27x16x512xf32, #tpu.memory_space<vmem>>, vector<1x16x512xf32>,
    %222 = arith.andi %12, %18 : vector<1x512xi1>
    %223 = arith.extui %222 : vector<1x512xi1> to vector<1x512xi32>
    %224 = arith.sitofp %223 : vector<1x512xi32> to vector<1x512xf32>
    %c0_85 = arith.constant 0 : index
    %c21 = arith.constant 21 : index
    %225 = vector.load %arg5[%c0_85, %c21] : memref<16x27xf32, #tpu.memory_space<vmem>>, vector<16x1xf32>
    %226 = vector.broadcast %225 : vector<16x1xf32> to vector<16x512xf32>
    %227 = vector.broadcast %224 : vector<1x512xf32> to vector<16x512xf32>
    %228 = arith.mulf %226, %227 : vector<16x512xf32>
    %c21_86 = arith.constant 21 : index
    %c0_87 = arith.constant 0 : index
    %c0_88 = arith.constant 0 : index
    %229 = vector.load %arg12[%c21_86, %c0_87, %c0_88] : memref<27x16x512xf32, #tpu.memory_space<vmem>>, vector<1x16x512xf32>
    %230 = vector.shape_cast %229 : vector<1x16x512xf32> to vector<16x512xf32>
    %231 = vector.shape_cast %228 : vector<16x512xf32> to vector<1x16x512xf32>
    tpu.vector_store %arg12[%c21_86, %c0_87, %c0_88], %231 {strides = array<i32>} : memref<27x16x512xf32, #tpu.memory_space<vmem>>, vector<1x16x512xf32>,
    %232 = arith.extui %12 : vector<1x512xi1> to vector<1x512xi32>
    %233 = arith.sitofp %232 : vector<1x512xi32> to vector<1x512xf32>
    %c0_89 = arith.constant 0 : index
    %c22 = arith.constant 22 : index
    %234 = vector.load %arg5[%c0_89, %c22] : memref<16x27xf32, #tpu.memory_space<vmem>>, vector<16x1xf32>
    %235 = vector.broadcast %234 : vector<16x1xf32> to vector<16x512xf32>
    %236 = vector.broadcast %233 : vector<1x512xf32> to vector<16x512xf32>
    %237 = arith.mulf %235, %236 : vector<16x512xf32>
    %c22_90 = arith.constant 22 : index
    %c0_91 = arith.constant 0 : index
    %c0_92 = arith.constant 0 : index
    %238 = vector.load %arg12[%c22_90, %c0_91, %c0_92] : memref<27x16x512xf32, #tpu.memory_space<vmem>>, vector<1x16x512xf32>
    %239 = vector.shape_cast %238 : vector<1x16x512xf32> to vector<16x512xf32>
    %240 = vector.shape_cast %237 : vector<16x512xf32> to vector<1x16x512xf32>
    tpu.vector_store %arg12[%c22_90, %c0_91, %c0_92], %240 {strides = array<i32>} : memref<27x16x512xf32, #tpu.memory_space<vmem>>, vector<1x16x512xf32>,
    %241 = arith.andi %12, %20 : vector<1x512xi1>
    %242 = arith.extui %241 : vector<1x512xi1> to vector<1x512xi32>
    %243 = arith.sitofp %242 : vector<1x512xi32> to vector<1x512xf32>
    %c0_93 = arith.constant 0 : index
    %c23 = arith.constant 23 : index
    %244 = vector.load %arg5[%c0_93, %c23] : memref<16x27xf32, #tpu.memory_space<vmem>>, vector<16x1xf32>
    %245 = vector.broadcast %244 : vector<16x1xf32> to vector<16x512xf32>
    %246 = vector.broadcast %243 : vector<1x512xf32> to vector<16x512xf32>
    %247 = arith.mulf %245, %246 : vector<16x512xf32>
    %c23_94 = arith.constant 23 : index
    %c0_95 = arith.constant 0 : index
    %c0_96 = arith.constant 0 : index
    %248 = vector.load %arg12[%c23_94, %c0_95, %c0_96] : memref<27x16x512xf32, #tpu.memory_space<vmem>>, vector<1x16x512xf32>
    %249 = vector.shape_cast %248 : vector<1x16x512xf32> to vector<16x512xf32>
    %250 = vector.shape_cast %247 : vector<16x512xf32> to vector<1x16x512xf32>
    tpu.vector_store %arg12[%c23_94, %c0_95, %c0_96], %250 {strides = array<i32>} : memref<27x16x512xf32, #tpu.memory_space<vmem>>, vector<1x16x512xf32>,
    %251 = arith.andi %12, %16 : vector<1x512xi1>
    %252 = arith.andi %251, %18 : vector<1x512xi1>
    %253 = arith.extui %252 : vector<1x512xi1> to vector<1x512xi32>
    %254 = arith.sitofp %253 : vector<1x512xi32> to vector<1x512xf32>
    %c0_97 = arith.constant 0 : index
    %c24 = arith.constant 24 : index
    %255 = vector.load %arg5[%c0_97, %c24] : memref<16x27xf32, #tpu.memory_space<vmem>>, vector<16x1xf32>
    %256 = vector.broadcast %255 : vector<16x1xf32> to vector<16x512xf32>
    %257 = vector.broadcast %254 : vector<1x512xf32> to vector<16x512xf32>
    %258 = arith.mulf %256, %257 : vector<16x512xf32>
    %c24_98 = arith.constant 24 : index
    %c0_99 = arith.constant 0 : index
    %c0_100 = arith.constant 0 : index
    %259 = vector.load %arg12[%c24_98, %c0_99, %c0_100] : memref<27x16x512xf32, #tpu.memory_space<vmem>>, vector<1x16x512xf32>
    %260 = vector.shape_cast %259 : vector<1x16x512xf32> to vector<16x512xf32>
    %261 = vector.shape_cast %258 : vector<16x512xf32> to vector<1x16x512xf32>
    tpu.vector_store %arg12[%c24_98, %c0_99, %c0_100], %261 {strides = array<i32>} : memref<27x16x512xf32, #tpu.memory_space<vmem>>, vector<1x16x512xf32>,
    %262 = arith.andi %12, %16 : vector<1x512xi1>
    %263 = arith.extui %262 : vector<1x512xi1> to vector<1x512xi32>
    %264 = arith.sitofp %263 : vector<1x512xi32> to vector<1x512xf32>
    %c0_101 = arith.constant 0 : index
    %c25 = arith.constant 25 : index
    %265 = vector.load %arg5[%c0_101, %c25] : memref<16x27xf32, #tpu.memory_space<vmem>>, vector<16x1xf32>
    %266 = vector.broadcast %265 : vector<16x1xf32> to vector<16x512xf32>
    %267 = vector.broadcast %264 : vector<1x512xf32> to vector<16x512xf32>
    %268 = arith.mulf %266, %267 : vector<16x512xf32>
    %c25_102 = arith.constant 25 : index
    %c0_103 = arith.constant 0 : index
    %c0_104 = arith.constant 0 : index
    %269 = vector.load %arg12[%c25_102, %c0_103, %c0_104] : memref<27x16x512xf32, #tpu.memory_space<vmem>>, vector<1x16x512xf32>
    %270 = vector.shape_cast %269 : vector<1x16x512xf32> to vector<16x512xf32>
    %271 = vector.shape_cast %268 : vector<16x512xf32> to vector<1x16x512xf32>
    tpu.vector_store %arg12[%c25_102, %c0_103, %c0_104], %271 {strides = array<i32>} : memref<27x16x512xf32, #tpu.memory_space<vmem>>, vector<1x16x512xf32>,
    %272 = arith.andi %12, %16 : vector<1x512xi1>
    %273 = arith.andi %272, %20 : vector<1x512xi1>
    %274 = arith.extui %273 : vector<1x512xi1> to vector<1x512xi32>
    %275 = arith.sitofp %274 : vector<1x512xi32> to vector<1x512xf32>
    %c0_105 = arith.constant 0 : index
    %c26 = arith.constant 26 : index
    %276 = vector.load %arg5[%c0_105, %c26] : memref<16x27xf32, #tpu.memory_space<vmem>>, vector<16x1xf32>
    %277 = vector.broadcast %276 : vector<16x1xf32> to vector<16x512xf32>
    %278 = vector.broadcast %275 : vector<1x512xf32> to vector<16x512xf32>
    %279 = arith.mulf %277, %278 : vector<16x512xf32>
    %c26_106 = arith.constant 26 : index
    %c0_107 = arith.constant 0 : index
    %c0_108 = arith.constant 0 : index
    %280 = vector.load %arg12[%c26_106, %c0_107, %c0_108] : memref<27x16x512xf32, #tpu.memory_space<vmem>>, vector<1x16x512xf32>
    %281 = vector.shape_cast %280 : vector<1x16x512xf32> to vector<16x512xf32>
    %282 = vector.shape_cast %279 : vector<16x512xf32> to vector<1x16x512xf32>
    tpu.vector_store %arg12[%c26_106, %c0_107, %c0_108], %282 {strides = array<i32>} : memref<27x16x512xf32, #tpu.memory_space<vmem>>, vector<1x16x512xf32>,
    %c0_109 = arith.constant 0 : index
    %c13 = arith.constant 13 : index
    %283 = vector.load %arg5[%c0_109, %c13] : memref<16x27xf32, #tpu.memory_space<vmem>>, vector<16x1xf32>
    %c0_110 = arith.constant 0 : index
    %c0_111 = arith.constant 0 : index
    %284 = vector.load %arg2[%c0_110, %c0_111] : memref<16x4xf32, #tpu.memory_space<vmem>>, vector<16x4xf32>
    %c0_112 = arith.constant 0 : index
    %c0_113 = arith.constant 0 : index
    %285 = vector.load %arg8[%c0_112, %c0_113] : memref<4x16xf32, #tpu.memory_space<vmem>>, vector<4x16xf32>
    %c0_114 = arith.constant 0 : index
    %c0_115 = arith.constant 0 : index
    %286 = vector.load %arg3[%c0_114, %c0_115] : memref<16x1xf32, #tpu.memory_space<vmem>>, vector<16x1xf32>
    %c0_116 = arith.constant 0 : index
    %c0_117 = arith.constant 0 : index
    %287 = vector.load %arg4[%c0_116, %c0_117] : memref<16x1xf32, #tpu.memory_space<vmem>>, vector<16x1xf32>
    %c0_118 = arith.constant 0 : index
    %c0_119 = arith.constant 0 : index
    %288 = vector.load %arg6[%c0_118, %c0_119] : memref<16x1xf32, #tpu.memory_space<vmem>>, vector<16x1xf32>
    %c0_120 = arith.constant 0 : index
    %c0_121 = arith.constant 0 : index
    %289 = vector.load %arg7[%c0_120, %c0_121] : memref<16x1xf32, #tpu.memory_space<vmem>>, vector<16x1xf32>
    %c0_122 = arith.constant 0 : index
    %c0_123 = arith.constant 0 : index
    %290 = vector.load %arg9[%c0_122, %c0_123] : memref<4x1xf32, #tpu.memory_space<vmem>>, vector<4x1xf32>
    %c0_124 = arith.constant 0 : index
    %c0_125 = arith.constant 0 : index
    %291 = vector.load %arg10[%c0_124, %c0_125] : memref<4x1xf32, #tpu.memory_space<vmem>>, vector<4x1xf32>
    %cst = arith.constant 0.001953125 : f32
    %c0_i32 = arith.constant 0 : i32
    %c2_i32 = arith.constant 2 : i32
    %292 = arith.addi %c0_i32, %c2_i32 : i32
    %c1_i32_126 = arith.constant 1 : i32
    scf.for %arg13 = %c0_i32 to %292 step %c1_i32_126  : i32 {
      %293 = arith.index_cast %arg13 : i32 to index
      %c0_128 = arith.constant 0 : index
      %c0_129 = arith.constant 0 : index
      %294 = vector.load %arg1[%293, %c0_128, %c0_129] : memref<2x4x512xf32, #tpu.memory_space<vmem>>, vector<1x4x512xf32>
      %295 = vector.shape_cast %294 : vector<1x4x512xf32> to vector<4x512xf32>
      %cst_130 = arith.constant dense<0.000000e+00> : vector<16x512xf32>
      %296 = tpu.matmul %284, %295, %cst_130 {dimension_numbers = #tpu.dot_dimension_numbers<[1], [0], [0], [1], [0, 0, 1, 1], [], []>} : vector<16x4xf32>, vector<4x512xf32>, vector<16x512xf32> -> vector<16x512xf32>
      %cst_131 = arith.constant dense<0.000000e+00> : vector<16xf32>
      %297 = vector.multi_reduction <add>, %296, %cst_131 [1] : vector<16x512xf32> to vector<16xf32>
      %298 = vector.shape_cast %297 : vector<16xf32> to vector<16x1xf32>
      %299 = vector.broadcast %cst : f32 to vector<16x1xf32>
      %300 = arith.mulf %298, %299 : vector<16x1xf32>
      %301 = vector.broadcast %300 : vector<16x1xf32> to vector<16x512xf32>
      %302 = arith.subf %296, %301 : vector<16x512xf32>
      %303 = arith.mulf %302, %302 : vector<16x512xf32>
      %cst_132 = arith.constant dense<0.000000e+00> : vector<16xf32>
      %304 = vector.multi_reduction <add>, %303, %cst_132 [1] : vector<16x512xf32> to vector<16xf32>
      %305 = vector.shape_cast %304 : vector<16xf32> to vector<16x1xf32>
      %306 = vector.broadcast %cst : f32 to vector<16x1xf32>
      %307 = arith.mulf %305, %306 : vector<16x1xf32>
      %cst_133 = arith.constant 9.99999974E-6 : f32
      %308 = vector.broadcast %cst_133 : f32 to vector<16x1xf32>
      %309 = arith.addf %307, %308 : vector<16x1xf32>
      %310 = math.rsqrt %309 : vector<16x1xf32>
      %311 = arith.mulf %286, %310 : vector<16x1xf32>
      %312 = vector.broadcast %311 : vector<16x1xf32> to vector<16x512xf32>
      %313 = arith.mulf %302, %312 : vector<16x512xf32>
      %314 = vector.broadcast %287 : vector<16x1xf32> to vector<16x512xf32>
      %315 = arith.addf %313, %314 : vector<16x512xf32>
      %cst_134 = arith.constant 0.000000e+00 : f32
      %316 = vector.broadcast %cst_134 : f32 to vector<16x512xf32>
      %317 = arith.maximumf %315, %316 : vector<16x512xf32>
      %318 = vector.broadcast %283 : vector<16x1xf32> to vector<16x512xf32>
      %319 = arith.mulf %317, %318 : vector<16x512xf32>
      %c73_i32 = arith.constant 73 : i32
      %320 = tpu.dynamic_rotate %317 by %c73_i32 dim 1 : vector<16x512xf32>, i32 -> vector<16x512xf32>
      %c0_135 = arith.constant 0 : index
      %c0_136 = arith.constant 0 : index
      %c0_137 = arith.constant 0 : index
      %321 = vector.load %arg12[%c0_135, %c0_136, %c0_137] : memref<27x16x512xf32, #tpu.memory_space<vmem>>, vector<1x16x512xf32>
      %322 = vector.shape_cast %321 : vector<1x16x512xf32> to vector<16x512xf32>
      %323 = arith.mulf %320, %322 : vector<16x512xf32>
      %324 = arith.addf %319, %323 : vector<16x512xf32>
      %c72_i32 = arith.constant 72 : i32
      %325 = tpu.dynamic_rotate %317 by %c72_i32 dim 1 : vector<16x512xf32>, i32 -> vector<16x512xf32>
      %c1_138 = arith.constant 1 : index
      %c0_139 = arith.constant 0 : index
      %c0_140 = arith.constant 0 : index
      %326 = vector.load %arg12[%c1_138, %c0_139, %c0_140] : memref<27x16x512xf32, #tpu.memory_space<vmem>>, vector<1x16x512xf32>
      %327 = vector.shape_cast %326 : vector<1x16x512xf32> to vector<16x512xf32>
      %328 = arith.mulf %325, %327 : vector<16x512xf32>
      %329 = arith.addf %324, %328 : vector<16x512xf32>
      %c71_i32 = arith.constant 71 : i32
      %330 = tpu.dynamic_rotate %317 by %c71_i32 dim 1 : vector<16x512xf32>, i32 -> vector<16x512xf32>
      %c2_141 = arith.constant 2 : index
      %c0_142 = arith.constant 0 : index
      %c0_143 = arith.constant 0 : index
      %331 = vector.load %arg12[%c2_141, %c0_142, %c0_143] : memref<27x16x512xf32, #tpu.memory_space<vmem>>, vector<1x16x512xf32>
      %332 = vector.shape_cast %331 : vector<1x16x512xf32> to vector<16x512xf32>
      %333 = arith.mulf %330, %332 : vector<16x512xf32>
      %334 = arith.addf %329, %333 : vector<16x512xf32>
      %c65_i32 = arith.constant 65 : i32
      %335 = tpu.dynamic_rotate %317 by %c65_i32 dim 1 : vector<16x512xf32>, i32 -> vector<16x512xf32>
      %c3_144 = arith.constant 3 : index
      %c0_145 = arith.constant 0 : index
      %c0_146 = arith.constant 0 : index
      %336 = vector.load %arg12[%c3_144, %c0_145, %c0_146] : memref<27x16x512xf32, #tpu.memory_space<vmem>>, vector<1x16x512xf32>
      %337 = vector.shape_cast %336 : vector<1x16x512xf32> to vector<16x512xf32>
      %338 = arith.mulf %335, %337 : vector<16x512xf32>
      %339 = arith.addf %334, %338 : vector<16x512xf32>
      %c64_i32 = arith.constant 64 : i32
      %340 = tpu.dynamic_rotate %317 by %c64_i32 dim 1 : vector<16x512xf32>, i32 -> vector<16x512xf32>
      %c4_147 = arith.constant 4 : index
      %c0_148 = arith.constant 0 : index
      %c0_149 = arith.constant 0 : index
      %341 = vector.load %arg12[%c4_147, %c0_148, %c0_149] : memref<27x16x512xf32, #tpu.memory_space<vmem>>, vector<1x16x512xf32>
      %342 = vector.shape_cast %341 : vector<1x16x512xf32> to vector<16x512xf32>
      %343 = arith.mulf %340, %342 : vector<16x512xf32>
      %344 = arith.addf %339, %343 : vector<16x512xf32>
      %c63_i32_150 = arith.constant 63 : i32
      %345 = tpu.dynamic_rotate %317 by %c63_i32_150 dim 1 : vector<16x512xf32>, i32 -> vector<16x512xf32>
      %c5_151 = arith.constant 5 : index
      %c0_152 = arith.constant 0 : index
      %c0_153 = arith.constant 0 : index
      %346 = vector.load %arg12[%c5_151, %c0_152, %c0_153] : memref<27x16x512xf32, #tpu.memory_space<vmem>>, vector<1x16x512xf32>
      %347 = vector.shape_cast %346 : vector<1x16x512xf32> to vector<16x512xf32>
      %348 = arith.mulf %345, %347 : vector<16x512xf32>
      %349 = arith.addf %344, %348 : vector<16x512xf32>
      %c57_i32 = arith.constant 57 : i32
      %350 = tpu.dynamic_rotate %317 by %c57_i32 dim 1 : vector<16x512xf32>, i32 -> vector<16x512xf32>
      %c6_154 = arith.constant 6 : index
      %c0_155 = arith.constant 0 : index
      %c0_156 = arith.constant 0 : index
      %351 = vector.load %arg12[%c6_154, %c0_155, %c0_156] : memref<27x16x512xf32, #tpu.memory_space<vmem>>, vector<1x16x512xf32>
      %352 = vector.shape_cast %351 : vector<1x16x512xf32> to vector<16x512xf32>
      %353 = arith.mulf %350, %352 : vector<16x512xf32>
      %354 = arith.addf %349, %353 : vector<16x512xf32>
      %c56_i32 = arith.constant 56 : i32
      %355 = tpu.dynamic_rotate %317 by %c56_i32 dim 1 : vector<16x512xf32>, i32 -> vector<16x512xf32>
      %c7_157 = arith.constant 7 : index
      %c0_158 = arith.constant 0 : index
      %c0_159 = arith.constant 0 : index
      %356 = vector.load %arg12[%c7_157, %c0_158, %c0_159] : memref<27x16x512xf32, #tpu.memory_space<vmem>>, vector<1x16x512xf32>
      %357 = vector.shape_cast %356 : vector<1x16x512xf32> to vector<16x512xf32>
      %358 = arith.mulf %355, %357 : vector<16x512xf32>
      %359 = arith.addf %354, %358 : vector<16x512xf32>
      %c55_i32 = arith.constant 55 : i32
      %360 = tpu.dynamic_rotate %317 by %c55_i32 dim 1 : vector<16x512xf32>, i32 -> vector<16x512xf32>
      %c8_160 = arith.constant 8 : index
      %c0_161 = arith.constant 0 : index
      %c0_162 = arith.constant 0 : index
      %361 = vector.load %arg12[%c8_160, %c0_161, %c0_162] : memref<27x16x512xf32, #tpu.memory_space<vmem>>, vector<1x16x512xf32>
      %362 = vector.shape_cast %361 : vector<1x16x512xf32> to vector<16x512xf32>
      %363 = arith.mulf %360, %362 : vector<16x512xf32>
      %364 = arith.addf %359, %363 : vector<16x512xf32>
      %c9_i32 = arith.constant 9 : i32
      %365 = tpu.dynamic_rotate %317 by %c9_i32 dim 1 : vector<16x512xf32>, i32 -> vector<16x512xf32>
      %c9_163 = arith.constant 9 : index
      %c0_164 = arith.constant 0 : index
      %c0_165 = arith.constant 0 : index
      %366 = vector.load %arg12[%c9_163, %c0_164, %c0_165] : memref<27x16x512xf32, #tpu.memory_space<vmem>>, vector<1x16x512xf32>
      %367 = vector.shape_cast %366 : vector<1x16x512xf32> to vector<16x512xf32>
      %368 = arith.mulf %365, %367 : vector<16x512xf32>
      %369 = arith.addf %364, %368 : vector<16x512xf32>
      %c8_i32 = arith.constant 8 : i32
      %370 = tpu.dynamic_rotate %317 by %c8_i32 dim 1 : vector<16x512xf32>, i32 -> vector<16x512xf32>
      %c10_166 = arith.constant 10 : index
      %c0_167 = arith.constant 0 : index
      %c0_168 = arith.constant 0 : index
      %371 = vector.load %arg12[%c10_166, %c0_167, %c0_168] : memref<27x16x512xf32, #tpu.memory_space<vmem>>, vector<1x16x512xf32>
      %372 = vector.shape_cast %371 : vector<1x16x512xf32> to vector<16x512xf32>
      %373 = arith.mulf %370, %372 : vector<16x512xf32>
      %374 = arith.addf %369, %373 : vector<16x512xf32>
      %c7_i32_169 = arith.constant 7 : i32
      %375 = tpu.dynamic_rotate %317 by %c7_i32_169 dim 1 : vector<16x512xf32>, i32 -> vector<16x512xf32>
      %c11_170 = arith.constant 11 : index
      %c0_171 = arith.constant 0 : index
      %c0_172 = arith.constant 0 : index
      %376 = vector.load %arg12[%c11_170, %c0_171, %c0_172] : memref<27x16x512xf32, #tpu.memory_space<vmem>>, vector<1x16x512xf32>
      %377 = vector.shape_cast %376 : vector<1x16x512xf32> to vector<16x512xf32>
      %378 = arith.mulf %375, %377 : vector<16x512xf32>
      %379 = arith.addf %374, %378 : vector<16x512xf32>
      %c1_i32_173 = arith.constant 1 : i32
      %380 = tpu.dynamic_rotate %317 by %c1_i32_173 dim 1 : vector<16x512xf32>, i32 -> vector<16x512xf32>
      %c12_174 = arith.constant 12 : index
      %c0_175 = arith.constant 0 : index
      %c0_176 = arith.constant 0 : index
      %381 = vector.load %arg12[%c12_174, %c0_175, %c0_176] : memref<27x16x512xf32, #tpu.memory_space<vmem>>, vector<1x16x512xf32>
      %382 = vector.shape_cast %381 : vector<1x16x512xf32> to vector<16x512xf32>
      %383 = arith.mulf %380, %382 : vector<16x512xf32>
      %384 = arith.addf %379, %383 : vector<16x512xf32>
      %c511_i32 = arith.constant 511 : i32
      %385 = tpu.dynamic_rotate %317 by %c511_i32 dim 1 : vector<16x512xf32>, i32 -> vector<16x512xf32>
      %c14_177 = arith.constant 14 : index
      %c0_178 = arith.constant 0 : index
      %c0_179 = arith.constant 0 : index
      %386 = vector.load %arg12[%c14_177, %c0_178, %c0_179] : memref<27x16x512xf32, #tpu.memory_space<vmem>>, vector<1x16x512xf32>
      %387 = vector.shape_cast %386 : vector<1x16x512xf32> to vector<16x512xf32>
      %388 = arith.mulf %385, %387 : vector<16x512xf32>
      %389 = arith.addf %384, %388 : vector<16x512xf32>
      %c505_i32 = arith.constant 505 : i32
      %390 = tpu.dynamic_rotate %317 by %c505_i32 dim 1 : vector<16x512xf32>, i32 -> vector<16x512xf32>
      %c15_180 = arith.constant 15 : index
      %c0_181 = arith.constant 0 : index
      %c0_182 = arith.constant 0 : index
      %391 = vector.load %arg12[%c15_180, %c0_181, %c0_182] : memref<27x16x512xf32, #tpu.memory_space<vmem>>, vector<1x16x512xf32>
      %392 = vector.shape_cast %391 : vector<1x16x512xf32> to vector<16x512xf32>
      %393 = arith.mulf %390, %392 : vector<16x512xf32>
      %394 = arith.addf %389, %393 : vector<16x512xf32>
      %c504_i32 = arith.constant 504 : i32
      %395 = tpu.dynamic_rotate %317 by %c504_i32 dim 1 : vector<16x512xf32>, i32 -> vector<16x512xf32>
      %c16_183 = arith.constant 16 : index
      %c0_184 = arith.constant 0 : index
      %c0_185 = arith.constant 0 : index
      %396 = vector.load %arg12[%c16_183, %c0_184, %c0_185] : memref<27x16x512xf32, #tpu.memory_space<vmem>>, vector<1x16x512xf32>
      %397 = vector.shape_cast %396 : vector<1x16x512xf32> to vector<16x512xf32>
      %398 = arith.mulf %395, %397 : vector<16x512xf32>
      %399 = arith.addf %394, %398 : vector<16x512xf32>
      %c503_i32 = arith.constant 503 : i32
      %400 = tpu.dynamic_rotate %317 by %c503_i32 dim 1 : vector<16x512xf32>, i32 -> vector<16x512xf32>
      %c17_186 = arith.constant 17 : index
      %c0_187 = arith.constant 0 : index
      %c0_188 = arith.constant 0 : index
      %401 = vector.load %arg12[%c17_186, %c0_187, %c0_188] : memref<27x16x512xf32, #tpu.memory_space<vmem>>, vector<1x16x512xf32>
      %402 = vector.shape_cast %401 : vector<1x16x512xf32> to vector<16x512xf32>
      %403 = arith.mulf %400, %402 : vector<16x512xf32>
      %404 = arith.addf %399, %403 : vector<16x512xf32>
      %c457_i32 = arith.constant 457 : i32
      %405 = tpu.dynamic_rotate %317 by %c457_i32 dim 1 : vector<16x512xf32>, i32 -> vector<16x512xf32>
      %c18_189 = arith.constant 18 : index
      %c0_190 = arith.constant 0 : index
      %c0_191 = arith.constant 0 : index
      %406 = vector.load %arg12[%c18_189, %c0_190, %c0_191] : memref<27x16x512xf32, #tpu.memory_space<vmem>>, vector<1x16x512xf32>
      %407 = vector.shape_cast %406 : vector<1x16x512xf32> to vector<16x512xf32>
      %408 = arith.mulf %405, %407 : vector<16x512xf32>
      %409 = arith.addf %404, %408 : vector<16x512xf32>
      %c456_i32 = arith.constant 456 : i32
      %410 = tpu.dynamic_rotate %317 by %c456_i32 dim 1 : vector<16x512xf32>, i32 -> vector<16x512xf32>
      %c19_192 = arith.constant 19 : index
      %c0_193 = arith.constant 0 : index
      %c0_194 = arith.constant 0 : index
      %411 = vector.load %arg12[%c19_192, %c0_193, %c0_194] : memref<27x16x512xf32, #tpu.memory_space<vmem>>, vector<1x16x512xf32>
      %412 = vector.shape_cast %411 : vector<1x16x512xf32> to vector<16x512xf32>
      %413 = arith.mulf %410, %412 : vector<16x512xf32>
      %414 = arith.addf %409, %413 : vector<16x512xf32>
      %c455_i32 = arith.constant 455 : i32
      %415 = tpu.dynamic_rotate %317 by %c455_i32 dim 1 : vector<16x512xf32>, i32 -> vector<16x512xf32>
      %c20_195 = arith.constant 20 : index
      %c0_196 = arith.constant 0 : index
      %c0_197 = arith.constant 0 : index
      %416 = vector.load %arg12[%c20_195, %c0_196, %c0_197] : memref<27x16x512xf32, #tpu.memory_space<vmem>>, vector<1x16x512xf32>
      %417 = vector.shape_cast %416 : vector<1x16x512xf32> to vector<16x512xf32>
      %418 = arith.mulf %415, %417 : vector<16x512xf32>
      %419 = arith.addf %414, %418 : vector<16x512xf32>
      %c449_i32 = arith.constant 449 : i32
      %420 = tpu.dynamic_rotate %317 by %c449_i32 dim 1 : vector<16x512xf32>, i32 -> vector<16x512xf32>
      %c21_198 = arith.constant 21 : index
      %c0_199 = arith.constant 0 : index
      %c0_200 = arith.constant 0 : index
      %421 = vector.load %arg12[%c21_198, %c0_199, %c0_200] : memref<27x16x512xf32, #tpu.memory_space<vmem>>, vector<1x16x512xf32>
      %422 = vector.shape_cast %421 : vector<1x16x512xf32> to vector<16x512xf32>
      %423 = arith.mulf %420, %422 : vector<16x512xf32>
      %424 = arith.addf %419, %423 : vector<16x512xf32>
      %c448_i32 = arith.constant 448 : i32
      %425 = tpu.dynamic_rotate %317 by %c448_i32 dim 1 : vector<16x512xf32>, i32 -> vector<16x512xf32>
      %c22_201 = arith.constant 22 : index
      %c0_202 = arith.constant 0 : index
      %c0_203 = arith.constant 0 : index
      %426 = vector.load %arg12[%c22_201, %c0_202, %c0_203] : memref<27x16x512xf32, #tpu.memory_space<vmem>>, vector<1x16x512xf32>
      %427 = vector.shape_cast %426 : vector<1x16x512xf32> to vector<16x512xf32>
      %428 = arith.mulf %425, %427 : vector<16x512xf32>
      %429 = arith.addf %424, %428 : vector<16x512xf32>
      %c447_i32 = arith.constant 447 : i32
      %430 = tpu.dynamic_rotate %317 by %c447_i32 dim 1 : vector<16x512xf32>, i32 -> vector<16x512xf32>
      %c23_204 = arith.constant 23 : index
      %c0_205 = arith.constant 0 : index
      %c0_206 = arith.constant 0 : index
      %431 = vector.load %arg12[%c23_204, %c0_205, %c0_206] : memref<27x16x512xf32, #tpu.memory_space<vmem>>, vector<1x16x512xf32>
      %432 = vector.shape_cast %431 : vector<1x16x512xf32> to vector<16x512xf32>
      %433 = arith.mulf %430, %432 : vector<16x512xf32>
      %434 = arith.addf %429, %433 : vector<16x512xf32>
      %c441_i32 = arith.constant 441 : i32
      %435 = tpu.dynamic_rotate %317 by %c441_i32 dim 1 : vector<16x512xf32>, i32 -> vector<16x512xf32>
      %c24_207 = arith.constant 24 : index
      %c0_208 = arith.constant 0 : index
      %c0_209 = arith.constant 0 : index
      %436 = vector.load %arg12[%c24_207, %c0_208, %c0_209] : memref<27x16x512xf32, #tpu.memory_space<vmem>>, vector<1x16x512xf32>
      %437 = vector.shape_cast %436 : vector<1x16x512xf32> to vector<16x512xf32>
      %438 = arith.mulf %435, %437 : vector<16x512xf32>
      %439 = arith.addf %434, %438 : vector<16x512xf32>
      %c440_i32 = arith.constant 440 : i32
      %440 = tpu.dynamic_rotate %317 by %c440_i32 dim 1 : vector<16x512xf32>, i32 -> vector<16x512xf32>
      %c25_210 = arith.constant 25 : index
      %c0_211 = arith.constant 0 : index
      %c0_212 = arith.constant 0 : index
      %441 = vector.load %arg12[%c25_210, %c0_211, %c0_212] : memref<27x16x512xf32, #tpu.memory_space<vmem>>, vector<1x16x512xf32>
      %442 = vector.shape_cast %441 : vector<1x16x512xf32> to vector<16x512xf32>
      %443 = arith.mulf %440, %442 : vector<16x512xf32>
      %444 = arith.addf %439, %443 : vector<16x512xf32>
      %c439_i32 = arith.constant 439 : i32
      %445 = tpu.dynamic_rotate %317 by %c439_i32 dim 1 : vector<16x512xf32>, i32 -> vector<16x512xf32>
      %c26_213 = arith.constant 26 : index
      %c0_214 = arith.constant 0 : index
      %c0_215 = arith.constant 0 : index
      %446 = vector.load %arg12[%c26_213, %c0_214, %c0_215] : memref<27x16x512xf32, #tpu.memory_space<vmem>>, vector<1x16x512xf32>
      %447 = vector.shape_cast %446 : vector<1x16x512xf32> to vector<16x512xf32>
      %448 = arith.mulf %445, %447 : vector<16x512xf32>
      %449 = arith.addf %444, %448 : vector<16x512xf32>
      %cst_216 = arith.constant dense<0.000000e+00> : vector<16xf32>
      %450 = vector.multi_reduction <add>, %449, %cst_216 [1] : vector<16x512xf32> to vector<16xf32>
      %451 = vector.shape_cast %450 : vector<16xf32> to vector<16x1xf32>
      %452 = vector.broadcast %cst : f32 to vector<16x1xf32>
      %453 = arith.mulf %451, %452 : vector<16x1xf32>
      %454 = vector.broadcast %453 : vector<16x1xf32> to vector<16x512xf32>
      %455 = arith.subf %449, %454 : vector<16x512xf32>
      %456 = arith.mulf %455, %455 : vector<16x512xf32>
      %cst_217 = arith.constant dense<0.000000e+00> : vector<16xf32>
      %457 = vector.multi_reduction <add>, %456, %cst_217 [1] : vector<16x512xf32> to vector<16xf32>
      %458 = vector.shape_cast %457 : vector<16xf32> to vector<16x1xf32>
      %459 = vector.broadcast %cst : f32 to vector<16x1xf32>
      %460 = arith.mulf %458, %459 : vector<16x1xf32>
      %cst_218 = arith.constant 9.99999974E-6 : f32
      %461 = vector.broadcast %cst_218 : f32 to vector<16x1xf32>
      %462 = arith.addf %460, %461 : vector<16x1xf32>
      %463 = math.rsqrt %462 : vector<16x1xf32>
      %464 = arith.mulf %288, %463 : vector<16x1xf32>
      %465 = vector.broadcast %464 : vector<16x1xf32> to vector<16x512xf32>
      %466 = arith.mulf %455, %465 : vector<16x512xf32>
      %467 = vector.broadcast %289 : vector<16x1xf32> to vector<16x512xf32>
      %468 = arith.addf %466, %467 : vector<16x512xf32>
      %cst_219 = arith.constant 0.000000e+00 : f32
      %469 = vector.broadcast %cst_219 : f32 to vector<16x512xf32>
      %470 = arith.maximumf %468, %469 : vector<16x512xf32>
      %cst_220 = arith.constant dense<0.000000e+00> : vector<4x512xf32>
      %471 = tpu.matmul %285, %470, %cst_220 {dimension_numbers = #tpu.dot_dimension_numbers<[1], [0], [0], [1], [0, 0, 1, 1], [], []>} : vector<4x16xf32>, vector<16x512xf32>, vector<4x512xf32> -> vector<4x512xf32>
      %cst_221 = arith.constant dense<0.000000e+00> : vector<4xf32>
      %472 = vector.multi_reduction <add>, %471, %cst_221 [1] : vector<4x512xf32> to vector<4xf32>
      %473 = vector.shape_cast %472 : vector<4xf32> to vector<4x1xf32>
      %474 = vector.broadcast %cst : f32 to vector<4x1xf32>
      %475 = arith.mulf %473, %474 : vector<4x1xf32>
      %476 = vector.broadcast %475 : vector<4x1xf32> to vector<4x512xf32>
      %477 = arith.subf %471, %476 : vector<4x512xf32>
      %478 = arith.mulf %477, %477 : vector<4x512xf32>
      %cst_222 = arith.constant dense<0.000000e+00> : vector<4xf32>
      %479 = vector.multi_reduction <add>, %478, %cst_222 [1] : vector<4x512xf32> to vector<4xf32>
      %480 = vector.shape_cast %479 : vector<4xf32> to vector<4x1xf32>
      %481 = vector.broadcast %cst : f32 to vector<4x1xf32>
      %482 = arith.mulf %480, %481 : vector<4x1xf32>
      %cst_223 = arith.constant 9.99999974E-6 : f32
      %483 = vector.broadcast %cst_223 : f32 to vector<4x1xf32>
      %484 = arith.addf %482, %483 : vector<4x1xf32>
      %485 = math.rsqrt %484 : vector<4x1xf32>
      %486 = arith.mulf %290, %485 : vector<4x1xf32>
      %487 = vector.broadcast %486 : vector<4x1xf32> to vector<4x512xf32>
      %488 = arith.mulf %477, %487 : vector<4x512xf32>
      %489 = vector.broadcast %291 : vector<4x1xf32> to vector<4x512xf32>
      %490 = arith.addf %488, %489 : vector<4x512xf32>
      %491 = arith.addf %490, %295 : vector<4x512xf32>
      %492 = arith.index_cast %arg13 : i32 to index
      %c0_224 = arith.constant 0 : index
      %c0_225 = arith.constant 0 : index
      %493 = vector.load %arg11[%492, %c0_224, %c0_225] : memref<2x4x512xf32, #tpu.memory_space<vmem>>, vector<1x4x512xf32>
      %494 = vector.shape_cast %493 : vector<1x4x512xf32> to vector<4x512xf32>
      %495 = vector.shape_cast %491 : vector<4x512xf32> to vector<1x4x512xf32>
      tpu.vector_store %arg11[%492, %c0_224, %c0_225], %495 {strides = array<i32>} : memref<2x4x512xf32, #tpu.memory_space<vmem>>, vector<1x4x512xf32>,
    }
    %c2_i32_127 = arith.constant 2 : i32
    return
  }
  func.func @transform_0(%arg0: i32) -> (i32, i32, i32) {
    %c0_i32 = arith.constant 0 : i32
    %c0_i32_0 = arith.constant 0 : i32
    %c0_i32_1 = arith.constant 0 : i32
    return %arg0, %c0_i32, %c0_i32_0 : i32, i32, i32
  }
  func.func @transform_1(%arg0: i32) -> (i32, i32) {
    %c0_i32 = arith.constant 0 : i32
    %c0_i32_0 = arith.constant 0 : i32
    %c0_i32_1 = arith.constant 0 : i32
    return %c0_i32, %c0_i32_0 : i32, i32
  }
  func.func @transform_2(%arg0: i32) -> (i32, i32) {
    %c0_i32 = arith.constant 0 : i32
    %c0_i32_0 = arith.constant 0 : i32
    %c0_i32_1 = arith.constant 0 : i32
    return %c0_i32, %c0_i32_0 : i32, i32
  }
  func.func @transform_3(%arg0: i32) -> (i32, i32) {
    %c0_i32 = arith.constant 0 : i32
    %c0_i32_0 = arith.constant 0 : i32
    %c0_i32_1 = arith.constant 0 : i32
    return %c0_i32, %c0_i32_0 : i32, i32
  }
  func.func @transform_4(%arg0: i32) -> (i32, i32) {
    %c0_i32 = arith.constant 0 : i32
    %c0_i32_0 = arith.constant 0 : i32
    %c0_i32_1 = arith.constant 0 : i32
    return %c0_i32, %c0_i32_0 : i32, i32
  }
  func.func @transform_5(%arg0: i32) -> (i32, i32) {
    %c0_i32 = arith.constant 0 : i32
    %c0_i32_0 = arith.constant 0 : i32
    %c0_i32_1 = arith.constant 0 : i32
    return %c0_i32, %c0_i32_0 : i32, i32
  }
  func.func @transform_6(%arg0: i32) -> (i32, i32) {
    %c0_i32 = arith.constant 0 : i32
    %c0_i32_0 = arith.constant 0 : i32
    %c0_i32_1 = arith.constant 0 : i32
    return %c0_i32, %c0_i32_0 : i32, i32
  }
  func.func @transform_7(%arg0: i32) -> (i32, i32) {
    %c0_i32 = arith.constant 0 : i32
    %c0_i32_0 = arith.constant 0 : i32
    %c0_i32_1 = arith.constant 0 : i32
    return %c0_i32, %c0_i32_0 : i32, i32
  }
  func.func @transform_8(%arg0: i32) -> (i32, i32) {
    %c0_i32 = arith.constant 0 : i32
    %c0_i32_0 = arith.constant 0 : i32
    %c0_i32_1 = arith.constant 0 : i32
    return %c0_i32, %c0_i32_0 : i32, i32
  }
  func.func @transform_9(%arg0: i32) -> (i32, i32) {
    %c0_i32 = arith.constant 0 : i32
    %c0_i32_0 = arith.constant 0 : i32
    %c0_i32_1 = arith.constant 0 : i32
    return %c0_i32, %c0_i32_0 : i32, i32
  }
  func.func @transform_10(%arg0: i32) -> (i32, i32, i32) {
    %c0_i32 = arith.constant 0 : i32
    %c0_i32_0 = arith.constant 0 : i32
    %c0_i32_1 = arith.constant 0 : i32
    return %arg0, %c0_i32, %c0_i32_0 : i32, i32, i32
  }
}

</mosaic_0001>

<bundles_post_ra>
// kernel: tpu_custom_call.1
= control target key start
LH: loop header
LB: loop body
LE: loop exit
PB: predicated region body
PF: predicated region fallthrough
CT: control target
= control target key end

     0   :  { %s6587_s0 = inlined_call_operand.vmem [shape: f32[4,4,512], index: 0, kind: input, shape index: {}]   ;;  %s6588_s1 = inlined_call_operand.vmem [shape: f32[16,4], index: 1, kind: input, shape index: {}]   ;;  %s6589_s2 = inlined_call_operand.vmem [shape: f32[16,1], index: 2, kind: input, shape index: {}]   ;;  %s6590_s3 = inlined_call_operand.vmem [shape: f32[16,1], index: 3, kind: input, shape index: {}]   ;;  %s6591_s4 = inlined_call_operand.vmem [shape: f32[16,27], index: 4, kind: input, shape index: {}]   ;;  %s6592_s5 = inlined_call_operand.vmem [shape: f32[16,1], index: 5, kind: input, shape index: {}]   ;;  %s6593_s6 = inlined_call_operand.vmem [shape: f32[16,1], index: 6, kind: input, shape index: {}]   ;;  %s6594_s7 = inlined_call_operand.vmem [shape: f32[4,16], index: 7, kind: input, shape index: {}]   ;;  %s6595_s8 = inlined_call_operand.vmem [shape: f32[4,1], index: 8, kind: input, shape index: {}]   ;;  %s6596_s9 = inlined_call_operand.vmem [shape: f32[4,1], index: 9, kind: input, shape index: {}]   ;;  %s6597_s10 = inlined_call_operand.hbm [shape: f32[4,4,512], index: 10, kind: output, shape index: {}]  }
   0x1   :  { %6740 = sst [smem:[#allocation87_spill]] %s6587_s0 }
   0x2   :  { %6741 = sst [smem:[#allocation88_spill]] %s6588_s1 }
   0x3   :  { %6742 = sst [smem:[#allocation89_spill]] %s6589_s2 }
   0x4   :  { %6743 = sst [smem:[#allocation90_spill]] %s6590_s3 }
   0x5   :  { %6744 = sst [smem:[#allocation91_spill]] %s6591_s4 }
   0x6   :  { %6745 = sst [smem:[#allocation92_spill]] %s6592_s5 }
   0x7   :  { %6746 = sst [smem:[#allocation93_spill]] %s6593_s6 }
   0x8   :  { %6747 = sst [smem:[#allocation94_spill]] %s6594_s7 }
   0x9   :  { %6748 = sst [smem:[#allocation95_spill]] %s6595_s8 }
   0xa   :  { %6749 = sst [smem:[#allocation96_spill]] %s6596_s9 }
   0xb   :  { %15 = vsyncpa [#allocation4], 0 }
   0xc   :  { %17 = vsyncpa [#allocation4 + $0x1], 0  ;;  %s3664_s13 = smov 0   ;;  %s3666_s14 = smov 0  }
   0xd   :  { %s3668_s15 = smov 0   ;;  %s3670_s16 = smov 0  }
   0xe LB: > { %s3685_s17 = sadd.s32 4294967295, %s3553_s16   ;;  %s3196_s18 = sadd.s32 4294967294, %s3553_s16   ;;  %s3553_s16 = sphi %s3670_s16, %s7266_s16   ;;  %s3549_s15 = sphi %s3668_s15, %s7265_s15   ;;  %s3545_s14 = sphi %s3666_s14, %s7264_s14   ;;  %s3541_s13 = sphi %s3664_s13, %s7263_s13  }
   0xf   : > { %s3689_s19 = sadd.s32 1, %s3553_s16   ;;  %s245_s20 = sadd.s32 1, %s3549_s15 }
  0x10   : > { %s242_s21 = ssub.s32 %s3553_s16, %s3689_s19  ;;  %p255_p0 = scmp.ne.s32.totalorder %s3549_s15, %s3545_s14 }
  0x11   : > { %p243_p1 = scmp.eq.s32.totalorder %s242_s21, 0  ;;  %p256_p2 = scmp.eq.s32.totalorder %s3685_s17, 1 }
  0x12   : > { %p261_p3 = scmp.ne.s32.totalorder %s3545_s14, %s3541_s13  ;;  %p262_p4 = scmp.eq.s32.totalorder %s3196_s18, 1 }
  0x13   : > { %s3700_s22 = scalar_select %p243_p1, %s3549_s15, %s245_s20  }
  0x14   : > { %p3702_p5 = por %p256_p2, %p255_p0  ;;  %p3706_p6 = por %p262_p4, %p261_p3 }
  0x15   : > { %p3199_p7 = scmp.ge.s32.totalorder %s3553_s16, 1  ;;  %p317_p8 = scmp.lt.s32.totalorder %s3553_s16, 3 }
  0x17   : > { %p318_p9 = pnand %p3199_p7, %p317_p8 }
  0x19   : > { %321 = sbr.rel (%p318_p9) target bundleno = 2493 (0x9bd), region = 60 }
  0x1e   : > { %s6752_s4 = sld [smem:[#allocation91_spill]]  ;;  %v3559_v1 = vmov 1   ;;  %v3560_v3 = vmov 0   ;;  %v3561_v4 = vmov 2   ;;  %v3562_v5 = vmov 3   ;;  %s3201_s29 = sshll.u32 %s3685_s17, 1 }
  0x1f   : > { %3429 = vset.pattern.permute.xlu1 %v3559_v1  ;;  %3428 = vset.pattern.permute.xlu0 %v3560_v3  ;;  %v3563_v6 = vmov 4   ;;  %v3564_v7 = vmov 5   ;;  %v3565_v8 = vmov 6   ;;  %v3566_v9 = vmov 8   ;;  %p357_p10 = scmp.lt.s32.totalorder %s3201_s29, 3  ;;  %s6616_s30 = sand.u32 1, %s3545_s14  }
  0x20   : > { %v3567_v10 = vmov 9   ;;  %v3568_v11 = vmov 7   ;;  %v3569_v12 = vmov 11   ;;  %v3570_v13 = vmov 12   ;;  %s4246_s11 = sshll.u32 %s6616_s30, 5  ;;  %s6855_s0 = sld [smem:[#allocation87_spill]] }
  0x21   : > { %v3571_v14 = vmov 15   ;;  %v3572_v15 = vmov 16   ;;  %v3573_v16 = vmov 10   ;;  %v3574_v17 = vmov 18   ;;  %s7268_s29 = smov (!%p357_p10, %s3201_s29), 3  ;;  %s6858_s1 = sld [smem:[#allocation88_spill]] }
  0x22   : > { %v3575_v18 = vmov 19   ;;  %v3576_v19 = vmov 21   ;;  %v3577_v20 = vmov 14   ;;  %v3578_v21 = vmov 22   ;;  %s3327_s12 = sshll.u32 %s7268_s29, 4  ;;  %s6861_s7 = sld [smem:[#allocation94_spill]] }
  0x23   : > { %v3579_v22 = vmov 24   ;;  %v3580_v23 = vmov 25   ;;  %v3581_v24 = vmov 26   ;;  %v364_v25 = vlaneseq  ;;  %s6863_s2 = sld [smem:[#allocation89_spill]]  ;;  %s5024_s28 = smov 0  }
  0x24   : > { %v3715_v0 = vld [vmem:[%s6752_s4] sm:$0xff]  ;;  %v3721_v2 = vld [vmem:[%s6752_s4 + $0x8] sm:$0xff]  ;;  %v3582_v26 = vmov 17   ;;  %v3583_v46 = vmov 20   ;;  %v6760_v47 = vmov 0  ;;  %v6617_v59 = vmov 0.0  }
  0x25   : > { %465 = vperm.xlu1 %3429, %v3715_v0   ;;  %429 = vperm.xlu0 %3428, %v3715_v0   ;;  %v3766_v27 = vand.u32 127, %v364_v25  ;;  %s6866_s3 = sld [smem:[#allocation90_spill]] }
  0x26   : > { %s4261_s21 = scalar_lea.vmem %s6855_s0, %s3327_s12  ;;  %s6869_s5 = sld [smem:[#allocation92_spill]] }
  0x27   : > { %6753 = vst [vmem:[#allocation6_spill] sm:$0xff] %v3766_v27  ;;  %v3770_v28 = vadd.s32 128, %v3766_v27  ;;  %v3773_v29 = vadd.s32 256, %v3766_v27  ;;  %v3776_v30 = vadd.s32 384, %v3766_v27  ;;  %v373_v31 = vand.u32 63, %v3766_v27  ;;  %s6872_s6 = sld [smem:[#allocation93_spill]] }
  0x28   : > { %v369_v35 = vshra.s32 %v3766_v27, 6  ;;  %s6875_s8 = sld [smem:[#allocation95_spill]] }
  0x29   : > { %470 = vperm.xlu1 %3429, %v3721_v2   ;;  %434 = vperm.xlu0 %3428, %v3721_v2   ;;  %v374_v32 = vand.u32 63, %v3770_v28  ;;  %v375_v33 = vand.u32 63, %v3773_v29  ;;  %v376_v34 = vand.u32 63, %v3776_v30  ;;  %v3784_v36 = vshra.s32 %v373_v31, 3  ;;  %s6877_s9 = sld [smem:[#allocation96_spill]] }
  0x2a   : > { %v370_v37 = vshra.s32 %v3770_v28, 6  ;;  %v371_v39 = vshra.s32 %v3773_v29, 6  ;;  %v372_v41 = vshra.s32 %v3776_v30, 6  ;;  %vm3798_vm0 = vcmp.ge.s32.totalorder %v369_v35, 1 }
  0x2b   : > { %v3787_v38 = vshra.s32 %v374_v32, 3  ;;  %v3790_v40 = vshra.s32 %v375_v33, 3  ;;  %v3794_v42 = vshra.s32 %v376_v34, 3  ;;  %vm6601_vm1 = vcmp.ge.s32.totalorder %v3784_v36, 1 }
  0x2c   : > { %vm3805_vm2 = vcmp.ge.s32.totalorder %v370_v37, 1  ;;  %vm3812_vm4 = vcmp.ge.s32.totalorder %v371_v39, 1  ;;  %vm3819_vm6 = vcmp.ge.s32.totalorder %v372_v41, 1  ;;  %vm3828_vm8 = vmand %vm3798_vm0, %vm6601_vm1  ;;  %v3841_v50 = vand.u32 7, %v373_v31 }
  0x2d   : > { %3431 = vset.pattern.permute.xlu1 %v3561_v4  ;;  %3430 = vset.pattern.permute.xlu0 %v3561_v4  ;;  %vm6600_vm3 = vcmp.ge.s32.totalorder %v3787_v38, 1  ;;  %vm6599_vm5 = vcmp.ge.s32.totalorder %v3790_v40, 1  ;;  %v6761_v47 = vsel %vm3819_vm6, 4294967295, %v6760_v47  ;;  %vm6598_vm7 = vcmp.ge.s32.totalorder %v3794_v42, 1 }
  0x2e   : > { %511 = vperm.xlu1 %3431, %v3721_v2   ;;  %506 = vperm.xlu0 %3430, %v3715_v0   ;;  %vm3837_vm9 = vmand %vm3805_vm2, %vm6600_vm3  ;;  %v3851_v52 = vand.u32 7, %v374_v32  ;;  %v3861_v54 = vand.u32 7, %v375_v33  ;;  %vm6604_vm12 = vcmp.ge.s32.totalorder %v3841_v50, 1  ;;  %v3864_v55 = vand.u32 7, %v376_v34 }
  0x2f   : > { %vm3847_vm10 = vmand %vm3812_vm4, %vm6599_vm5  ;;  %v3208_v60 = vsel %vm3828_vm8, 1.0, %v6617_v59  ;;  %vm6615_vm1 = vcmp.le.s32.totalorder %v3841_v50, 6  ;;  %v3209_v61 = vsel %vm3837_vm9, 1.0, %v6617_v59 }
  0x30   : > { %vm3857_vm11 = vmand %vm3819_vm6, %vm6598_vm7  ;;  %vm6602_vm13 = vcmp.ge.s32.totalorder %v3851_v52, 1  ;;  %vm6603_vm15 = vcmp.ge.s32.totalorder %v3861_v54, 1  ;;  %vm6605_vm5 = vcmp.ge.s32.totalorder %v3864_v55, 1  ;;  %v3210_v62 = vsel %vm3847_vm10, 1.0, %v6617_v59 }
  0x31   : > { %vm3871_vm14 = vmand %vm3828_vm8, %vm6604_vm12  ;;  %v3211_v63 = vsel %vm3857_vm11, 1.0, %v6617_v59  ;;  %vm6608_vm12 = vcmp.le.s32.totalorder %v3861_v54, 6 }
  0x32   : > { %3432 = vset.pattern.permute.xlu1 %v3562_v5  ;;  %3433 = vset.pattern.permute.xlu0 %v3562_v5  ;;  %vm3881_vm7 = vmand %vm3837_vm9, %vm6602_vm13  ;;  %v3204_v4 = vsel %vm3871_vm14, 1.0, %v6617_v59 }
  0x33   : > { %547 = vperm.xlu1 %3432, %v3715_v0   ;;  %552 = vperm.xlu0 %3433, %v3721_v2   ;;  %vm3890_vm3 = vmand %vm3847_vm10, %vm6603_vm15  ;;  %vm6614_vm15 = vcmp.le.s32.totalorder %v3851_v52, 6  ;;  %v3205_v5 = vsel %vm3881_vm7, 1.0, %v6617_v59 }
  0x34   : > { %vm416_vm13 = vmand %vm3857_vm11, %vm6605_vm5  ;;  %vm6609_vm5 = vcmp.le.s32.totalorder %v3864_v55, 6 }
  0x35   : > { %vm3920_vm6 = vmand %vm3828_vm8, %vm6615_vm1 }
  0x36   : > { %vm3938_vm8 = vmand %vm3837_vm9, %vm6614_vm15  ;;  %vm6784_vm9 = vcmp.ge.s32.totalorder %v3841_v50, 1 }
  0x37   : > { %3434 = vset.pattern.permute.xlu1 %v3563_v6  ;;  %3435 = vset.pattern.permute.xlu0 %v3564_v7  ;;  %v3206_v6 = vsel %vm3890_vm3, 1.0, %v6617_v59  ;;  %vm3946_vm7 = vmand %vm3847_vm10, %vm6608_vm12  ;;  %v3213_v34 = vsel %vm3938_vm8, 1.0, %v6617_v59  ;;  %vm6793_vm8 = vcmp.ge.s32.totalorder %v3864_v55, 1 }
  0x38   : > { %584 = vperm.xlu1 %3434, %v3715_v0   ;;  %625 = vperm.xlu0 %3435, %v3715_v0   ;;  %vm3954_vm3 = vmand %vm3857_vm11, %vm6609_vm5  ;;  %vm6787_vm11 = vcmp.ge.s32.totalorder %v3851_v52, 1 }
  0x39   : > { %vm3964_vm10 = vmand %vm3798_vm0, %vm6784_vm9  ;;  %v3215_v48 = vsel %vm3954_vm3, 1.0, %v6617_v59 }
  0x3a   : > { %vm4015_vm9 = vmand %vm3798_vm0, %vm6615_vm1 }
  0x3c   : > { %589 = vperm.xlu1 %3434, %v3721_v2   ;;  %3438 = vset.pattern.permute.xlu0 %v3565_v8 }
  0x3d   : > { %675 = vperm.xlu0 %3438, %v3721_v2  }
  0x40   : > { %3436 = vset.pattern.permute.xlu1 %v3564_v7  ;;  %v3207_v7 = vsel %vm416_vm13, 1.0, %v6617_v59  ;;  %vm3984_vm13 = vmand %vm3805_vm2, %vm6787_vm11  ;;  %vm6613_vm11 = vcmp.le.s32.totalorder %v3784_v36, 6 }
  0x41   : > { %630 = vperm.xlu1 %3436, %v3721_v2   ;;  %3440 = vset.pattern.permute.xlu0 %v3566_v9  ;;  %v3217_v3 = vsel %vm3984_vm13, 1.0, %v6617_v59  ;;  %vm6610_vm13 = vcmp.le.s32.totalorder %v3787_v38, 6 }
  0x42   : > { %748 = vperm.xlu0 %3440, %v3715_v0  }
  0x45   : > { %3437 = vset.pattern.permute.xlu1 %v3565_v8 }
  0x46   : > { %670 = vperm.xlu1 %3437, %v3715_v0   ;;  %3443 = vset.pattern.permute.xlu0 %v3567_v10 }
  0x47   : > { %794 = vperm.xlu0 %3443, %v3721_v2  }
  0x4a   : > { %3439 = vset.pattern.permute.xlu1 %v3568_v11 }
  0x4b   : > { %707 = vperm.xlu1 %3439, %v3715_v0   ;;  %3445 = vset.pattern.permute.xlu0 %v3569_v12 }
  0x4c   : > { %867 = vperm.xlu0 %3445, %v3715_v0  }
  0x4f   : > { %712 = vperm.xlu1 %3439, %v3721_v2  }
  0x50   : > { %3448 = vset.pattern.permute.xlu0 %v3570_v13 }
  0x51   : > { %909 = vperm.xlu0 %3448, %v3721_v2  }
  0x53   : > { %3441 = vset.pattern.permute.xlu1 %v3566_v9 }
  0x54   : > { %753 = vperm.xlu1 %3441, %v3721_v2  }
  0x55   : > { %3450 = vset.pattern.permute.xlu0 %v3571_v14 }
  0x56   : > { %982 = vperm.xlu0 %3450, %v3715_v0  }
  0x58   : > { %3442 = vset.pattern.permute.xlu1 %v3567_v10 }
  0x59   : > { %789 = vperm.xlu1 %3442, %v3715_v0  }
  0x5a   : > { %3453 = vset.pattern.permute.xlu0 %v3572_v15 }
  0x5b   : > { %1024 = vperm.xlu0 %3453, %v3721_v2  }
  0x5d   : > { %3444 = vset.pattern.permute.xlu1 %v3573_v16 }
  0x5e   : > { %826 = vperm.xlu1 %3444, %v3715_v0  }
  0x5f   : > { %3455 = vset.pattern.permute.xlu0 %v3574_v17 }
  0x60   : > { %1105 = vperm.xlu0 %3455, %v3715_v0  }
  0x62   : > { %831 = vperm.xlu1 %3444, %v3721_v2  }
  0x64   : > { %3458 = vset.pattern.permute.xlu0 %v3575_v18 }
  0x65   : > { %1147 = vperm.xlu0 %3458, %v3721_v2  }
  0x66   : > { %3446 = vset.pattern.permute.xlu1 %v3569_v12 }
  0x67   : > { %872 = vperm.xlu1 %3446, %v3721_v2  }
  0x69   : > { %3460 = vset.pattern.permute.xlu0 %v3576_v19 }
  0x6a   : > { %1224 = vperm.xlu0 %3460, %v3715_v0  }
  0x6b   : > { %3447 = vset.pattern.permute.xlu1 %v3570_v13 }
  0x6c   : > { %904 = vperm.xlu1 %3447, %v3715_v0  }
  0x6e   : > { %3463 = vset.pattern.permute.xlu0 %v3578_v21 }
  0x6f   : > { %1266 = vperm.xlu0 %3463, %v3721_v2  }
  0x70   : > { %3449 = vset.pattern.permute.xlu1 %v3577_v20 }
  0x71   : > { %941 = vperm.xlu1 %3449, %v3715_v0  }
  0x73   : > { %3465 = vset.pattern.permute.xlu0 %v3579_v22 }
  0x74   : > { %1347 = vperm.xlu0 %3465, %v3715_v0  }
  0x75   : > { %946 = vperm.xlu1 %3449, %v3721_v2  }
  0x78   : > { %3468 = vset.pattern.permute.xlu0 %v3580_v23 }
  0x79   : > { %3451 = vset.pattern.permute.xlu1 %v3571_v14  ;;  %1389 = vperm.xlu0 %3468, %v3721_v2  }
  0x7a   : > { %987 = vperm.xlu1 %3451, %v3721_v2  }
  0x7d   : > { %3470 = vset.pattern.permute.xlu0 %v3581_v24 }
  0x7e   : > { %3452 = vset.pattern.permute.xlu1 %v3572_v15 }
  0x7f   : > { %1019 = vperm.xlu1 %3452, %v3715_v0  }
  0x83   : > { %3454 = vset.pattern.permute.xlu1 %v3582_v26 }
  0x84   : > { %1060 = vperm.xlu1 %3454, %v3715_v0  }
  0x88   : > { %1065 = vperm.xlu1 %3454, %v3721_v2  }
  0x8c   : > { %3456 = vset.pattern.permute.xlu1 %v3574_v17 }
  0x8d   : > { %1110 = vperm.xlu1 %3456, %v3721_v2  }
  0x91   : > { %3457 = vset.pattern.permute.xlu1 %v3575_v18 }
  0x92   : > { %1142 = vperm.xlu1 %3457, %v3715_v0  }
  0x96   : > { %3459 = vset.pattern.permute.xlu1 %v3583_v46  ;;  %v3214_v46 = vsel %vm3946_vm7, 1.0, %v6617_v59  ;;  %vm6794_vm7 = vnez %v6761_v47 }
  0x97   : > { %1183 = vperm.xlu1 %3459, %v3715_v0   ;;  %vm4000_vm3 = vmand %vm6794_vm7, %vm6793_vm8  ;;  %vm6612_vm8 = vcmp.le.s32.totalorder %v3790_v40, 6 }
  0x9b   : > { %1188 = vperm.xlu1 %3459, %v3721_v2  }
  0x9f   : > { %3461 = vset.pattern.permute.xlu1 %v3576_v19 }
  0xa0   : > { %1229 = vperm.xlu1 %3461, %v3721_v2   ;;  %v466_v1 = vpop.permute.xlu1 %465  ;;  %v430_v14 = vpop.permute.xlu0 %429 }
  0xa1   : > { %v473_v8 = vmul.f32 %v3208_v60, %v466_v1  ;;  %v474_v9 = vmul.f32 %v3209_v61, %v466_v1  ;;  %v475_v10 = vmul.f32 %v3210_v62, %v466_v1  ;;  %v476_v11 = vmul.f32 %v3211_v63, %v466_v1 }
  0xa2   : > { %v437_v16 = vmul.f32 %v3204_v4, %v430_v14  ;;  %v438_v17 = vmul.f32 %v3205_v5, %v430_v14  ;;  %v439_v18 = vmul.f32 %v3206_v6, %v430_v14  ;;  %v440_v19 = vmul.f32 %v3207_v7, %v430_v14 }
  0xa3   : > { %482 = vst [vmem:[#allocation2 + $0x108] sm:$0xff] %v473_v8  ;;  %483 = vst [vmem:[#allocation2 + $0x550] sm:$0xff] %v474_v9  ;;  %v3216_v1 = vsel %vm3964_vm10, 1.0, %v6617_v59 }
  0xa4   : > { %484 = vst [vmem:[#allocation2 + $0x4d0] sm:$0xff] %v475_v10  ;;  %485 = vst [vmem:[#allocation2 + $0x318] sm:$0xff] %v476_v11  ;;  %3462 = vset.pattern.permute.xlu1 %v3578_v21  ;;  %v471_v20 = vpop.permute.xlu1 %470  ;;  %v3212_v21 = vsel %vm3920_vm6, 1.0, %v6617_v59  ;;  %v435_v51 = vpop.permute.xlu0 %434  ;;  %vm6790_vm6 = vcmp.ge.s32.totalorder %v3861_v54, 1  ;;  %v3219_v10 = vsel %vm4000_vm3, 1.0, %v6617_v59  ;;  %vm6611_vm3 = vcmp.le.s32.totalorder %v3794_v42, 6 }
  0xa5   : > { %v477_v25 = vmul.f32 %v3208_v60, %v471_v20  ;;  %v478_v26 = vmul.f32 %v3209_v61, %v471_v20  ;;  %v479_v31 = vmul.f32 %v3210_v62, %v471_v20  ;;  %v480_v32 = vmul.f32 %v3211_v63, %v471_v20  ;;  %1261 = vperm.xlu1 %3462, %v3715_v0   ;;  %vm3992_vm14 = vmand %vm3812_vm4, %vm6790_vm6  ;;  %v4320_v20 = vld [vmem:[%s6866_s3 + $0x8] sm:$0xff] }
  0xa6   : > { %445 = vst [vmem:[#allocation2 + $0x2b0] sm:$0xff] %v437_v16  ;;  %446 = vst [vmem:[#allocation2 + $0x3f0] sm:$0xff] %v438_v17  ;;  %v441_v56 = vmul.f32 %v3204_v4, %v435_v51  ;;  %v442_v57 = vmul.f32 %v3205_v5, %v435_v51  ;;  %v443_v58 = vmul.f32 %v3206_v6, %v435_v51  ;;  %v3585_v62 = vmov 23  }
  0xa7   : > { %447 = vst [vmem:[#allocation2 + $0x518] sm:$0xff] %v439_v18  ;;  %448 = vst [vmem:[#allocation2 + $0x18] sm:$0xff] %v440_v19  ;;  %v444_v60 = vmul.f32 %v3207_v7, %v435_v51  ;;  %v3218_v9 = vsel %vm3992_vm14, 1.0, %v6617_v59 }
  0xa8   : > { %486 = vst [vmem:[#allocation2 + $0x588] sm:$0xff] %v477_v25  ;;  %487 = vst [vmem:[#allocation2 + $0x540] sm:$0xff] %v478_v26 }
  0xa9   : > { %488 = vst [vmem:[#allocation2 + $0x58] sm:$0xff] %v479_v31  ;;  %489 = vst [vmem:[#allocation2 + $0x2b8] sm:$0xff] %v480_v32  ;;  %3464 = vset.pattern.permute.xlu1 %v3585_v62  ;;  %v512_v63 = vpop.permute.xlu1 %511  ;;  %v507_v12 = vpop.permute.xlu0 %506 }
  0xaa   : > { %449 = vst [vmem:[#allocation2 + $0x490] sm:$0xff] %v441_v56  ;;  %450 = vst [vmem:[#allocation2 + $0x328] sm:$0xff] %v442_v57  ;;  %v518_v4 = vmul.f32 %v3212_v21, %v512_v63  ;;  %v519_v5 = vmul.f32 %v3213_v34, %v512_v63  ;;  %v520_v6 = vmul.f32 %v3214_v46, %v512_v63  ;;  %1302 = vperm.xlu1 %3464, %v3715_v0  }
  0xab   : > { %451 = vst [vmem:[#allocation2 + $0x480] sm:$0xff] %v443_v58  ;;  %452 = vst [vmem:[#allocation2 + $0x3b8] sm:$0xff] %v444_v60  ;;  %v521_v7 = vmul.f32 %v3215_v48, %v512_v63  ;;  %v514_v14 = vmul.f32 %v3212_v21, %v507_v12  ;;  %v515_v15 = vmul.f32 %v3213_v34, %v507_v12  ;;  %v3220_v21 = vsel %vm3798_vm0, 1.0, %v6617_v59 }
  0xac   : > { %vm4029_vm10 = vmand %vm3805_vm2, %vm6614_vm15  ;;  %527 = vst [vmem:[#allocation2 + $0x6a0] sm:$0xff] %v518_v4  ;;  %v516_v16 = vmul.f32 %v3214_v46, %v507_v12  ;;  %v517_v17 = vmul.f32 %v3215_v48, %v507_v12  ;;  %v3221_v34 = vsel %vm3805_vm2, 1.0, %v6617_v59  ;;  %v3222_v46 = vsel %vm3812_vm4, 1.0, %v6617_v59 }
  0xad   : > { %528 = vst [vmem:[#allocation2 + $0x338] sm:$0xff] %v519_v5  ;;  %529 = vst [vmem:[#allocation2 + $0x40] sm:$0xff] %v520_v6  ;;  %v3223_v48 = vsel %vm6794_vm7, 1.0, %v6617_v59 }
  0xae   : > { %530 = vst [vmem:[#allocation2 + $0x3f8] sm:$0xff] %v521_v7  ;;  %vm4039_vm6 = vmand %vm3812_vm4, %vm6608_vm12  ;;  %1307 = vperm.xlu1 %3464, %v3721_v2   ;;  %v548_v19 = vpop.permute.xlu1 %547  ;;  %v553_v43 = vpop.permute.xlu0 %552 }
  0xaf   : > { %vm4047_vm14 = vmand %vm6794_vm7, %vm6609_vm5  ;;  %523 = vst [vmem:[#allocation2 + $0x5c0] sm:$0xff] %v514_v14  ;;  %v555_v25 = vmul.f32 %v3216_v1, %v548_v19  ;;  %v556_v26 = vmul.f32 %v3217_v3, %v548_v19  ;;  %v557_v31 = vmul.f32 %v3218_v9, %v548_v19  ;;  %v558_v32 = vmul.f32 %v3219_v10, %v548_v19  ;;  %v4325_v19 = vld [vmem:[%s6869_s5] sm:$0xff] }
  0xb0   : > { %vm4058_vm12 = vmand %vm3798_vm0, %vm6613_vm11  ;;  %524 = vst [vmem:[#allocation2 + $0x5d0] sm:$0xff] %v515_v15  ;;  %v559_v51 = vmul.f32 %v3216_v1, %v553_v43  ;;  %v560_v53 = vmul.f32 %v3217_v3, %v553_v43  ;;  %v561_v45 = vmul.f32 %v3218_v9, %v553_v43  ;;  %v562_v56 = vmul.f32 %v3219_v10, %v553_v43 }
  0xb1   : > { %525 = vst [vmem:[#allocation2 + $0x580] sm:$0xff] %v516_v16  ;;  %526 = vst [vmem:[#allocation2 + $0x400] sm:$0xff] %v517_v17  ;;  %v3224_v1 = vsel %vm4015_vm9, 1.0, %v6617_v59  ;;  %v3225_v3 = vsel %vm4029_vm10, 1.0, %v6617_v59  ;;  %v3226_v4 = vsel %vm4039_vm6, 1.0, %v6617_v59  ;;  %v3227_v5 = vsel %vm4047_vm14, 1.0, %v6617_v59 }
  0xb2   : > { %vm4066_vm5 = vmand %vm3805_vm2, %vm6610_vm13  ;;  %564 = vst [vmem:[#allocation2 + $0x190] sm:$0xff] %v555_v25  ;;  %3466 = vset.pattern.permute.xlu1 %v3579_v22  ;;  %vm6813_vm2 = vcmp.ge.s32.totalorder %v3841_v50, 1  ;;  %vm6829_vm6 = vcmp.le.s32.totalorder %v3861_v54, 6  ;;  %v3232_v14 = vsel %vm4058_vm12, 1.0, %v6617_v59 }
  0xb3   : > { %vm4086_vm13 = vmand %vm3812_vm4, %vm6612_vm8  ;;  %565 = vst [vmem:[#allocation2 + $0x250] sm:$0xff] %v556_v26  ;;  %1352 = vperm.xlu1 %3466, %v3721_v2   ;;  %v585_v47 = vpop.permute.xlu1 %584  ;;  %v626_v7 = vpop.permute.xlu0 %625 }
  0xb4   : > { %566 = vst [vmem:[#allocation2 + $0xd0] sm:$0xff] %v557_v31  ;;  %567 = vst [vmem:[#allocation2 + $0x3d0] sm:$0xff] %v558_v32  ;;  %v592_v22 = vmul.f32 %v3220_v21, %v585_v47  ;;  %v593_v60 = vmul.f32 %v3221_v34, %v585_v47  ;;  %v594_v61 = vmul.f32 %v3222_v46, %v585_v47 }
  0xb5   : > { %vm4094_vm0 = vmand %vm6794_vm7, %vm6611_vm3  ;;  %vm6816_vm7 = vcmp.ge.s32.totalorder %v3851_v52, 1  ;;  %568 = vst [vmem:[#allocation2 + $0x568] sm:$0xff] %v559_v51  ;;  %v595_v62 = vmul.f32 %v3223_v48, %v585_v47  ;;  %v633_v9 = vmul.f32 %v3224_v1, %v626_v7  ;;  %v634_v10 = vmul.f32 %v3225_v3, %v626_v7 }
  0xb6   : > { %vm4103_vm4 = vmand %vm4058_vm12, %vm6813_vm2  ;;  %569 = vst [vmem:[#allocation2 + $0x8] sm:$0xff] %v560_v53  ;;  %vm6819_vm2 = vcmp.ge.s32.totalorder %v3861_v54, 1  ;;  %v635_v11 = vmul.f32 %v3226_v4, %v626_v7  ;;  %v636_v12 = vmul.f32 %v3227_v5, %v626_v7 }
  0xb7   : > { %vm4112_vm3 = vmand %vm4066_vm5, %vm6816_vm7  ;;  %570 = vst [vmem:[#allocation2 + $0x628] sm:$0xff] %v561_v45  ;;  %vm6822_vm7 = vcmp.ge.s32.totalorder %v3864_v55, 1  ;;  %3467 = vset.pattern.permute.xlu1 %v3580_v23  ;;  %v590_v13 = vpop.permute.xlu1 %589  ;;  %v3228_v25 = vsel %vm4103_vm4, 1.0, %v6617_v59  ;;  %vm6840_vm4 = vcmp.ge.s32.totalorder %v3787_v38, 1 }
  0xb8   : > { %571 = vst [vmem:[#allocation2 + $0x50] sm:$0xff] %v562_v56  ;;  %vm4120_vm8 = vmand %vm4086_vm13, %vm6819_vm2  ;;  %v596_v15 = vmul.f32 %v3220_v21, %v590_v13  ;;  %v597_v16 = vmul.f32 %v3221_v34, %v590_v13  ;;  %v598_v17 = vmul.f32 %v3222_v46, %v590_v13  ;;  %v599_v18 = vmul.f32 %v3223_v48, %v590_v13  ;;  %v676_v34 = vpop.permute.xlu0 %675 }
  0xb9   : > { %vm4140_vm2 = vmand %vm4094_vm0, %vm6822_vm7  ;;  %601 = vst [vmem:[#allocation2 + $0x10] sm:$0xff] %v592_v22  ;;  %1384 = vperm.xlu1 %3467, %v3715_v0   ;;  %vm6832_vm7 = vcmp.le.s32.totalorder %v3864_v55, 6  ;;  %v3229_v26 = vsel %vm4112_vm3, 1.0, %v6617_v59  ;;  %v3230_v31 = vsel %vm4120_vm8, 1.0, %v6617_v59  ;;  %vm6839_vm3 = vcmp.ge.s32.totalorder %v3851_v52, 1 }
  0xba   : > { %602 = vst [vmem:[#allocation2 + $0x408] sm:$0xff] %v593_v60  ;;  %603 = vst [vmem:[#allocation2 + $0x6b0] sm:$0xff] %v594_v61  ;;  %v3231_v32 = vsel %vm4140_vm2, 1.0, %v6617_v59  ;;  %v682_v48 = vmul.f32 %v3228_v25, %v676_v34  ;;  %v683_v43 = vmul.f32 %v3229_v26, %v676_v34  ;;  %v684_v51 = vmul.f32 %v3230_v31, %v676_v34 }
  0xbb   : > { %604 = vst [vmem:[#allocation2 + $0x98] sm:$0xff] %v595_v62  ;;  %vm4148_vm9 = vmand %vm4058_vm12, %vm6615_vm1  ;;  %v685_v53 = vmul.f32 %v3231_v32, %v676_v34  ;;  %vm6843_vm8 = vcmp.ge.s32.totalorder %v3861_v54, 1  ;;  %vm6844_vm2 = vcmp.ge.s32.totalorder %v3790_v40, 1  ;;  %v4330_v34 = vld [vmem:[%s6869_s5 + $0x8] sm:$0xff]  ;;  %vm6880_vm12 = vcmp.ge.s32.totalorder %v3787_v38, 1 }
  0xbc   : > { %vm4157_vm10 = vmand %vm4066_vm5, %vm6614_vm15  ;;  %642 = vst [vmem:[#allocation2 + $0x100] sm:$0xff] %v633_v9  ;;  %v631_v45 = vpop.permute.xlu1 %630  ;;  %v4229_v60 = vsel %vm4148_vm9, 1.0, %v6617_v59 }
  0xbd   : > { %vm4166_vm14 = vmand %vm4086_vm13, %vm6829_vm6  ;;  %643 = vst [vmem:[#allocation2 + $0x638] sm:$0xff] %v634_v10  ;;  %vm6835_vm6 = vcmp.ge.s32.totalorder %v3841_v50, 1  ;;  %3469 = vset.pattern.permute.xlu1 %v3581_v24  ;;  %v637_v57 = vmul.f32 %v3224_v1, %v631_v45  ;;  %v638_v47 = vmul.f32 %v3225_v3, %v631_v45  ;;  %v639_v58 = vmul.f32 %v3226_v4, %v631_v45  ;;  %v749_v1 = vpop.permute.xlu0 %748  ;;  %v4266_v3 = vld [vmem:[%s6752_s4] sm:$0xff]  ;;  %v4271_v4 = vld [vmem:[%s6752_s4 + $0x8] sm:$0xff] }
  0xbe   : > { %644 = vst [vmem:[#allocation2 + $0x208] sm:$0xff] %v635_v11  ;;  %645 = vst [vmem:[#allocation2 + $0x300] sm:$0xff] %v636_v12  ;;  %v640_v22 = vmul.f32 %v3227_v5, %v631_v45  ;;  %1425 = vperm.xlu1 %3469, %v3715_v0   ;;  %v4234_v0 = vsel %vm4157_vm10, 1.0, %v6617_v59  ;;  %v4251_v62 = vsel %vm4166_vm14, 1.0, %v6617_v59  ;;  %v4276_v5 = vld [vmem:[%s6858_s1] sm:$0xff]  ;;  %v756_v6 = vmul.f32 %v4229_v60, %v749_v1  ;;  %v4285_v10 = vld [vmem:[%s6858_s1 + $0x8] sm:$0xff] }
  0xbf   : > { %vm4174_vm11 = vmand %vm4094_vm0, %vm6832_vm7  ;;  %605 = vst [vmem:[#allocation2] sm:$0xff] %v596_v15  ;;  %vm6836_vm7 = vcmp.ge.s32.totalorder %v3784_v36, 1  ;;  %v757_v7 = vmul.f32 %v4234_v0, %v749_v1  ;;  %v758_v8 = vmul.f32 %v4251_v62, %v749_v1  ;;  %v4290_v11 = vld [vmem:[%s6861_s7] sm:$0xf]  ;;  %v3233_v15 = vsel %vm4066_vm5, 1.0, %v6617_v59 }
  0xc0   : > { %606 = vst [vmem:[#allocation2 + $0x80] sm:$0xff] %v597_v16  ;;  %607 = vst [vmem:[#allocation2 + $0x5e8] sm:$0xff] %v598_v17  ;;  %v4256_v63 = vsel %vm4174_vm11, 1.0, %v6617_v59  ;;  %v4295_v12 = vld [vmem:[%s6863_s2] sm:$0xff]  ;;  %v3234_v16 = vsel %vm4086_vm13, 1.0, %v6617_v59  ;;  %v4310_v17 = vld [vmem:[%s6863_s2 + $0x8] sm:$0xff] }
  0xc1   : > { %608 = vst [vmem:[#allocation2 + $0x5f8] sm:$0xff] %v599_v18  ;;  %vm4195_vm15 = vmand %vm6836_vm7, %vm6835_vm6  ;;  %vm6847_vm7 = vcmp.ge.s32.totalorder %v3864_v55, 1  ;;  %v759_v9 = vmul.f32 %v4256_v63, %v749_v1  ;;  %v671_v13 = vpop.permute.xlu1 %670  ;;  %vm6879_vm5 = vcmp.le.s32.totalorder %v3851_v52, 6  ;;  %vm6884_vm11 = vcmp.ge.s32.totalorder %v3790_v40, 1 }
  0xc2   : > { %vm4203_vm1 = vmand %vm6840_vm4, %vm6839_vm3  ;;  %vm6848_vm3 = vcmp.ge.s32.totalorder %v3794_v42, 1  ;;  %691 = vst [vmem:[#allocation2 + $0x508] sm:$0xff] %v682_v48  ;;  %1430 = vperm.xlu1 %3469, %v3721_v2   ;;  %v4315_v2 = vld [vmem:[%s6866_s3] sm:$0xff]  ;;  %v678_v33 = vmul.f32 %v3228_v25, %v671_v13  ;;  %v679_v18 = vmul.f32 %v3229_v26, %v671_v13  ;;  %v680_v23 = vmul.f32 %v3230_v31, %v671_v13  ;;  %v4343_v31 = vld [vmem:[%s6872_s6 + $0x8] sm:$0xff]  ;;  %v795_v46 = vpop.permute.xlu0 %794 }
  0xc3   : > { %vm4212_vm6 = vmand %vm6844_vm2, %vm6843_vm8  ;;  %692 = vst [vmem:[#allocation2 + $0x380] sm:$0xff] %v683_v43  ;;  %vm6851_vm8 = vcmp.le.s32.totalorder %v3841_v50, 6  ;;  %vm6852_vm2 = vcmp.ge.s32.totalorder %v3784_v36, 1  ;;  %v681_v49 = vmul.f32 %v3231_v32, %v671_v13  ;;  %v4335_v25 = vld [vmem:[%s6872_s6] sm:$0xff]  ;;  %v3235_v26 = vsel %vm4094_vm0, 1.0, %v6617_v59 }
  0xc4   : > { %vm4221_vm4 = vmand %vm6848_vm3, %vm6847_vm7  ;;  %693 = vst [vmem:[#allocation2 + $0x528] sm:$0xff] %v684_v51  ;;  %v4348_v32 = vld [vmem:[%s6875_s8] sm:$0xf]  ;;  %v4358_v44 = vsel %vm4195_vm15, 1.0, %v6617_v59  ;;  %v4363_v43 = vsel %vm4203_vm1, 1.0, %v6617_v59  ;;  %v4368_v51 = vsel %vm4212_vm6, 1.0, %v6617_v59 }
  0xc5   : > { %694 = vst [vmem:[#allocation2 + $0x170] sm:$0xff] %v685_v53  ;;  %vm4240_vm7 = vmand %vm6852_vm2, %vm6851_vm8  ;;  %v4353_v48 = vld [vmem:[%s6877_s9] sm:$0xf]  ;;  %v4373_v53 = vsel %vm4221_vm4, 1.0, %v6617_v59  ;;  %vm6883_vm1 = vcmp.le.s32.totalorder %v3861_v54, 6  ;;  %v801_v56 = vmul.f32 %v4358_v44, %v795_v46  ;;  %vm6887_vm0 = vcmp.le.s32.totalorder %v3864_v55, 6 }
  0xc6   : > { %646 = vst [vmem:[#allocation2 + $0x418] sm:$0xff] %v637_v57  ;;  %647 = vst [vmem:[#allocation2 + $0x610] sm:$0xff] %v638_v47  ;;  %v802_v57 = vmul.f32 %v4363_v43, %v795_v46  ;;  %v803_v47 = vmul.f32 %v4368_v51, %v795_v46  ;;  %vm6891_vm14 = vcmp.ge.s32.totalorder %v3841_v50, 1  ;;  %vm6896_vm8 = vcmp.ge.s32.totalorder %v3851_v52, 1 }
  0xc7   : > { %648 = vst [vmem:[#allocation2 + $0x698] sm:$0xff] %v639_v58  ;;  %649 = vst [vmem:[#allocation2 + $0x390] sm:$0xff] %v640_v22  ;;  %v804_v58 = vmul.f32 %v4373_v53, %v795_v46  ;;  %v708_v22 = vpop.permute.xlu1 %707  ;;  %vm6897_vm2 = vcmp.ge.s32.totalorder %v3861_v54, 1 }
  0xc8   : > { %6856 = vst [vmem:[#allocation7_spill] sm:$0xff] %v4266_v3  ;;  %6857 = vst [vmem:[#allocation8_spill] sm:$0xff] %v4271_v4  ;;  %v715_v1 = vmul.f32 %v3232_v14, %v708_v22 }
  0xc9   : > { %6859 = vst [vmem:[#allocation9_spill] sm:$0xff] %v4276_v5  ;;  %6860 = vst [vmem:[#allocation10_spill] sm:$0xff] %v4285_v10 }
  0xca   : > { %6862 = vst [vmem:[#allocation11_spill] sm:$0xff] %v4290_v11  ;;  %6864 = vst [vmem:[#allocation12_spill] sm:$0xff] %v4295_v12  ;;  %v6947_v11 = vmov 0.0  }
  0xcb   : > { %6865 = vst [vmem:[#allocation13_spill] sm:$0xff] %v4310_v17  ;;  %6867 = vst [vmem:[#allocation14_spill] sm:$0xff] %v4315_v2 }
  0xcc   : > { %6868 = vst [vmem:[#allocation15_spill] sm:$0xff] %v4320_v20  ;;  %765 = vst [vmem:[#allocation2 + $0xa0] sm:$0xff] %v756_v6  ;;  %v716_v6 = vmul.f32 %v3233_v15, %v708_v22 }
  0xcd   : > { %766 = vst [vmem:[#allocation2 + $0x320] sm:$0xff] %v757_v7  ;;  %767 = vst [vmem:[#allocation2 + $0x3e8] sm:$0xff] %v758_v8  ;;  %v717_v7 = vmul.f32 %v3234_v16, %v708_v22  ;;  %v718_v8 = vmul.f32 %v3235_v26, %v708_v22  ;;  %v4430_v22 = vsel %vm6891_vm14, 1.0, %v6617_v59 }
  0xce   : > { %768 = vst [vmem:[#allocation2 + $0x660] sm:$0xff] %v759_v9  ;;  %6870 = vst [vmem:[#allocation16_spill] sm:$0xff] %v4325_v19  ;;  %v4406_v9 = vsel %vm4240_vm7, 1.0, %v6617_v59  ;;  %vm6898_vm7 = vcmp.ge.s32.totalorder %v3864_v55, 1 }
  0xcf   : > { %6871 = vst [vmem:[#allocation17_spill] sm:$0xff] %v4330_v34  ;;  %6873 = vst [vmem:[#allocation18_spill] sm:$0xff] %v4335_v25 }
  0xd0   : > { %6874 = vst [vmem:[#allocation19_spill] sm:$0xff] %v4343_v31  ;;  %6876 = vst [vmem:[#allocation20_spill] sm:$0xff] %v4348_v32 }
  0xd1   : > { %6878 = vst [vmem:[#allocation21_spill] sm:$0xff] %v4353_v48  ;;  %687 = vst [vmem:[#allocation2 + $0x4d8] sm:$0xff] %v678_v33 }
  0xd2   : > { %688 = vst [vmem:[#allocation2 + $0x2c0] sm:$0xff] %v679_v18  ;;  %689 = vst [vmem:[#allocation2 + $0x438] sm:$0xff] %v680_v23  ;;  %v868_v23 = vpop.permute.xlu0 %867 }
  0xd3   : > { %690 = vst [vmem:[#allocation2 + $0x430] sm:$0xff] %v681_v49  ;;  %vm4379_vm15 = vmand %vm6880_vm12, %vm6879_vm5  ;;  %v713_v49 = vpop.permute.xlu1 %712  ;;  %v875_v61 = vmul.f32 %v4406_v9, %v868_v23  ;;  %vm6900_vm12 = vcmp.le.s32.totalorder %v3787_v38, 6 }
  0xd4   : > { %vm4387_vm13 = vmand %vm6884_vm11, %vm6883_vm1  ;;  %810 = vst [vmem:[#allocation2 + $0x200] sm:$0xff] %v801_v56  ;;  %v4411_v13 = vsel %vm4379_vm15, 1.0, %v6617_v59  ;;  %v721_v45 = vmul.f32 %v3234_v16, %v713_v49  ;;  %v4448_v16 = vsel %vm6897_vm2, 1.0, %v6617_v59  ;;  %vm4465_vm1 = vcmp.le.s32.totalorder %v369_v35, 6 }
  0xd5   : > { %vm6888_vm9 = vmmov %vm6848_vm3  ;;  %811 = vst [vmem:[#allocation2 + $0x440] sm:$0xff] %v802_v57  ;;  %v4416_v33 = vsel %vm4387_vm13, 1.0, %v6617_v59  ;;  %v876_v46 = vmul.f32 %v4411_v13, %v868_v23  ;;  %v719_v57 = vmul.f32 %v3232_v14, %v713_v49  ;;  %vm6893_vm3 = vcmp.le.s32.totalorder %v3784_v36, 6 }
  0xd6   : > { %vm4399_vm10 = vmand %vm6888_vm9, %vm6887_vm0  ;;  %812 = vst [vmem:[#allocation2 + $0x248] sm:$0xff] %v803_v47  ;;  %v877_v21 = vmul.f32 %v4416_v33, %v868_v23  ;;  %v720_v47 = vmul.f32 %v3233_v15, %v713_v49  ;;  %v4443_v15 = vsel %vm6896_vm8, 1.0, %v6617_v59  ;;  %vm6906_vm13 = vcmp.le.s32.totalorder %v3790_v40, 6 }
  0xd7   : > { %813 = vst [vmem:[#allocation2 + $0x1e0] sm:$0xff] %v804_v58  ;;  %724 = vst [vmem:[#allocation2 + $0x668] sm:$0xff] %v715_v1  ;;  %v4421_v18 = vsel %vm4399_vm10, 1.0, %v6617_v59  ;;  %v722_v58 = vmul.f32 %v3235_v26, %v713_v49  ;;  %v4453_v26 = vsel %vm6898_vm7, 1.0, %v6617_v59  ;;  %vm6910_vm10 = vcmp.le.s32.totalorder %v3794_v42, 6 }
  0xd8   : > { %725 = vst [vmem:[#allocation2 + $0x48] sm:$0xff] %v716_v6  ;;  %726 = vst [vmem:[#allocation2 + $0x600] sm:$0xff] %v717_v7  ;;  %v878_v56 = vmul.f32 %v4421_v18, %v868_v23  ;;  %v910_v6 = vpop.permute.xlu0 %909  ;;  %v754_v7 = vpop.permute.xlu1 %753 }
  0xd9   : > { %727 = vst [vmem:[#allocation2 + $0x678] sm:$0xff] %v718_v8  ;;  %884 = vst [vmem:[#allocation2 + $0x188] sm:$0xff] %v875_v61  ;;  %v916_v23 = vmul.f32 %v4430_v22, %v910_v6  ;;  %v917_v49 = vmul.f32 %v4443_v15, %v910_v6  ;;  %v918_v61 = vmul.f32 %v4448_v16, %v910_v6 }
  0xda   : > { %885 = vst [vmem:[#allocation2 + $0x2e0] sm:$0xff] %v876_v46  ;;  %886 = vst [vmem:[#allocation2 + $0x1b0] sm:$0xff] %v877_v21  ;;  %v919_v35 = vmul.f32 %v4453_v26, %v910_v6  ;;  %v760_v46 = vmul.f32 %v4229_v60, %v754_v7  ;;  %v761_v21 = vmul.f32 %v4234_v0, %v754_v7 }
  0xdb   : > { %887 = vst [vmem:[#allocation2 + $0x4c8] sm:$0xff] %v878_v56  ;;  %728 = vst [vmem:[#allocation2 + $0x28] sm:$0xff] %v719_v57  ;;  %v762_v56 = vmul.f32 %v4251_v62, %v754_v7  ;;  %v763_v57 = vmul.f32 %v4256_v63, %v754_v7 }
  0xdc   : > { %729 = vst [vmem:[#allocation2 + $0x298] sm:$0xff] %v720_v47  ;;  %730 = vst [vmem:[#allocation2 + $0x88] sm:$0xff] %v721_v45  ;;  %v983_v63 = vpop.permute.xlu0 %982  ;;  %v790_v45 = vpop.permute.xlu1 %789 }
  0xdd   : > { %731 = vst [vmem:[#allocation2 + $0xe0] sm:$0xff] %v722_v58  ;;  %vm6892_vm6 = vmmov %vm6891_vm14  ;;  %v797_v6 = vmul.f32 %v4358_v44, %v790_v45  ;;  %v798_v7 = vmul.f32 %v4363_v43, %v790_v45  ;;  %v799_v8 = vmul.f32 %v4368_v51, %v790_v45  ;;  %v6927_v44 = vmov 0 }
  0xde   : > { %vm4436_vm4 = vmand %vm6893_vm3, %vm6892_vm6  ;;  %vm4491_vm6 = vcmp.le.s32.totalorder %v370_v37, 6  ;;  %925 = vst [vmem:[#allocation2 + $0x620] sm:$0xff] %v916_v23  ;;  %vm4502_vm3 = vcmp.le.s32.totalorder %v371_v39, 6  ;;  %v800_v23 = vmul.f32 %v4373_v53, %v790_v45 }
  0xdf   : > { %vm6899_vm5 = vmmov %vm6896_vm8  ;;  %926 = vst [vmem:[#allocation2 + $0xf0] sm:$0xff] %v917_v49  ;;  %v4498_v60 = vsel %vm4436_vm4, 1.0, %v6617_v59  ;;  %vm4521_vm4 = vcmp.le.s32.totalorder %v372_v41, 6  ;;  %vm6917_vm8 = vcmp.ge.s32.totalorder %v3784_v36, 1  ;;  %v6924_v49 = vmov 0 }
  0xe0   : > { %vm4459_vm15 = vmand %vm6900_vm12, %vm6899_vm5  ;;  %927 = vst [vmem:[#allocation2 + $0x220] sm:$0xff] %v918_v61  ;;  %v990_v41 = vmul.f32 %v4498_v60, %v983_v63  ;;  %vm6923_vm12 = vcmp.ge.s32.totalorder %v3790_v40, 1  ;;  %v1025_v45 = vpop.permute.xlu0 %1024 }
  0xe1   : > { %vm6905_vm11 = vmmov %vm6897_vm2  ;;  %928 = vst [vmem:[#allocation2 + $0x428] sm:$0xff] %v919_v35  ;;  %v4509_v37 = vsel %vm4459_vm15, 1.0, %v6617_v59 }
  0xe2   : > { %vm4473_vm0 = vmand %vm6906_vm13, %vm6905_vm11  ;;  %769 = vst [vmem:[#allocation2 + $0x1a8] sm:$0xff] %v760_v46  ;;  %v991_v58 = vmul.f32 %v4509_v37, %v983_v63  ;;  %vm6926_vm11 = vcmp.ge.s32.totalorder %v3794_v42, 1 }
  0xe3   : > { %vm6909_vm9 = vmmov %vm6898_vm7  ;;  %770 = vst [vmem:[#allocation2 + $0x5a0] sm:$0xff] %v761_v21  ;;  %v4514_v0 = vsel %vm4473_vm0, 1.0, %v6617_v59  ;;  %vm6920_vm7 = vcmp.ge.s32.totalorder %v3787_v38, 1 }
  0xe4   : > { %vm969_vm14 = vmand %vm6910_vm10, %vm6909_vm9  ;;  %771 = vst [vmem:[#allocation2 + $0x5d8] sm:$0xff] %v762_v56  ;;  %v992_v14 = vmul.f32 %v4514_v0, %v983_v63 }
  0xe5   : > { %772 = vst [vmem:[#allocation2 + $0x648] sm:$0xff] %v763_v57  ;;  %v4517_v62 = vsel %vm969_vm14, 1.0, %v6617_v59  ;;  %vm4529_vm2 = vmand %vm4465_vm1, %vm6917_vm8 }
  0xe6   : > { %vm4537_vm5 = vmand %vm4491_vm6, %vm6920_vm7  ;;  %v993_v24 = vmul.f32 %v4517_v62, %v983_v63  ;;  %999 = vst [vmem:[#allocation2 + $0x670] sm:$0xff] %v990_v41  ;;  %v827_v41 = vpop.permute.xlu1 %826 }
  0xe7   : > { %vm4553_vm15 = vmand %vm4502_vm3, %vm6923_vm12  ;;  %1000 = vst [vmem:[#allocation2 + $0x38] sm:$0xff] %v991_v58 }
  0xe8   : > { %v6925_v49 = vsel %vm4553_vm15, 4294967295, %v6924_v49  ;;  %vm4561_vm13 = vmand %vm4521_vm4, %vm6926_vm11  ;;  %1001 = vst [vmem:[#allocation2 + $0x330] sm:$0xff] %v992_v14 }
  0xe9   : > { %v6928_v44 = vsel %vm4561_vm13, 4294967295, %v6927_v44  ;;  %1002 = vst [vmem:[#allocation2 + $0x488] sm:$0xff] %v993_v24  ;;  %806 = vst [vmem:[#allocation2 + $0x1e8] sm:$0xff] %v797_v6 }
  0xea   : > { %807 = vst [vmem:[#allocation2 + $0x5f0] sm:$0xff] %v798_v7  ;;  %808 = vst [vmem:[#allocation2 + $0x70] sm:$0xff] %v799_v8  ;;  %v832_v48 = vpop.permute.xlu1 %831 }
  0xeb   : > { %809 = vst [vmem:[#allocation2 + $0x310] sm:$0xff] %v800_v23  ;;  %vm6929_vm0 = vmmov %vm6917_vm8  ;;  %vm6933_vm8 = vcmp.ge.s32.totalorder %v3841_v50, 1 }
  0xec   : > { %v3244_v43 = vsel %vm6929_vm0, 1.0, %v6617_v59  ;;  %vm6930_vm9 = vmmov %vm6920_vm7  ;;  %vm6938_vm0 = vcmp.le.s32.totalorder %v3790_v40, 6 }
  0xed   : > { %v3245_v51 = vsel %vm6930_vm9, 1.0, %v6617_v59  ;;  %vm6931_vm10 = vmmov %vm6923_vm12  ;;  %vm6936_vm12 = vcmp.le.s32.totalorder %v3784_v36, 6  ;;  %v4598_v56 = vsel %vm6938_vm0, 1.0, %v6617_v59  ;;  %vm6939_vm9 = vcmp.le.s32.totalorder %v3794_v42, 6 }
  0xee   : > { %v3246_v53 = vsel %vm6931_vm10, 1.0, %v6617_v59  ;;  %vm6932_vm14 = vmmov %vm6926_vm11  ;;  %v4588_v46 = vsel %vm6936_vm12, 1.0, %v6617_v59  ;;  %vm6937_vm11 = vcmp.le.s32.totalorder %v3787_v38, 6  ;;  %v4603_v57 = vsel %vm6939_vm9, 1.0, %v6617_v59 }
  0xef   : > { %v3247_v61 = vsel %vm6932_vm14, 1.0, %v6617_v59  ;;  %vm4581_vm7 = vmand %vm4529_vm2, %vm6933_vm8  ;;  %v4593_v21 = vsel %vm6937_vm11, 1.0, %v6617_v59  ;;  %vm6940_vm10 = vcmp.ge.s32.totalorder %v3851_v52, 1  ;;  %vm6943_vm8 = vcmp.ge.s32.totalorder %v3861_v54, 1 }
  0xf0   : > { %vm4609_vm14 = vmand %vm4537_vm5, %vm6940_vm10  ;;  %v1031_v14 = vmul.f32 %v4588_v46, %v1025_v45  ;;  %v1032_v24 = vmul.f32 %v4593_v21, %v1025_v45  ;;  %v1033_v6 = vmul.f32 %v4598_v56, %v1025_v45  ;;  %v1034_v7 = vmul.f32 %v4603_v57, %v1025_v45 }
  0xf1   : > { %vm4617_vm12 = vmand %vm4553_vm15, %vm6943_vm8  ;;  %v834_v8 = vmul.f32 %v3244_v43, %v827_v41  ;;  %v835_v23 = vmul.f32 %v3245_v51, %v827_v41  ;;  %v836_v59 = vmul.f32 %v3246_v53, %v827_v41  ;;  %v837_v32 = vmul.f32 %v3247_v61, %v827_v41 }
  0xf2   : > { %vm6946_vm11 = vcmp.ge.s32.totalorder %v3864_v55, 1  ;;  %1040 = vst [vmem:[#allocation2 + $0x30] sm:$0xff] %v1031_v14  ;;  %1041 = vst [vmem:[#allocation2 + $0x270] sm:$0xff] %v1032_v24  ;;  %v4632_v45 = vsel %vm4581_vm7, 1.0, %v6947_v11  ;;  %v4637_v41 = vsel %vm4609_vm14, 1.0, %v6947_v11  ;;  %v4642_v14 = vsel %vm4617_vm12, 1.0, %v6947_v11 }
  0xf3   : > { %vm1092_vm0 = vmand %vm4561_vm13, %vm6946_vm11  ;;  %1042 = vst [vmem:[#allocation2 + $0x2d0] sm:$0xff] %v1033_v6  ;;  %v839_v6 = vmul.f32 %v3245_v51, %v832_v48  ;;  %v841_v35 = vmul.f32 %v3247_v61, %v832_v48  ;;  %vm6948_vm7 = vcmp.ge.s32.totalorder %v3841_v50, 1  ;;  %v4662_v51 = vsel %vm4529_vm2, 1.0, %v6947_v11 }
  0xf4   : > { %1043 = vst [vmem:[#allocation2 + $0x158] sm:$0xff] %v1034_v7  ;;  %843 = vst [vmem:[#allocation2 + $0x388] sm:$0xff] %v834_v8  ;;  %v4645_v24 = vsel %vm1092_vm0, 1.0, %v6947_v11  ;;  %v840_v7 = vmul.f32 %v3246_v53, %v832_v48  ;;  %v4667_v53 = vsel %vm4537_vm5, 1.0, %v6947_v11  ;;  %v4672_v61 = vsel %vm4553_vm15, 1.0, %v6947_v11 }
  0xf5   : > { %844 = vst [vmem:[#allocation2 + $0x3e0] sm:$0xff] %v835_v23  ;;  %845 = vst [vmem:[#allocation2 + $0x630] sm:$0xff] %v836_v59  ;;  %v1106_v59 = vpop.permute.xlu0 %1105 }
  0xf6   : > { %846 = vst [vmem:[#allocation2 + $0x560] sm:$0xff] %v837_v32  ;;  %v838_v32 = vmul.f32 %v3244_v43, %v832_v48  ;;  %v1113_v8 = vmul.f32 %v4632_v45, %v1106_v59  ;;  %v1114_v23 = vmul.f32 %v4637_v41, %v1106_v59  ;;  %v1115_v63 = vmul.f32 %v4642_v14, %v1106_v59  ;;  %vm4655_vm9 = vmand %vm4465_vm1, %vm6948_vm7  ;;  %v873_v48 = vpop.permute.xlu1 %872 }
  0xf7   : > { %v1116_v25 = vmul.f32 %v4645_v24, %v1106_v59  ;;  %848 = vst [vmem:[#allocation2 + $0xd8] sm:$0xff] %v839_v6  ;;  %849 = vst [vmem:[#allocation2 + $0x680] sm:$0xff] %v840_v7  ;;  %v880_v6 = vmul.f32 %v4411_v13, %v873_v48  ;;  %v881_v7 = vmul.f32 %v4416_v33, %v873_v48  ;;  %vm6957_vm7 = vcmp.le.s32.totalorder %v3784_v36, 6 }
  0xf8   : > { %847 = vst [vmem:[#allocation2 + $0x558] sm:$0xff] %v838_v32  ;;  %850 = vst [vmem:[#allocation2 + $0x498] sm:$0xff] %v841_v35  ;;  %v879_v32 = vmul.f32 %v4406_v9, %v873_v48  ;;  %v882_v35 = vmul.f32 %v4421_v18, %v873_v48  ;;  %v6964_v9 = vmov 0 }
  0xf9   : > { %1122 = vst [vmem:[#allocation2 + $0x110] sm:$0xff] %v1113_v8  ;;  %1123 = vst [vmem:[#allocation2 + $0x3c8] sm:$0xff] %v1114_v23  ;;  %v1148_v59 = vpop.permute.xlu0 %1147 }
  0xfa   : > { %1124 = vst [vmem:[#allocation2 + $0x6a8] sm:$0xff] %v1115_v63  ;;  %1125 = vst [vmem:[#allocation2 + $0x640] sm:$0xff] %v1116_v25  ;;  %v4677_v25 = vsel %vm4561_vm13, 1.0, %v6947_v11  ;;  %v1154_v13 = vmul.f32 %v4662_v51, %v1148_v59  ;;  %v1155_v33 = vmul.f32 %v4667_v53, %v1148_v59  ;;  %v1156_v18 = vmul.f32 %v4672_v61, %v1148_v59  ;;  %v905_v48 = vpop.permute.xlu1 %904 }
  0xfb   : > { %vm4683_vm14 = vmand %vm4491_vm6, %vm6940_vm10  ;;  %v1157_v23 = vmul.f32 %v4677_v25, %v1148_v59  ;;  %888 = vst [vmem:[#allocation2 + $0x180] sm:$0xff] %v879_v32  ;;  %v4722_v59 = vsel %vm4655_vm9, 1.0, %v6947_v11  ;;  %v912_v58 = vmul.f32 %v4430_v22, %v905_v48  ;;  %v913_v8 = vmul.f32 %v4443_v15, %v905_v48 }
  0xfc   : > { %vm4695_vm12 = vmand %vm4502_vm3, %vm6943_vm8  ;;  %889 = vst [vmem:[#allocation2 + $0x658] sm:$0xff] %v880_v6  ;;  %v4727_v32 = vsel %vm4683_vm14, 1.0, %v6947_v11  ;;  %vm6960_vm8 = vcmp.le.s32.totalorder %v3787_v38, 6  ;;  %vm6963_vm14 = vcmp.le.s32.totalorder %v3790_v40, 6  ;;  %vm6973_vm13 = vcmp.ge.s32.totalorder %v3841_v50, 1 }
  0xfd   : > { %vm4703_vm0 = vmand %vm4521_vm4, %vm6946_vm11  ;;  %890 = vst [vmem:[#allocation2 + $0x4a8] sm:$0xff] %v881_v7  ;;  %v4732_v6 = vsel %vm4695_vm12, 1.0, %v6947_v11  ;;  %vm6966_vm11 = vcmp.le.s32.totalorder %v3794_v42, 6 }
  0xfe   : > { %891 = vst [vmem:[#allocation2 + $0x590] sm:$0xff] %v882_v35  ;;  %1163 = vst [vmem:[#allocation2 + $0x2f8] sm:$0xff] %v1154_v13  ;;  %v4737_v7 = vsel %vm4703_vm0, 1.0, %v6947_v11  ;;  %v1225_v35 = vpop.permute.xlu0 %1224  ;;  %v914_v13 = vmul.f32 %v4448_v16, %v905_v48  ;;  %v6967_v16 = vmov 0 }
  0xff   : > { %1164 = vst [vmem:[#allocation2 + $0x128] sm:$0xff] %v1155_v33  ;;  %1165 = vst [vmem:[#allocation2 + $0x1b8] sm:$0xff] %v1156_v18  ;;  %v915_v33 = vmul.f32 %v4453_v26, %v905_v48  ;;  %v1232_v18 = vmul.f32 %v4722_v59, %v1225_v35  ;;  %v1234_v22 = vmul.f32 %v4732_v6, %v1225_v35 }
 0x100   : > { %1166 = vst [vmem:[#allocation2 + $0x1c8] sm:$0xff] %v1157_v23  ;;  %vm4715_vm10 = vmand %vm4465_vm1, %vm6957_vm7  ;;  %v1233_v23 = vmul.f32 %v4727_v32, %v1225_v35  ;;  %v1235_v15 = vmul.f32 %v4737_v7, %v1225_v35  ;;  %vm6969_vm7 = vcmp.le.s32.totalorder %v3841_v50, 6 }
 0x101   : > { %vm4743_vm9 = vmand %vm4491_vm6, %vm6960_vm8  ;;  %921 = vst [vmem:[#allocation2 + $0x650] sm:$0xff] %v912_v58  ;;  %v3256_v26 = vsel %vm6969_vm7, 1.0, %v6947_v11  ;;  %vm6970_vm8 = vcmp.le.s32.totalorder %v3851_v52, 6  ;;  %vm6976_vm7 = vcmp.ge.s32.totalorder %v3851_v52, 1 }
 0x102   : > { %vm4755_vm12 = vmand %vm4502_vm3, %vm6963_vm14  ;;  %922 = vst [vmem:[#allocation2 + $0x4a0] sm:$0xff] %v913_v8  ;;  %v3257_v48 = vsel %vm6970_vm8, 1.0, %v6947_v11  ;;  %vm6971_vm14 = vcmp.le.s32.totalorder %v3861_v54, 6  ;;  %v1267_v31 = vpop.permute.xlu0 %1266 }
 0x103   : > { %v6965_v9 = vsel %vm4755_vm12, 4294967295, %v6964_v9  ;;  %vm4767_vm0 = vmand %vm4521_vm4, %vm6966_vm11  ;;  %923 = vst [vmem:[#allocation2 + $0x4e0] sm:$0xff] %v914_v13  ;;  %v3258_v35 = vsel %vm6971_vm14, 1.0, %v6947_v11  ;;  %vm6972_vm11 = vcmp.le.s32.totalorder %v3864_v55, 6  ;;  %v942_v13 = vpop.permute.xlu1 %941 }
 0x104   : > { %v6968_v16 = vsel %vm4767_vm0, 4294967295, %v6967_v16  ;;  %924 = vst [vmem:[#allocation2 + $0x448] sm:$0xff] %v915_v33  ;;  %v3259_v34 = vsel %vm6972_vm11, 1.0, %v6947_v11  ;;  %vm4787_vm15 = vmand %vm4715_vm10, %vm6973_vm13  ;;  %v4802_v33 = vsel %vm4465_vm1, 1.0, %v6947_v11  ;;  %vm6982_vm13 = vcmp.ge.s32.totalorder %v3861_v54, 1 }
 0x105   : > { %1241 = vst [vmem:[#allocation2 + $0x6b8] sm:$0xff] %v1232_v18  ;;  %1242 = vst [vmem:[#allocation2 + $0x60] sm:$0xff] %v1233_v23  ;;  %v4807_v18 = vsel %vm4491_vm6, 1.0, %v6947_v11  ;;  %v4812_v23 = vsel %vm4502_vm3, 1.0, %v6947_v11  ;;  %v949_v19 = vmul.f32 %v3256_v26, %v942_v13  ;;  %v950_v27 = vmul.f32 %v3257_v48, %v942_v13 }
 0x106   : > { %1243 = vst [vmem:[#allocation2 + $0x520] sm:$0xff] %v1234_v22  ;;  %1244 = vst [vmem:[#allocation2 + $0x5b8] sm:$0xff] %v1235_v15  ;;  %v4817_v22 = vsel %vm4521_vm4, 1.0, %v6947_v11  ;;  %v951_v17 = vmul.f32 %v3258_v35, %v942_v13  ;;  %v952_v12 = vmul.f32 %v3259_v34, %v942_v13  ;;  %vm6985_vm11 = vcmp.ge.s32.totalorder %v3864_v55, 1  ;;  %v1348_v58 = vpop.permute.xlu0 %1347 }
 0x107   : > { %vm4795_vm8 = vmand %vm4743_vm9, %vm6976_vm7  ;;  %6979 = vst [vmem:[#allocation22_spill] sm:$0xff] %v4807_v18  ;;  %v1273_v3 = vmul.f32 %v4802_v33, %v1267_v31  ;;  %v1274_v4 = vmul.f32 %v4807_v18, %v1267_v31  ;;  %v1275_v2 = vmul.f32 %v4812_v23, %v1267_v31  ;;  %v1276_v20 = vmul.f32 %v4817_v22, %v1267_v31  ;;  %v947_v10 = vpop.permute.xlu1 %946 }
 0x108   : > { %6980 = vst [vmem:[#allocation23_spill] sm:$0xff] %v4812_v23  ;;  %6981 = vst [vmem:[#allocation24_spill] sm:$0xff] %v4817_v22  ;;  %v4838_v13 = vsel %vm4787_vm15, 1.0, %v6947_v11  ;;  %v4843_v5 = vsel %vm4795_vm8, 1.0, %v6947_v11  ;;  %v956_v31 = vmul.f32 %v3259_v34, %v947_v10  ;;  %vm6986_vm15 = vcmp.le.s32.totalorder %v3841_v50, 6 }
 0x109   : > { %vm4823_vm14 = vmand %vm4755_vm12, %vm6982_vm13  ;;  %958 = vst [vmem:[#allocation2 + $0x90] sm:$0xff] %v949_v19  ;;  %v955_v19 = vmul.f32 %v3258_v35, %v947_v10  ;;  %v1355_v8 = vmul.f32 %v4838_v13, %v1348_v58  ;;  %v1356_v22 = vmul.f32 %v4843_v5, %v1348_v58  ;;  %vm6987_vm8 = vcmp.le.s32.totalorder %v3784_v36, 6 }
 0x10a   : > { %vm1334_vm7 = vmand %vm4767_vm0, %vm6985_vm11  ;;  %959 = vst [vmem:[#allocation2 + $0x290] sm:$0xff] %v950_v27  ;;  %v4848_v23 = vsel %vm4823_vm14, 1.0, %v6947_v11  ;;  %vm6990_vm14 = vcmp.le.s32.totalorder %v3851_v52, 6  ;;  %vm6991_vm11 = vcmp.le.s32.totalorder %v3787_v38, 6 }
 0x10b   : > { %960 = vst [vmem:[#allocation2 + $0x3d8] sm:$0xff] %v951_v17  ;;  %961 = vst [vmem:[#allocation2 + $0x2f0] sm:$0xff] %v952_v12  ;;  %v4851_v27 = vsel %vm1334_vm7, 1.0, %v6947_v11  ;;  %v953_v12 = vmul.f32 %v3256_v26, %v947_v10  ;;  %v954_v17 = vmul.f32 %v3257_v48, %v947_v10  ;;  %v1357_v15 = vmul.f32 %v4848_v23, %v1348_v58 }
 0x10c   : > { %1282 = vst [vmem:[#allocation2 + $0xf8] sm:$0xff] %v1273_v3  ;;  %1283 = vst [vmem:[#allocation2 + $0xe8] sm:$0xff] %v1274_v4  ;;  %v1358_v18 = vmul.f32 %v4851_v27, %v1348_v58  ;;  %v988_v3 = vpop.permute.xlu1 %987  ;;  %v4860_v4 = vsel %vm4715_vm10, 1.0, %v6947_v11  ;;  %v4865_v10 = vsel %vm4743_vm9, 1.0, %v6947_v11 }
 0x10d   : > { %1284 = vst [vmem:[#allocation2 + $0x3c0] sm:$0xff] %v1275_v2  ;;  %1285 = vst [vmem:[#allocation2 + $0x398] sm:$0xff] %v1276_v20  ;;  %v4870_v2 = vsel %vm4755_vm12, 1.0, %v6947_v11  ;;  %v4875_v20 = vsel %vm4767_vm0, 1.0, %v6947_v11  ;;  %v994_v34 = vmul.f32 %v4498_v60, %v988_v3  ;;  %v995_v26 = vmul.f32 %v4509_v37, %v988_v3 }
 0x10e   : > { %962 = vst [vmem:[#allocation2 + $0x618] sm:$0xff] %v953_v12  ;;  %963 = vst [vmem:[#allocation2 + $0x138] sm:$0xff] %v954_v17  ;;  %v996_v48 = vmul.f32 %v4514_v0, %v988_v3  ;;  %v997_v35 = vmul.f32 %v4517_v62, %v988_v3  ;;  %vm6998_vm12 = vcmp.le.s32.totalorder %v3864_v55, 6 }
 0x10f   : > { %964 = vst [vmem:[#allocation2 + $0xc8] sm:$0xff] %v955_v19  ;;  %965 = vst [vmem:[#allocation2 + $0x1d8] sm:$0xff] %v956_v31 }
 0x110   : > { %1364 = vst [vmem:[#allocation2 + $0x268] sm:$0xff] %v1355_v8  ;;  %1365 = vst [vmem:[#allocation2 + $0x578] sm:$0xff] %v1356_v22  ;;  %v1020_v62 = vpop.permute.xlu1 %1019 }
 0x111   : > { %1366 = vst [vmem:[#allocation2 + $0x3a8] sm:$0xff] %v1357_v15  ;;  %1367 = vst [vmem:[#allocation2 + $0x178] sm:$0xff] %v1358_v18  ;;  %v1390_v18 = vpop.permute.xlu0 %1389  ;;  %v1027_v38 = vmul.f32 %v4588_v46, %v1020_v62  ;;  %v1028_v19 = vmul.f32 %v4593_v21, %v1020_v62  ;;  %v1030_v31 = vmul.f32 %v4603_v57, %v1020_v62 }
 0x112   : > { %vm4885_vm13 = vmand %vm6987_vm8, %vm6986_vm15  ;;  %v1396_v12 = vmul.f32 %v4860_v4, %v1390_v18  ;;  %v1397_v17 = vmul.f32 %v4865_v10, %v1390_v18  ;;  %v1398_v60 = vmul.f32 %v4870_v2, %v1390_v18  ;;  %v1399_v37 = vmul.f32 %v4875_v20, %v1390_v18  ;;  %1003 = vst [vmem:[#allocation2 + $0x308] sm:$0xff] %v994_v34 }
 0x113   : > { %1004 = vst [vmem:[#allocation2 + $0x470] sm:$0xff] %v995_v26  ;;  %1005 = vst [vmem:[#allocation2 + $0x410] sm:$0xff] %v996_v48  ;;  %vm6994_vm15 = vcmp.le.s32.totalorder %v3861_v54, 6  ;;  %vm6995_vm8 = vcmp.le.s32.totalorder %v3790_v40, 6  ;;  %v1029_v40 = vmul.f32 %v4598_v56, %v1020_v62  ;;  %v3268_v58 = vsel %vm4885_vm13, 1.0, %v6947_v11 }
 0x114   : > { %1006 = vst [vmem:[#allocation2 + $0x1a0] sm:$0xff] %v997_v35  ;;  %vm4897_vm7 = vmand %vm6991_vm11, %vm6990_vm14  ;;  %vm6999_vm14 = vcmp.le.s32.totalorder %v3794_v42, 6  ;;  %v1061_v56 = vpop.permute.xlu1 %1060  ;;  %vm7003_vm13 = vcmp.le.s32.totalorder %v3851_v52, 6 }
 0x115   : > { %vm4905_vm0 = vmand %vm6995_vm8, %vm6994_vm15  ;;  %1405 = vst [vmem:[#allocation2 + $0x20] sm:$0xff] %v1396_v12  ;;  %v3269_v42 = vsel %vm4897_vm7, 1.0, %v6947_v11  ;;  %v1068_v57 = vmul.f32 %v3268_v58, %v1061_v56  ;;  %vm7004_vm8 = vnez %v6925_v49 }
 0x116   : > { %1406 = vst [vmem:[#allocation2 + $0x4b0] sm:$0xff] %v1397_v17  ;;  %1407 = vst [vmem:[#allocation2 + $0x140] sm:$0xff] %v1398_v60  ;;  %v3270_v46 = vsel %vm4905_vm0, 1.0, %v6947_v11  ;;  %v1069_v8 = vmul.f32 %v3269_v42, %v1061_v56 }
 0x117   : > { %1408 = vst [vmem:[#allocation2 + $0x4b8] sm:$0xff] %v1399_v37  ;;  %vm1047_vm11 = vmand %vm6999_vm14, %vm6998_vm12  ;;  %v1070_v15 = vmul.f32 %v3270_v46, %v1061_v56  ;;  %vm7000_vm12 = vcmp.le.s32.totalorder %v3841_v50, 6 }
 0x118   : > { %1036 = vst [vmem:[#allocation2 + $0x3a0] sm:$0xff] %v1027_v38  ;;  %1037 = vst [vmem:[#allocation2 + $0x4e8] sm:$0xff] %v1028_v19  ;;  %v3271_v21 = vsel %vm1047_vm11, 1.0, %v6947_v11  ;;  %v1066_v34 = vpop.permute.xlu1 %1065  ;;  %vm7006_vm11 = vnez %v6928_v44 }
 0x119   : > { %1038 = vst [vmem:[#allocation2 + $0x460] sm:$0xff] %v1029_v40  ;;  %1039 = vst [vmem:[#allocation2 + $0x168] sm:$0xff] %v1030_v31  ;;  %v1071_v3 = vmul.f32 %v3271_v21, %v1061_v56  ;;  %v1072_v26 = vmul.f32 %v3268_v58, %v1066_v34  ;;  %v1073_v48 = vmul.f32 %v3269_v42, %v1066_v34 }
 0x11a   : > { %1077 = vst [vmem:[#allocation2 + $0x5e0] sm:$0xff] %v1068_v57  ;;  %1078 = vst [vmem:[#allocation2 + $0x4f0] sm:$0xff] %v1069_v8  ;;  %v1074_v35 = vmul.f32 %v3270_v46, %v1066_v34  ;;  %v1075_v18 = vmul.f32 %v3271_v21, %v1066_v34 }
 0x11b   : > { %1079 = vst [vmem:[#allocation2 + $0x160] sm:$0xff] %v1070_v15  ;;  %1080 = vst [vmem:[#allocation2 + $0x420] sm:$0xff] %v1071_v3  ;;  %v7013_v3 = vld [vmem:[#allocation24_spill] sm:$0xff] }
 0x11c   : > { %1081 = vst [vmem:[#allocation2 + $0x598] sm:$0xff] %v1072_v26  ;;  %1082 = vst [vmem:[#allocation2 + $0x4c0] sm:$0xff] %v1073_v48  ;;  %v1111_v22 = vpop.permute.xlu1 %1110 }
 0x11d   : > { %1083 = vst [vmem:[#allocation2 + $0x3b0] sm:$0xff] %v1074_v35  ;;  %1084 = vst [vmem:[#allocation2 + $0x210] sm:$0xff] %v1075_v18  ;;  %v1117_v12 = vmul.f32 %v4632_v45, %v1111_v22  ;;  %v1118_v17 = vmul.f32 %v4637_v41, %v1111_v22  ;;  %v1119_v60 = vmul.f32 %v4642_v14, %v1111_v22 }
 0x11e   : > { %v1120_v37 = vmul.f32 %v4645_v24, %v1111_v22  ;;  %vm4935_vm0 = vmand %vm4529_vm2, %vm7000_vm12  ;;  %vm7005_vm2 = vcmp.le.s32.totalorder %v3864_v55, 6 }
 0x11f   : > { %1126 = vst [vmem:[#allocation2 + $0xb8] sm:$0xff] %v1117_v12  ;;  %1127 = vst [vmem:[#allocation2 + $0x68] sm:$0xff] %v1118_v17  ;;  %v3280_v49 = vsel %vm4935_vm0, 1.0, %v6947_v11 }
 0x120   : > { %1128 = vst [vmem:[#allocation2 + $0x450] sm:$0xff] %v1119_v60  ;;  %1129 = vst [vmem:[#allocation2 + $0xb0] sm:$0xff] %v1120_v37  ;;  %v1143_v45 = vpop.permute.xlu1 %1142 }
 0x121   : > { %vm1168_vm7 = vmand %vm4537_vm5, %vm7003_vm13  ;;  %v1150_v39 = vmul.f32 %v4662_v51, %v1143_v45  ;;  %v1151_v41 = vmul.f32 %v4667_v53, %v1143_v45  ;;  %v1152_v14 = vmul.f32 %v4672_v61, %v1143_v45  ;;  %v1153_v30 = vmul.f32 %v4677_v25, %v1143_v45 }
 0x122   : > { %vm1169_vm14 = vmand %vm7004_vm8, %vm6994_vm15  ;;  %v3281_v24 = vsel %vm1168_vm7, 1.0, %v6947_v11  ;;  %vm7007_vm5 = vcmp.le.s32.totalorder %v3841_v50, 6 }
 0x123   : > { %vm1170_vm12 = vmand %vm7006_vm11, %vm7005_vm2  ;;  %1159 = vst [vmem:[#allocation2 + $0x510] sm:$0xff] %v1150_v39  ;;  %v3282_v44 = vsel %vm1169_vm14, 1.0, %v6947_v11 }
 0x124   : > { %1160 = vst [vmem:[#allocation2 + $0x538] sm:$0xff] %v1151_v41  ;;  %1161 = vst [vmem:[#allocation2 + $0xa8] sm:$0xff] %v1152_v14  ;;  %v3283_v51 = vsel %vm1170_vm12, 1.0, %v6947_v11  ;;  %v1184_v0 = vpop.permute.xlu1 %1183  ;;  %vm7017_vm12 = vnez %v6965_v9 }
 0x125   : > { %1162 = vst [vmem:[#allocation2 + $0x478] sm:$0xff] %v1153_v30  ;;  %v1191_v53 = vmul.f32 %v3280_v49, %v1184_v0  ;;  %v1192_v62 = vmul.f32 %v3281_v24, %v1184_v0  ;;  %v1193_v61 = vmul.f32 %v3282_v44, %v1184_v0  ;;  %v1194_v38 = vmul.f32 %v3283_v51, %v1184_v0  ;;  %vm4969_vm0 = vmand %vm4465_vm1, %vm7007_vm5 }
 0x126   : > { %vm1287_vm7 = vmand %vm4491_vm6, %vm7003_vm13  ;;  %v3292_v28 = vsel %vm4969_vm0, 1.0, %v6947_v11 }
 0x127   : > { %1200 = vst [vmem:[#allocation2 + $0x5b0] sm:$0xff] %v1191_v53  ;;  %1201 = vst [vmem:[#allocation2 + $0x120] sm:$0xff] %v1192_v62  ;;  %v3293_v34 = vsel %vm1287_vm7, 1.0, %v6947_v11 }
 0x128   : > { %1202 = vst [vmem:[#allocation2 + $0xc0] sm:$0xff] %v1193_v61  ;;  %1203 = vst [vmem:[#allocation2 + $0x278] sm:$0xff] %v1194_v38  ;;  %v1189_v25 = vpop.permute.xlu1 %1188 }
 0x129   : > { %v1195_v19 = vmul.f32 %v3280_v49, %v1189_v25  ;;  %v1196_v40 = vmul.f32 %v3281_v24, %v1189_v25  ;;  %v1197_v31 = vmul.f32 %v3282_v44, %v1189_v25  ;;  %v1198_v58 = vmul.f32 %v3283_v51, %v1189_v25  ;;  %vm1288_vm8 = vmand %vm4502_vm3, %vm6994_vm15 }
 0x12a   : > { %vm7010_vm1 = vmmov %vm7005_vm2  ;;  %v3294_v29 = vsel %vm1288_vm8, 1.0, %v6947_v11 }
 0x12b   : > { %1204 = vst [vmem:[#allocation2 + $0x198] sm:$0xff] %v1195_v19  ;;  %1205 = vst [vmem:[#allocation2 + $0x150] sm:$0xff] %v1196_v40 }
 0x12c   : > { %1206 = vst [vmem:[#allocation2 + $0x5c8] sm:$0xff] %v1197_v31  ;;  %1207 = vst [vmem:[#allocation2 + $0x2a8] sm:$0xff] %v1198_v58  ;;  %v1230_v42 = vpop.permute.xlu1 %1229 }
 0x12d   : > { %v1236_v46 = vmul.f32 %v4722_v59, %v1230_v42  ;;  %v1237_v21 = vmul.f32 %v4727_v32, %v1230_v42  ;;  %v1238_v56 = vmul.f32 %v4732_v6, %v1230_v42  ;;  %v1239_v57 = vmul.f32 %v4737_v7, %v1230_v42  ;;  %vm1289_vm14 = vmand %vm4521_vm4, %vm7010_vm1  ;;  %v7011_v32 = vld [vmem:[#allocation22_spill] sm:$0xff]  ;;  %v7012_v7 = vld [vmem:[#allocation23_spill] sm:$0xff] }
 0x12e   : > { %vm7014_vm6 = vmmov %vm7007_vm5 }
 0x12f   : > { %1245 = vst [vmem:[#allocation2 + $0x240] sm:$0xff] %v1236_v46  ;;  %1246 = vst [vmem:[#allocation2 + $0x288] sm:$0xff] %v1237_v21 }
 0x130   : > { %1247 = vst [vmem:[#allocation2 + $0x148] sm:$0xff] %v1238_v56  ;;  %1248 = vst [vmem:[#allocation2 + $0x1c0] sm:$0xff] %v1239_v57  ;;  %v1262_v59 = vpop.permute.xlu1 %1261 }
 0x131   : > { %v1269_v1 = vmul.f32 %v4802_v33, %v1262_v59  ;;  %v1270_v6 = vmul.f32 %v7011_v32, %v1262_v59  ;;  %v1271_v15 = vmul.f32 %v7012_v7, %v1262_v59  ;;  %v1272_v47 = vmul.f32 %v7013_v3, %v1262_v59  ;;  %vm1409_vm3 = vmand %vm4715_vm10, %vm7014_vm6 }
 0x132   : > { %v3295_v33 = vsel %vm1289_vm14, 1.0, %v6947_v11  ;;  %vm7015_vm4 = vmmov %vm7003_vm13  ;;  %vm7019_vm13 = vnez %v6968_v16 }
 0x133   : > { %1278 = vst [vmem:[#allocation2 + $0x690] sm:$0xff] %v1269_v1  ;;  %1279 = vst [vmem:[#allocation2 + $0x548] sm:$0xff] %v1270_v6 }
 0x134   : > { %1280 = vst [vmem:[#allocation2 + $0x530] sm:$0xff] %v1271_v15  ;;  %1281 = vst [vmem:[#allocation2 + $0x570] sm:$0xff] %v1272_v47  ;;  %v1303_v26 = vpop.permute.xlu1 %1302 }
 0x135   : > { %v1310_v48 = vmul.f32 %v3292_v28, %v1303_v26  ;;  %v1311_v35 = vmul.f32 %v3293_v34, %v1303_v26  ;;  %v1312_v18 = vmul.f32 %v3294_v29, %v1303_v26  ;;  %v1313_v22 = vmul.f32 %v3295_v33, %v1303_v26  ;;  %vm1410_vm2 = vmand %vm4743_vm9, %vm7015_vm4 }
 0x136   : > { %vm7016_vm11 = vmmov %vm6994_vm15  ;;  %v3305_v54 = vsel %vm1410_vm2, 1.0, %v6947_v11 }
 0x137   : > { %1319 = vst [vmem:[#allocation2 + $0x468] sm:$0xff] %v1310_v48  ;;  %1320 = vst [vmem:[#allocation2 + $0x2e8] sm:$0xff] %v1311_v35 }
 0x138   : > { %1321 = vst [vmem:[#allocation2 + $0x1f0] sm:$0xff] %v1312_v18  ;;  %1322 = vst [vmem:[#allocation2 + $0x1f8] sm:$0xff] %v1313_v22  ;;  %v1308_v12 = vpop.permute.xlu1 %1307 }
 0x139   : > { %v1314_v17 = vmul.f32 %v3292_v28, %v1308_v12  ;;  %v1315_v60 = vmul.f32 %v3293_v34, %v1308_v12  ;;  %v1316_v37 = vmul.f32 %v3294_v29, %v1308_v12  ;;  %v1317_v36 = vmul.f32 %v3295_v33, %v1308_v12  ;;  %vm1411_vm5 = vmand %vm7017_vm12, %vm7016_vm11 }
 0x13a   : > { %vm7018_vm0 = vmmov %vm7010_vm1  ;;  %v3306_v9 = vsel %vm1411_vm5, 1.0, %v6947_v11 }
 0x13b   : > { %1323 = vst [vmem:[#allocation2 + $0x2d8] sm:$0xff] %v1314_v17  ;;  %1324 = vst [vmem:[#allocation2 + $0x4f8] sm:$0xff] %v1315_v60 }
 0x13c   : > { %1325 = vst [vmem:[#allocation2 + $0x2a0] sm:$0xff] %v1316_v37  ;;  %1326 = vst [vmem:[#allocation2 + $0x458] sm:$0xff] %v1317_v36  ;;  %v1353_v45 = vpop.permute.xlu1 %1352 }
 0x13d   : > { %v1359_v39 = vmul.f32 %v4838_v13, %v1353_v45  ;;  %v1360_v41 = vmul.f32 %v4843_v5, %v1353_v45  ;;  %v1361_v14 = vmul.f32 %v4848_v23, %v1353_v45  ;;  %v1362_v30 = vmul.f32 %v4851_v27, %v1353_v45  ;;  %vm1412_vm10 = vmand %vm7019_vm13, %vm7018_vm0 }
 0x13e   : > { %v3304_v23 = vsel %vm1409_vm3, 1.0, %v6947_v11  ;;  %v3307_v13 = vsel %vm1412_vm10, 1.0, %v6947_v11 }
 0x13f   : > { %1368 = vst [vmem:[#allocation2 + $0x608] sm:$0xff] %v1359_v39  ;;  %1369 = vst [vmem:[#allocation2 + $0x218] sm:$0xff] %v1360_v41 }
 0x140   : > { %1370 = vst [vmem:[#allocation2 + $0x1d0] sm:$0xff] %v1361_v14  ;;  %1371 = vst [vmem:[#allocation2 + $0x130] sm:$0xff] %v1362_v30  ;;  %v1385_v5 = vpop.permute.xlu1 %1384 }
 0x141   : > { %v1392_v50 = vmul.f32 %v4860_v4, %v1385_v5  ;;  %v1393_v63 = vmul.f32 %v4865_v10, %v1385_v5  ;;  %v1394_v52 = vmul.f32 %v4870_v2, %v1385_v5  ;;  %v1395_v43 = vmul.f32 %v4875_v20, %v1385_v5 }
 0x143   : > { %1401 = vst [vmem:[#allocation2 + $0x228] sm:$0xff] %v1392_v50  ;;  %1402 = vst [vmem:[#allocation2 + $0x230] sm:$0xff] %v1393_v63 }
 0x144   : > { %1403 = vst [vmem:[#allocation2 + $0x258] sm:$0xff] %v1394_v52  ;;  %1404 = vst [vmem:[#allocation2 + $0x118] sm:$0xff] %v1395_v43  ;;  %v1426_v55 = vpop.permute.xlu1 %1425 }
 0x145   : > { %v1433_v16 = vmul.f32 %v3304_v23, %v1426_v55  ;;  %v1434_v27 = vmul.f32 %v3305_v54, %v1426_v55  ;;  %v1435_v4 = vmul.f32 %v3306_v9, %v1426_v55  ;;  %v1436_v10 = vmul.f32 %v3307_v13, %v1426_v55 }
 0x147   : > { %1442 = vst [vmem:[#allocation2 + $0x500] sm:$0xff] %v1433_v16  ;;  %1443 = vst [vmem:[#allocation2 + $0x688] sm:$0xff] %v1434_v27 }
 0x148   : > { %1444 = vst [vmem:[#allocation2 + $0x280] sm:$0xff] %v1435_v4  ;;  %1445 = vst [vmem:[#allocation2 + $0x260] sm:$0xff] %v1436_v10  ;;  %v1431_v2 = vpop.permute.xlu1 %1430 }
 0x149   : > { %v1437_v20 = vmul.f32 %v3304_v23, %v1431_v2  ;;  %v1438_v49 = vmul.f32 %v3305_v54, %v1431_v2  ;;  %v1439_v24 = vmul.f32 %v3306_v9, %v1431_v2  ;;  %v1440_v44 = vmul.f32 %v3307_v13, %v1431_v2 }
 0x14b   : > { %1446 = vst [vmem:[#allocation2 + $0x5a8] sm:$0xff] %v1437_v20  ;;  %1447 = vst [vmem:[#allocation2 + $0x2c8] sm:$0xff] %v1438_v49 }
 0x14c   : > { %1448 = vst [vmem:[#allocation2 + $0x78] sm:$0xff] %v1439_v24  ;;  %1449 = vst [vmem:[#allocation2 + $0x238] sm:$0xff] %v1440_v44 }
 0x14d LB: >> { %v3586_v11 = vmov 0.0   ;;  %s6631_s29 = sshll.u32 %s3557_s28, 4  ;;  %vm6698_vm9 = vcmask 1043456   ;;  %vm1480_vm7 = vcmask 31744   ;;  %v7022_v61 = vld [vmem:[#allocation9_spill] sm:$0xff]  ;;  %v7023_v38 = vld [vmem:[#allocation10_spill] sm:$0xff]  ;;  %s3557_s28 = sphi %s5024_s28, %s1470_s28  }
 0x14e   : >> { %1560 = vmatprep.mubr.f32.mxu0 %v3586_v11  ;;  %1637 = vmatprep.mubr.f32.mxu1 %v3586_v11  ;;  %s5033_s12 = scalar_lea.vmem %s4261_s21, %s6631_s29  ;;  %v3587_v25 = vmov 0   ;;  %v7024_v19 = vld [vmem:[#allocation15_spill] sm:$0xff]  ;;  %v7025_v40 = vld [vmem:[#allocation14_spill] sm:$0xff]  ;;  %v3588_v31 = vmov 13   ;;  %v7026_v58 = vld [vmem:[#allocation8_spill] sm:$0xff]  ;;  %s6632_s18 = smov 73  }
 0x14f   : >> { %v1474_v51 = vld [vmem:[%s5033_s12] sm:$0xff]  ;;  %v1475_v0 = vld [vmem:[%s5033_s12 + $0x8] sm:$0xff]  ;;  %3471 = vset.pattern.permute.xlu1 %v3587_v25  ;;  %3474 = vset.pattern.permute.xlu0 %v3587_v25  ;;  %s6634_s20 = smov 72   ;;  %s6640_s25 = smov 71  }
 0x150   : >> { %v5037_v53 = vcombine.high %v1474_v51, %v1474_v51  ;;  %v5039_v62 = vcombine.high %v1475_v0, %v1475_v0  ;;  %1721 = vperm.xlu1 %3471, %v7024_v19   ;;  %v7027_v42 = vld [vmem:[#allocation7_spill] sm:$0xff]  ;;  %s6662_s30 = smov 65   ;;  %s6660_s26 = smov 64  }
 0x151   : >> { %s6636_s27 = smov 63   ;;  %s6638_s29 = smov 57  }
 0x152   : >> { %7020 = vst [vmem:[#allocation25_spill] sm:$0xff] %v5037_v53  ;;  %7021 = vst [vmem:[#allocation26_spill] sm:$0xff] %v5039_v62  ;;  %3310 = vmatprep.subr.msk.mxu0 %vm6698_vm9, %v5037_v53  ;;  %3314 = vmatprep.subr.msk.mxu1 %vm6698_vm9, %v5039_v62  ;;  %s7038_s0 = smov 65   ;;  %s7039_s1 = smov 8   ;;  %v1786_v53 = vld [vmem:[#allocation2 + $0x18] sm:$0xff] }
 0x153   : >> { %3311 = vmatpush1.msk.msra.mxu0 %vm6698_vm9, %v1474_v51  ;;  %3315 = vmatpush1.msk.msra.mxu1 %vm6698_vm9, %v1475_v0  ;;  %s7040_s2 = smov 64   ;;  %s7041_s3 = smov 7  }
 0x154   : >> { %3312 = vmatmul.mubr.msk.f32.vlgmr.msra.gmra.mxu0 %vm1480_vm7, %v7022_v61  ;;  %3316 = vmatmul.mubr.msk.f32.vlgmr.msra.gmra.mxu1 %vm1480_vm7, %v7022_v61  ;;  %s7042_s4 = smov 1   ;;  %s7043_s5 = smov 127  }
 0x155   : >> { %1566 = vmatprep.mubr.f32.mxu0 %v3586_v11  ;;  %1643 = vmatprep.mubr.f32.mxu1 %v3586_v11  ;;  %s7044_s6 = smov 56   ;;  %s7045_s7 = smov 121  }
 0x156   : >> { %1716 = vperm.xlu1 %3471, %v7025_v40   ;;  %s7046_s8 = smov 120   ;;  %s7047_s9 = smov 119  }
 0x158   : >> { %3313 = vmatmul.mubr.msk.f32.gmra.mxu0 %vm1480_vm7, %v7023_v38  ;;  %3317 = vmatmul.mubr.msk.f32.gmra.mxu1 %vm1480_vm7, %v7023_v38 }
 0x159   : >> { %2965 = vmatprep.mubr.f32.mxu0 %v3586_v11  ;;  %3036 = vmatprep.mubr.f32.mxu1 %v3586_v11  ;;  %v7029_v11 = vld [vmem:[#allocation12_spill] sm:$0xff] }
 0x15a   : >> { %3472 = vset.pattern.permute.xlu1 %v3588_v31 }
 0x15b   : >> { %1747 = vperm.xlu1 %3472, %v7026_v58  }
 0x15f   : >> { %1742 = vperm.xlu1 %3472, %v7027_v42  }
 0x163   : >> { %3473 = vset.pattern.permute.xlu1 %v3587_v25  ;;  %v7030_v25 = vld [vmem:[#allocation13_spill] sm:$0xff] }
 0x1cb   : >> { %v5071_v13 = vpop.permute.xlu1 %1721 }
 0x1d1   : >> { %v1717_v55 = vpop.permute.xlu1 %1716 }
 0x1d6   : >> { %v5073_v16 = vpop.permute.xlu1 %1747 }
 0x1d7   : >> { %7028 = vst [vmem:[#allocation27_spill] sm:$0xff] %v5073_v16  ;;  %v1833_v16 = vld [vmem:[#allocation2 + $0x550] sm:$0xff] }
 0x1da   : >> { %v5075_v27 = vpop.permute.xlu1 %1742 }
 0x214   : >> { %v1562_v46 = vpop.f32.mrf.mxu0  ;;  %v1639_v21 = vpop.f32.mrf.mxu1 }
 0x216   : >> { %v1564_v56 = vpop.f32.mrf.mxu0  ;;  %v1641_v57 = vpop.f32.mrf.mxu1 }
 0x217   : >> { %v1650_v8 = vadd.f32 %v1564_v56, %v1562_v46 }
 0x218   : >> { %v1568_v59 = vpop.f32.mrf.mxu0  ;;  %v1645_v1 = vpop.f32.mrf.mxu1 }
 0x219   : >> { %v1651_v32 = vadd.f32 %v1650_v8, %v1639_v21 }
 0x21a   : >> { %v1570_v6 = vpop.f32.mrf.mxu0  ;;  %v1647_v3 = vpop.f32.mrf.mxu1 }
 0x21b   : >> { %v1655_v7 = vadd.f32 %v1570_v6, %v1568_v59  ;;  %v1652_v15 = vadd.f32 %v1651_v32, %v1641_v57 }
 0x21d   : >> { %v1656_v47 = vadd.f32 %v1655_v7, %v1645_v1  ;;  %1653 = vadd.xlane.f32.xlu0 %v1652_v15 }
 0x21f   : >> { %v1657_v28 = vadd.f32 %v1656_v47, %v1647_v3 }
 0x221   : >> { %1658 = vadd.xlane.f32.xlu0 %v1657_v28 }
 0x2a6   : >> { %v1654_v34 = vpop.xlane.xlu0 %1653 }
 0x2a7   : >> { %v1660_v29 = vmul.f32 0.001953125, %v1654_v34 }
 0x2a9   : >> { %v1662_v33 = vsub.f32 %v1562_v46, %v1660_v29  ;;  %v1663_v26 = vsub.f32 %v1564_v56, %v1660_v29  ;;  %v1664_v48 = vsub.f32 %v1639_v21, %v1660_v29  ;;  %v1665_v18 = vsub.f32 %v1641_v57, %v1660_v29 }
 0x2aa   : >> { %v1659_v35 = vpop.xlane.xlu0 %1658 }
 0x2ab   : >> { %v1661_v22 = vmul.f32 0.001953125, %v1659_v35  ;;  %v1670_v12 = vmul.f32 %v1662_v33, %v1662_v33  ;;  %v1671_v17 = vmul.f32 %v1663_v26, %v1663_v26  ;;  %v1672_v60 = vmul.f32 %v1664_v48, %v1664_v48 }
 0x2ac   : >> { %v1673_v41 = vmul.f32 %v1665_v18, %v1665_v18 }
 0x2ad   : >> { %v1678_v37 = vadd.f32 %v1671_v17, %v1670_v12  ;;  %v5055_v36 = vsub.f32 %v1568_v59, %v1661_v22  ;;  %v5057_v45 = vsub.f32 %v1570_v6, %v1661_v22  ;;  %v5059_v39 = vsub.f32 %v1645_v1, %v1661_v22 }
 0x2ae   : >> { %v5061_v30 = vsub.f32 %v1647_v3, %v1661_v22 }
 0x2af   : >> { %v1679_v14 = vadd.f32 %v1678_v37, %v1672_v60  ;;  %v1674_v5 = vmul.f32 %v5055_v36, %v5055_v36  ;;  %v1675_v50 = vmul.f32 %v5057_v45, %v5057_v45  ;;  %v1676_v52 = vmul.f32 %v5059_v39, %v5059_v39 }
 0x2b0   : >> { %v1677_v23 = vmul.f32 %v5061_v30, %v5061_v30 }
 0x2b1   : >> { %v1680_v63 = vadd.f32 %v1679_v14, %v1673_v41  ;;  %v1683_v43 = vadd.f32 %v1675_v50, %v1674_v5 }
 0x2b3   : >> { %1681 = vadd.xlane.f32.xlu1 %v1680_v63  ;;  %v1684_v54 = vadd.f32 %v1683_v43, %v1676_v52 }
 0x2b5   : >> { %v1685_v9 = vadd.f32 %v1684_v54, %v1677_v23 }
 0x2b7   : >> { %1686 = vadd.xlane.f32.xlu1 %v1685_v9 }
 0x33c   : >> { %v1682_v4 = vpop.xlane.xlu1 %1681 }
 0x33d   : >> { %v1688_v10 = vmul.f32 0.001953125, %v1682_v4 }
 0x33f   : >> { %v1690_v2 = vadd.f32 1e-05, %v1688_v10 }
 0x340   : >> { %v1687_v20 = vpop.xlane.xlu1 %1686 }
 0x341   : >> { %3477 = vrsqrt.f32 %v1690_v2  ;;  %v1689_v49 = vmul.f32 0.001953125, %v1687_v20 }
 0x343   : >> { %v1691_v24 = vadd.f32 1e-05, %v1689_v49 }
 0x345   : >> { %3479 = vrsqrt.f32 %v1691_v24 }
 0x34e   : >> { %v3478_v44 = vpop.eup %3477 }
 0x34f   : >> { %v1694_v51 = vmul.f32 %v3478_v44, %v7029_v11 }
 0x351   : >> { %1698 = vperm.xlu1 %3473, %v1694_v51  }
 0x352   : >> { %v3480_v0 = vpop.eup %3479 }
 0x353   : >> { %v1695_v19 = vmul.f32 %v3480_v0, %v7030_v25 }
 0x355   : >> { %1703 = vperm.xlu0 %3474, %v1695_v19  }
 0x3cc   : >> { %v1699_v40 = vpop.permute.xlu1 %1698 }
 0x3cd   : >> { %v1706_v31 = vmul.f32 %v1699_v40, %v1662_v33  ;;  %v1707_v58 = vmul.f32 %v1699_v40, %v1663_v26  ;;  %v1709_v42 = vmul.f32 %v1699_v40, %v1665_v18  ;;  %v1708_v56 = vmul.f32 %v1699_v40, %v1664_v48 }
 0x3cf   : >> { %v1724_v46 = vadd.f32 %v1717_v55, %v1706_v31  ;;  %v1725_v21 = vadd.f32 %v1717_v55, %v1707_v58  ;;  %v1727_v57 = vadd.f32 %v1717_v55, %v1709_v42  ;;  %v1726_v1 = vadd.f32 %v1717_v55, %v1708_v56 }
 0x3d0   : >> { %v5159_v7 = vpop.permute.xlu0 %1703 }
 0x3d1   : >> { %v5079_v8 = vmax.f32 %v1724_v46, 0.0  ;;  %v5081_v59 = vmax.f32 %v1725_v21, 0.0  ;;  %v5087_v32 = vmax.f32 %v1727_v57, 0.0  ;;  %v5093_v6 = vmax.f32 %v1726_v1, 0.0 }
 0x3d2   : >> { %v1712_v15 = vmul.f32 %v5159_v7, %v5059_v39  ;;  %v1710_v3 = vmul.f32 %v5159_v7, %v5055_v36  ;;  %v1713_v28 = vmul.f32 %v5159_v7, %v5061_v30  ;;  %v1711_v19 = vmul.f32 %v5159_v7, %v5057_v45 }
 0x3d3   : >> { %1762 = vrot.lane.b32.xlu1 %v5081_v59, %s6632_s18  ;;  %1758 = vrot.lane.b32.xlu0 %v5079_v8, %s6632_s18 }
 0x3d4   : >> { %v1730_v47 = vadd.f32 %v5071_v13, %v1712_v15  ;;  %v1728_v34 = vadd.f32 %v5071_v13, %v1710_v3  ;;  %v1731_v33 = vadd.f32 %v5071_v13, %v1713_v28  ;;  %v1729_v58 = vadd.f32 %v5071_v13, %v1711_v19  ;;  %v1784_v28 = vld [vmem:[#allocation2 + $0x3f0] sm:$0xff] }
 0x3d6   : >> { %v5181_v29 = vmax.f32 %v1730_v47, 0.0  ;;  %v5188_v26 = vmax.f32 %v1728_v34, 0.0  ;;  %v5194_v48 = vmax.f32 %v1731_v33, 0.0  ;;  %v5367_v45 = vmax.f32 %v1729_v58, 0.0  ;;  %v7051_v47 = vld [vmem:[#allocation6_spill] sm:$0xff]  ;;  %v1783_v33 = vld [vmem:[#allocation2 + $0x2b0] sm:$0xff] }
 0x3d7   : >> { %1770 = vrot.lane.b32.xlu1 %v5087_v32, %s6632_s18  ;;  %1807 = vrot.lane.b32.xlu0 %v5079_v8, %s6634_s20  ;;  %vm1774_vm15 = vcmp.lt.s32.totalorder %v7051_v47, 73  ;;  %vm1823_vm8 = vcmp.lt.s32.totalorder %v7051_v47, 72  ;;  %v1785_v58 = vld [vmem:[#allocation2 + $0x518] sm:$0xff]  ;;  %vm1872_vm1 = vcmp.lt.s32.totalorder %v7051_v47, 71  ;;  %vm1921_vm14 = vcmp.lt.s32.totalorder %v7051_v47, 65 }
 0x3d8   : >> { %vm1970_vm6 = vcmp.lt.s32.totalorder %v7051_v47, 64  ;;  %vm2019_vm3 = vcmp.lt.s32.totalorder %v7051_v47, 63  ;;  %vm2068_vm4 = vcmp.lt.s32.totalorder %v7051_v47, 57  ;;  %vm2117_vm2 = vcmp.lt.s32.totalorder %v7051_v47, 56 }
 0x3d9   : >> { %vm2166_vm11 = vcmp.lt.s32.totalorder %v7051_v47, 55  ;;  %vm2215_vm12 = vcmp.lt.s32.totalorder %v7051_v47, 9  ;;  %vm2264_vm5 = vcmp.lt.s32.totalorder %v7051_v47, 8  ;;  %vm2313_vm0 = vcmp.lt.s32.totalorder %v7051_v47, 7 }
 0x3da   : >> { %vm2362_vm13 = vcmp.lt.s32.totalorder %v7051_v47, 1  ;;  %vm2411_vm10 = vcmp.lt.s32.totalorder %v7051_v47, 127  ;;  %vm6699_vm7 = vcmp.lt.s32.totalorder %v7051_v47, 121  ;;  %vm2509_vm9 = vcmp.lt.s32.totalorder %v7051_v47, 120 }
 0x3db   : >> { %1766 = vrot.lane.b32.xlu1 %v5093_v6, %s6632_s18  ;;  %1856 = vrot.lane.b32.xlu0 %v5079_v8, %s6640_s25  ;;  %s6664_s18 = smov 56  }
 0x3df   : >> { %1811 = vrot.lane.b32.xlu1 %v5081_v59, %s6634_s20  ;;  %1905 = vrot.lane.b32.xlu0 %v5079_v8, %s6662_s30 }
 0x3e3   : >> { %1819 = vrot.lane.b32.xlu1 %v5087_v32, %s6634_s20  ;;  %1954 = vrot.lane.b32.xlu0 %v5079_v8, %s6660_s26 }
 0x3e7   : >> { %1815 = vrot.lane.b32.xlu1 %v5093_v6, %s6634_s20  ;;  %2003 = vrot.lane.b32.xlu0 %v5079_v8, %s6636_s27  ;;  %s6642_s20 = smov 55   ;;  %s6644_s27 = smov 9  }
 0x3eb   : >> { %1860 = vrot.lane.b32.xlu1 %v5081_v59, %s6640_s25  ;;  %2052 = vrot.lane.b32.xlu0 %v5079_v8, %s6638_s29  ;;  %s6648_s29 = smov 8  }
 0x3ef   : >> { %1868 = vrot.lane.b32.xlu1 %v5087_v32, %s6640_s25  ;;  %2101 = vrot.lane.b32.xlu0 %v5079_v8, %s6664_s18 }
 0x3f3   : >> { %1864 = vrot.lane.b32.xlu1 %v5093_v6, %s6640_s25  ;;  %2150 = vrot.lane.b32.xlu0 %v5079_v8, %s6642_s20  ;;  %s6646_s25 = smov 7   ;;  %s6650_s20 = smov 1  }
 0x3f7   : >> { %1909 = vrot.lane.b32.xlu1 %v5081_v59, %s6662_s30  ;;  %2199 = vrot.lane.b32.xlu0 %v5079_v8, %s6644_s27  ;;  %s6652_s27 = smov 127  }
 0x3fb   : >> { %1917 = vrot.lane.b32.xlu1 %v5087_v32, %s6662_s30  ;;  %2248 = vrot.lane.b32.xlu0 %v5079_v8, %s6648_s29  ;;  %s6654_s29 = smov 121  }
 0x3ff   : >> { %1913 = vrot.lane.b32.xlu1 %v5093_v6, %s6662_s30  ;;  %2297 = vrot.lane.b32.xlu0 %v5079_v8, %s6646_s25  ;;  %s7031_s25 = smov 63   ;;  %s7036_s30 = smov 71  }
 0x403   : >> { %1958 = vrot.lane.b32.xlu1 %v5081_v59, %s6660_s26  ;;  %2346 = vrot.lane.b32.xlu0 %v5079_v8, %s6650_s20  ;;  %s6656_s20 = smov 120  }
 0x407   : >> { %1966 = vrot.lane.b32.xlu1 %v5087_v32, %s6660_s26  ;;  %2395 = vrot.lane.b32.xlu0 %v5079_v8, %s6652_s27 }
 0x40b   : >> { %1962 = vrot.lane.b32.xlu1 %v5093_v6, %s6660_s26  ;;  %2403 = vrot.lane.b32.xlu0 %v5093_v6, %s6652_s27  ;;  %s7032_s27 = smov 57   ;;  %s7035_s26 = smov 55  }
 0x40f   : >> { %2007 = vrot.lane.b32.xlu1 %v5081_v59, %s7031_s25  ;;  %2444 = vrot.lane.b32.xlu0 %v5079_v8, %s6654_s29 }
 0x413   : >> { %2015 = vrot.lane.b32.xlu1 %v5087_v32, %s7031_s25  ;;  %2452 = vrot.lane.b32.xlu0 %v5093_v6, %s6654_s29  ;;  %s6658_s29 = smov 119  }
 0x417   : >> { %2011 = vrot.lane.b32.xlu1 %v5093_v6, %s7031_s25  ;;  %2493 = vrot.lane.b32.xlu0 %v5079_v8, %s6656_s20 }
 0x41b   : >> { %2056 = vrot.lane.b32.xlu1 %v5081_v59, %s7032_s27  ;;  %2501 = vrot.lane.b32.xlu0 %v5093_v6, %s6656_s20  ;;  %s7033_s20 = smov 73  }
 0x41f   : >> { %2064 = vrot.lane.b32.xlu1 %v5087_v32, %s7032_s27  ;;  %2542 = vrot.lane.b32.xlu0 %v5079_v8, %s6658_s29 }
 0x423   : >> { %2060 = vrot.lane.b32.xlu1 %v5093_v6, %s7032_s27  ;;  %2550 = vrot.lane.b32.xlu0 %v5093_v6, %s6658_s29  ;;  %s7034_s29 = smov 72  }
 0x427   : >> { %2105 = vrot.lane.b32.xlu1 %v5081_v59, %s6664_s18  ;;  %1768 = vrot.lane.b32.xlu0 %v5181_v29, %s7033_s20 }
 0x42b   : >> { %2113 = vrot.lane.b32.xlu1 %v5087_v32, %s6664_s18  ;;  %1809 = vrot.lane.b32.xlu0 %v5188_v26, %s7034_s29 }
 0x42f   : >> { %2109 = vrot.lane.b32.xlu1 %v5093_v6, %s6664_s18  ;;  %1821 = vrot.lane.b32.xlu0 %v5194_v48, %s7034_s29  ;;  %s7037_s18 = smov 9  }
 0x433   : >> { %2154 = vrot.lane.b32.xlu1 %v5081_v59, %s7035_s26  ;;  %1817 = vrot.lane.b32.xlu0 %v5181_v29, %s7034_s29 }
 0x437   : >> { %2162 = vrot.lane.b32.xlu1 %v5087_v32, %s7035_s26  ;;  %1858 = vrot.lane.b32.xlu0 %v5188_v26, %s7036_s30 }
 0x43b   : >> { %2158 = vrot.lane.b32.xlu1 %v5093_v6, %s7035_s26  ;;  %1870 = vrot.lane.b32.xlu0 %v5194_v48, %s7036_s30 }
 0x43f   : >> { %2203 = vrot.lane.b32.xlu1 %v5081_v59, %s7037_s18  ;;  %1866 = vrot.lane.b32.xlu0 %v5181_v29, %s7036_s30 }
 0x443   : >> { %2211 = vrot.lane.b32.xlu1 %v5087_v32, %s7037_s18  ;;  %1907 = vrot.lane.b32.xlu0 %v5188_v26, %s7038_s0 }
 0x445   : >> { %v5220_v35 = vpop.permute.xlu1 %1762  ;;  %v5222_v18 = vpop.permute.xlu0 %1758 }
 0x446   : >> { %v5407_v34 = vsel %vm1774_vm15, %v5222_v18, %v5220_v35 }
 0x447   : >> { %2207 = vrot.lane.b32.xlu1 %v5093_v6, %s7037_s18  ;;  %1919 = vrot.lane.b32.xlu0 %v5194_v48, %s7038_s0  ;;  %7052 = vst [vmem:[#allocation31_spill] sm:$0xff] %v5407_v34 }
 0x449   : >> { %v5228_v22 = vpop.permute.xlu1 %1770  ;;  %v5230_v12 = vpop.permute.xlu0 %1807 }
 0x44a   : >> { %v5413_v19 = vsel %vm1774_vm15, %v5228_v22, %v5222_v18  ;;  %v1751_v18 = vmul.f32 %v5075_v27, %v5081_v59 }
 0x44b   : >> { %2252 = vrot.lane.b32.xlu1 %v5081_v59, %s7039_s1  ;;  %1915 = vrot.lane.b32.xlu0 %v5181_v29, %s7038_s0  ;;  %7053 = vst [vmem:[#allocation32_spill] sm:$0xff] %v5413_v19 }
 0x44d   : >> { %v5236_v17 = vpop.permute.xlu1 %1766  ;;  %v5238_v60 = vpop.permute.xlu0 %1856 }
 0x44e   : >> { %v5419_v38 = vsel %vm1774_vm15, %v5220_v35, %v5236_v17 }
 0x44f   : >> { %2260 = vrot.lane.b32.xlu1 %v5087_v32, %s7039_s1  ;;  %1956 = vrot.lane.b32.xlu0 %v5188_v26, %s7040_s2  ;;  %7054 = vst [vmem:[#allocation33_spill] sm:$0xff] %v5419_v38 }
 0x451   : >> { %v5244_v37 = vpop.permute.xlu1 %1811  ;;  %v5246_v36 = vpop.permute.xlu0 %1905 }
 0x452   : >> { %v5437_v35 = vsel %vm1823_vm8, %v5230_v12, %v5244_v37 }
 0x453   : >> { %2256 = vrot.lane.b32.xlu1 %v5093_v6, %s7039_s1  ;;  %1968 = vrot.lane.b32.xlu0 %v5194_v48, %s7040_s2  ;;  %7057 = vst [vmem:[#allocation36_spill] sm:$0xff] %v5437_v35 }
 0x455   : >> { %v5252_v39 = vpop.permute.xlu1 %1819  ;;  %v5254_v41 = vpop.permute.xlu0 %1954 }
 0x457   : >> { %2301 = vrot.lane.b32.xlu1 %v5081_v59, %s7041_s3  ;;  %1964 = vrot.lane.b32.xlu0 %v5181_v29, %s7040_s2 }
 0x459   : >> { %v5260_v14 = vpop.permute.xlu1 %1815  ;;  %v5262_v30 = vpop.permute.xlu0 %2003 }
 0x45b   : >> { %2309 = vrot.lane.b32.xlu1 %v5087_v32, %s7041_s3  ;;  %2005 = vrot.lane.b32.xlu0 %v5188_v26, %s7031_s25 }
 0x45d   : >> { %v5268_v5 = vpop.permute.xlu1 %1860  ;;  %v5270_v50 = vpop.permute.xlu0 %2052 }
 0x45f   : >> { %2305 = vrot.lane.b32.xlu1 %v5093_v6, %s7041_s3  ;;  %2017 = vrot.lane.b32.xlu0 %v5194_v48, %s7031_s25 }
 0x461   : >> { %v5276_v63 = vpop.permute.xlu1 %1868  ;;  %v5278_v52 = vpop.permute.xlu0 %2101 }
 0x463   : >> { %2350 = vrot.lane.b32.xlu1 %v5081_v59, %s7042_s4  ;;  %2013 = vrot.lane.b32.xlu0 %v5181_v29, %s7031_s25 }
 0x465   : >> { %v5284_v43 = vpop.permute.xlu1 %1864  ;;  %v5286_v23 = vpop.permute.xlu0 %2150 }
 0x467   : >> { %2358 = vrot.lane.b32.xlu1 %v5087_v32, %s7042_s4  ;;  %2054 = vrot.lane.b32.xlu0 %v5188_v26, %s7032_s27 }
 0x469   : >> { %v5292_v54 = vpop.permute.xlu1 %1909  ;;  %v5294_v9 = vpop.permute.xlu0 %2199 }
 0x46b   : >> { %2354 = vrot.lane.b32.xlu1 %v5093_v6, %s7042_s4  ;;  %2066 = vrot.lane.b32.xlu0 %v5194_v48, %s7032_s27 }
 0x46d   : >> { %v5300_v55 = vpop.permute.xlu1 %1917  ;;  %v5302_v4 = vpop.permute.xlu0 %2248 }
 0x46f   : >> { %2399 = vrot.lane.b32.xlu1 %v5081_v59, %s7043_s5  ;;  %2062 = vrot.lane.b32.xlu0 %v5181_v29, %s7032_s27 }
 0x471   : >> { %v5308_v10 = vpop.permute.xlu1 %1913  ;;  %v5310_v2 = vpop.permute.xlu0 %2297 }
 0x473   : >> { %2407 = vrot.lane.b32.xlu1 %v5087_v32, %s7043_s5  ;;  %2103 = vrot.lane.b32.xlu0 %v5188_v26, %s7044_s6 }
 0x475   : >> { %v5316_v20 = vpop.permute.xlu1 %1958  ;;  %v5318_v49 = vpop.permute.xlu0 %2346 }
 0x477   : >> { %2448 = vrot.lane.b32.xlu1 %v5081_v59, %s7045_s7  ;;  %2115 = vrot.lane.b32.xlu0 %v5194_v48, %s7044_s6 }
 0x479   : >> { %v5324_v24 = vpop.permute.xlu1 %1966  ;;  %v5326_v44 = vpop.permute.xlu0 %2395 }
 0x47b   : >> { %2456 = vrot.lane.b32.xlu1 %v5087_v32, %s7045_s7  ;;  %2111 = vrot.lane.b32.xlu0 %v5181_v29, %s7044_s6 }
 0x47d   : >> { %v5332_v11 = vpop.permute.xlu1 %1962  ;;  %v5334_v51 = vpop.permute.xlu0 %2403 }
 0x47f   : >> { %2497 = vrot.lane.b32.xlu1 %v5081_v59, %s7046_s8  ;;  %2152 = vrot.lane.b32.xlu0 %v5188_v26, %s7035_s26 }
 0x481   : >> { %v5340_v0 = vpop.permute.xlu1 %2007  ;;  %v5342_v25 = vpop.permute.xlu0 %2444 }
 0x483   : >> { %2505 = vrot.lane.b32.xlu1 %v5087_v32, %s7046_s8  ;;  %2164 = vrot.lane.b32.xlu0 %v5194_v48, %s7035_s26 }
 0x485   : >> { %v5350_v40 = vpop.permute.xlu1 %2015  ;;  %v5352_v31 = vpop.permute.xlu0 %2452 }
 0x487   : >> { %2546 = vrot.lane.b32.xlu1 %v5081_v59, %s7047_s9  ;;  %2160 = vrot.lane.b32.xlu0 %v5181_v29, %s7035_s26  ;;  %v5448_v59 = vsel %vm1823_vm8, %v5252_v39, %v5230_v12  ;;  %v1753_v12 = vmul.f32 %v5075_v27, %v5087_v32 }
 0x488   : >> { %7058 = vst [vmem:[#allocation37_spill] sm:$0xff] %v5448_v59 }
 0x489   : >> { %v5359_v42 = vpop.permute.xlu1 %2011  ;;  %v5361_v46 = vpop.permute.xlu0 %2493 }
 0x48b   : >> { %1760 = vrot.lane.b32.xlu1 %v5188_v26, %s7033_s20  ;;  %2201 = vrot.lane.b32.xlu0 %v5188_v26, %s7037_s18 }
 0x48d   : >> { %v5369_v21 = vpop.permute.xlu1 %2056  ;;  %v5371_v56 = vpop.permute.xlu0 %2501 }
 0x48f   : >> { %1764 = vrot.lane.b32.xlu1 %v5367_v45, %s7033_s20  ;;  %2213 = vrot.lane.b32.xlu0 %v5194_v48, %s7037_s18 }
 0x491   : >> { %v5377_v13 = vpop.permute.xlu1 %2064  ;;  %v5379_v57 = vpop.permute.xlu0 %2542 }
 0x492   : >> { %7048 = vst [vmem:[#allocation28_spill] sm:$0xff] %v5379_v57  ;;  %v1791_v57 = vmul.f32 %v1783_v33, %v5413_v19 }
 0x493   : >> { %1772 = vrot.lane.b32.xlu1 %v5194_v48, %s7033_s20  ;;  %2209 = vrot.lane.b32.xlu0 %v5181_v29, %s7037_s18 }
 0x495   : >> { %v5385_v1 = vpop.permute.xlu1 %2060  ;;  %v5387_v7 = vpop.permute.xlu0 %2550 }
 0x496   : >> { %7049 = vst [vmem:[#allocation29_spill] sm:$0xff] %v5387_v7  ;;  %v1750_v7 = vmul.f32 %v5075_v27, %v5079_v8  ;;  %v5469_v8 = vsel %vm1823_vm8, %v5244_v37, %v5260_v14 }
 0x497   : >> { %1813 = vrot.lane.b32.xlu1 %v5367_v45, %s7034_s29  ;;  %2250 = vrot.lane.b32.xlu0 %v5188_v26, %s7039_s1  ;;  %7060 = vst [vmem:[#allocation39_spill] sm:$0xff] %v5469_v8 }
 0x499   : >> { %v5393_v15 = vpop.permute.xlu1 %2105  ;;  %v5395_v3 = vpop.permute.xlu0 %1768 }
 0x49a   : >> { %7050 = vst [vmem:[#allocation30_spill] sm:$0xff] %v5395_v3  ;;  %v5429_v3 = vsel %vm1774_vm15, %v5236_v17, %v5228_v22  ;;  %v1793_v22 = vmul.f32 %v1785_v58, %v5419_v38  ;;  %v1832_v17 = vld [vmem:[#allocation2 + $0x108] sm:$0xff]  ;;  %v1834_v38 = vld [vmem:[#allocation2 + $0x4d0] sm:$0xff] }
 0x49b   : >> { %1862 = vrot.lane.b32.xlu1 %v5367_v45, %s7036_s30  ;;  %2262 = vrot.lane.b32.xlu0 %v5194_v48, %s7039_s1  ;;  %7056 = vst [vmem:[#allocation35_spill] sm:$0xff] %v5429_v3  ;;  %v1794_v33 = vmul.f32 %v1786_v53, %v5429_v3  ;;  %v1840_v53 = vmul.f32 %v1832_v17, %v5448_v59  ;;  %v1881_v59 = vld [vmem:[#allocation2 + $0x5c0] sm:$0xff] }
 0x49c   : >> { %v5477_v3 = vsel %vm1823_vm8, %v5260_v14, %v5252_v39  ;;  %v5487_v17 = vsel %vm1872_vm1, %v5238_v60, %v5268_v5  ;;  %v1842_v14 = vmul.f32 %v1834_v38, %v5469_v8 }
 0x49d   : >> { %v5421_v61 = vpop.permute.xlu1 %2113  ;;  %v5423_v62 = vpop.permute.xlu0 %1809  ;;  %7061 = vst [vmem:[#allocation40_spill] sm:$0xff] %v5477_v3  ;;  %7062 = vst [vmem:[#allocation41_spill] sm:$0xff] %v5487_v17  ;;  %v1802_v39 = vadd.f32 %v1794_v33, %v1753_v12  ;;  %v1884_v33 = vld [vmem:[#allocation2 + $0x400] sm:$0xff]  ;;  %v1931_v12 = vld [vmem:[#allocation2 + $0x250] sm:$0xff] }
 0x49e   : >> { %7055 = vst [vmem:[#allocation34_spill] sm:$0xff] %v5423_v62  ;;  %v1792_v62 = vmul.f32 %v1784_v28, %v5407_v34  ;;  %v1752_v28 = vmul.f32 %v5075_v27, %v5093_v6  ;;  %v1841_v34 = vmul.f32 %v1833_v16, %v5437_v35  ;;  %v1835_v6 = vld [vmem:[#allocation2 + $0x318] sm:$0xff]  ;;  %v1799_v27 = vadd.f32 %v1791_v57, %v1750_v7  ;;  %v1882_v35 = vld [vmem:[#allocation2 + $0x5d0] sm:$0xff]  ;;  %v1883_v57 = vld [vmem:[#allocation2 + $0x580] sm:$0xff] }
 0x49f   : >> { %1911 = vrot.lane.b32.xlu1 %v5367_v45, %s7038_s0  ;;  %2258 = vrot.lane.b32.xlu0 %v5181_v29, %s7039_s1  ;;  %v5502_v7 = vsel %vm1872_vm1, %v5268_v5, %v5284_v43  ;;  %v5520_v5 = vsel %vm1921_vm14, %v5246_v36, %v5292_v54  ;;  %s7259_s0 = sshll.u32 %s3557_s28, 4  ;;  %s1470_s28 = sadd.s32 1, %s3557_s28  }
 0x4a0   : >> { %v1800_v16 = vadd.f32 %v1792_v62, %v1751_v18  ;;  %v1801_v37 = vadd.f32 %v1793_v22, %v1752_v28  ;;  %v5496_v62 = vsel %vm1872_vm1, %v5276_v63, %v5238_v60  ;;  %7064 = vst [vmem:[#allocation43_spill] sm:$0xff] %v5502_v7  ;;  %v1843_v28 = vmul.f32 %v1835_v6, %v5477_v3  ;;  %v1979_v3 = vld [vmem:[#allocation2 + $0x10] sm:$0xff]  ;;  %p1467_p11 = scmp.ge.s32.totalorder %s1470_s28, 2  }
 0x4a1   : >> { %v5458_v58 = vpop.permute.xlu1 %2109  ;;  %v5460_v19 = vpop.permute.xlu0 %1821  ;;  %7063 = vst [vmem:[#allocation42_spill] sm:$0xff] %v5496_v62  ;;  %v5514_v60 = vsel %vm1872_vm1, %v5284_v43, %v5276_v63  ;;  %7067 = vst [vmem:[#allocation46_spill] sm:$0xff] %v5520_v5  ;;  %v5527_v6 = vsel %vm1921_vm14, %v5300_v55, %v5246_v36  ;;  %v5533_v63 = vsel %vm1921_vm14, %v5292_v54, %v5308_v10 }
 0x4a2   : >> { %7059 = vst [vmem:[#allocation38_spill] sm:$0xff] %v5460_v19  ;;  %v1849_v38 = vadd.f32 %v1841_v34, %v1800_v16  ;;  %7066 = vst [vmem:[#allocation45_spill] sm:$0xff] %v5514_v60  ;;  %v1848_v19 = vadd.f32 %v1840_v53, %v1799_v27  ;;  %v1930_v34 = vld [vmem:[#allocation2 + $0x190] sm:$0xff]  ;;  %v1889_v43 = vmul.f32 %v1881_v59, %v5496_v62  ;;  %v1980_v27 = vld [vmem:[#allocation2 + $0x408] sm:$0xff] }
 0x4a3   : >> { %1960 = vrot.lane.b32.xlu1 %v5367_v45, %s7040_s2  ;;  %2299 = vrot.lane.b32.xlu0 %v5188_v26, %s7041_s3  ;;  %7068 = vst [vmem:[#allocation47_spill] sm:$0xff] %v5527_v6  ;;  %v1932_v16 = vld [vmem:[#allocation2 + $0xd0] sm:$0xff]  ;;  %v5544_v36 = vsel %vm1921_vm14, %v5308_v10, %v5300_v55  ;;  %v5550_v54 = vsel %vm1970_vm6, %v5254_v41, %v5316_v20 }
 0x4a4   : >> { %v1933_v53 = vld [vmem:[#allocation2 + $0x3d0] sm:$0xff]  ;;  %7069 = vst [vmem:[#allocation48_spill] sm:$0xff] %v5544_v36  ;;  %7070 = vst [vmem:[#allocation49_spill] sm:$0xff] %v5550_v54  ;;  %v1850_v59 = vadd.f32 %v1842_v14, %v1801_v37  ;;  %v1939_v62 = vmul.f32 %v1931_v12, %v5520_v5  ;;  %v5560_v55 = vsel %vm1970_vm6, %v5324_v24, %v5254_v41  ;;  %v1982_v5 = vld [vmem:[#allocation2 + $0x98] sm:$0xff] }
 0x4a5   : >> { %v5505_v18 = vpop.permute.xlu1 %2154  ;;  %v5507_v22 = vpop.permute.xlu0 %1817  ;;  %7071 = vst [vmem:[#allocation50_spill] sm:$0xff] %v5560_v55  ;;  %v1938_v8 = vmul.f32 %v1930_v34, %v5527_v6  ;;  %v1940_v37 = vmul.f32 %v1932_v16, %v5533_v63  ;;  %v1981_v14 = vld [vmem:[#allocation2 + $0x6b0] sm:$0xff]  ;;  %v1941_v12 = vmul.f32 %v1933_v53, %v5544_v36  ;;  %v1987_v34 = vmul.f32 %v1979_v3, %v5560_v55  ;;  %v2029_v16 = vld [vmem:[#allocation2 + $0x638] sm:$0xff]  ;;  %v2030_v53 = vld [vmem:[#allocation2 + $0x208] sm:$0xff] }
 0x4a6   : >> { %7065 = vst [vmem:[#allocation44_spill] sm:$0xff] %v5507_v22  ;;  %v1890_v22 = vmul.f32 %v1882_v35, %v5487_v17  ;;  %v1891_v35 = vmul.f32 %v1883_v57, %v5502_v7  ;;  %v1892_v57 = vmul.f32 %v1884_v33, %v5514_v60  ;;  %v1851_v7 = vadd.f32 %v1843_v28, %v1802_v39  ;;  %v2178_v55 = vld [vmem:[#allocation2 + $0x660] sm:$0xff] }
 0x4a7   : >> { %2009 = vrot.lane.b32.xlu1 %v5367_v45, %s7031_s25  ;;  %2311 = vrot.lane.b32.xlu0 %v5194_v48, %s7041_s3  ;;  %v5572_v33 = vsel %vm1970_vm6, %v5316_v20, %v5332_v11  ;;  %v1988_v60 = vmul.f32 %v1980_v27, %v5550_v54  ;;  %v5581_v39 = vsel %vm1970_vm6, %v5332_v11, %v5324_v24  ;;  %v1934_v54 = vld [vmem:[#allocation2 + $0x568] sm:$0xff] }
 0x4a8   : >> { %v1898_v41 = vadd.f32 %v1890_v22, %v1849_v38  ;;  %7072 = vst [vmem:[#allocation51_spill] sm:$0xff] %v5581_v39  ;;  %v1897_v28 = vadd.f32 %v1889_v43, %v1848_v19  ;;  %v1899_v20 = vadd.f32 %v1891_v35, %v1850_v59  ;;  %v5590_v22 = vsel %vm2019_vm3, %v5262_v30, %v5340_v0 }
 0x4a9   : >> { %v5562_v10 = vpop.permute.xlu1 %2162  ;;  %v5564_v17 = vpop.permute.xlu0 %1858  ;;  %7073 = vst [vmem:[#allocation52_spill] sm:$0xff] %v5590_v22  ;;  %v1900_v38 = vadd.f32 %v1892_v57, %v1851_v7  ;;  %v1989_v11 = vmul.f32 %v1981_v14, %v5572_v33  ;;  %v5599_v3 = vsel %vm2019_vm3, %v5340_v0, %v5359_v42  ;;  %v1990_v59 = vmul.f32 %v1982_v5, %v5581_v39  ;;  %v2031_v7 = vld [vmem:[#allocation2 + $0x300] sm:$0xff] }
 0x4aa   : >> { %v1947_v24 = vadd.f32 %v1939_v62, %v1898_v41  ;;  %v1946_v35 = vadd.f32 %v1938_v8, %v1897_v28  ;;  %v1948_v27 = vadd.f32 %v1940_v37, %v1899_v20  ;;  %v5609_v62 = vsel %vm2019_vm3, %v5359_v42, %v5350_v40  ;;  %v2079_v41 = vld [vmem:[#allocation2 + $0x438] sm:$0xff]  ;;  %v2078_v28 = vld [vmem:[#allocation2 + $0x2c0] sm:$0xff] }
 0x4ab   : >> { %2058 = vrot.lane.b32.xlu1 %v5367_v45, %s7032_s27  ;;  %2307 = vrot.lane.b32.xlu0 %v5181_v29, %s7041_s3  ;;  %7074 = vst [vmem:[#allocation53_spill] sm:$0xff] %v5609_v62  ;;  %v1949_v57 = vadd.f32 %v1941_v12, %v1900_v38  ;;  %v2037_v0 = vmul.f32 %v2029_v16, %v5590_v22  ;;  %v2128_v38 = vld [vmem:[#allocation2 + $0x600] sm:$0xff] }
 0x4ac   : >> { %v1996_v14 = vadd.f32 %v1988_v60, %v1947_v24  ;;  %v5616_v8 = vsel %vm2068_vm4, %v5369_v21, %v5385_v1  ;;  %v1995_v5 = vadd.f32 %v1987_v34, %v1946_v35  ;;  %v2038_v37 = vmul.f32 %v2030_v53, %v5599_v3  ;;  %v2080_v60 = vld [vmem:[#allocation2 + $0x430] sm:$0xff]  ;;  %v2028_v34 = vld [vmem:[#allocation2 + $0x100] sm:$0xff] }
 0x4ad   : >> { %v2159_v19 = vpop.permute.xlu1 %2158  ;;  %v5601_v43 = vpop.permute.xlu0 %1870  ;;  %v5625_v42 = vsel %vm2068_vm4, %v5270_v50, %v5369_v21  ;;  %v5631_v12 = vsel %vm2068_vm4, %v5385_v1, %v5377_v13  ;;  %v1997_v20 = vadd.f32 %v1989_v11, %v1948_v27  ;;  %v5639_v16 = vsel %vm2019_vm3, %v5350_v40, %v5262_v30  ;;  %v2127_v27 = vld [vmem:[#allocation2 + $0x48] sm:$0xff]  ;;  %v2129_v40 = vld [vmem:[#allocation2 + $0x678] sm:$0xff] }
 0x4ae   : >> { %7075 = vst [vmem:[#allocation54_spill] sm:$0xff] %v5625_v42  ;;  %7076 = vst [vmem:[#allocation55_spill] sm:$0xff] %v5631_v12  ;;  %v2039_v21 = vmul.f32 %v2031_v7, %v5609_v62  ;;  %v5646_v1 = vsel %vm2117_vm2, %v5393_v15, %v5458_v58  ;;  %v1998_v11 = vadd.f32 %v1990_v59, %v1949_v57  ;;  %v2177_v57 = vld [vmem:[#allocation2 + $0x3e8] sm:$0xff] }
 0x4af   : >> { %2107 = vrot.lane.b32.xlu1 %v5367_v45, %s7044_s6  ;;  %2348 = vrot.lane.b32.xlu0 %v5188_v26, %s7042_s4  ;;  %7077 = vst [vmem:[#allocation56_spill] sm:$0xff] %v5639_v16  ;;  %v2087_v35 = vmul.f32 %v2079_v41, %v5616_v8  ;;  %v5655_v30 = vsel %vm2117_vm2, %v5278_v52, %v5393_v15 }
 0x4b0   : >> { %7078 = vst [vmem:[#allocation57_spill] sm:$0xff] %v5655_v30  ;;  %v5661_v7 = vsel %vm2117_vm2, %v5458_v58, %v5421_v61  ;;  %v2045_v62 = vadd.f32 %v2037_v0, %v1996_v14  ;;  %v2086_v22 = vmul.f32 %v2078_v28, %v5625_v42  ;;  %v2088_v59 = vmul.f32 %v2080_v60, %v5631_v12  ;;  %v2077_v28 = vld [vmem:[#allocation2 + $0x4d8] sm:$0xff]  ;;  %v2126_v12 = vld [vmem:[#allocation2 + $0x668] sm:$0xff]  ;;  %v1885_v42 = vld [vmem:[#allocation2 + $0x6a0] sm:$0xff] }
 0x4b1   : >> { %v2204_v24 = vpop.permute.xlu1 %2203  ;;  %v5648_v53 = vpop.permute.xlu0 %1866  ;;  %7079 = vst [vmem:[#allocation58_spill] sm:$0xff] %v5661_v7  ;;  %v5668_v41 = vsel %vm2166_vm11, %v5505_v18, %v2159_v19  ;;  %v2036_v15 = vmul.f32 %v2028_v34, %v5639_v16  ;;  %v2046_v39 = vadd.f32 %v2038_v37, %v1997_v20  ;;  %v2136_v58 = vmul.f32 %v2128_v38, %v5646_v1  ;;  %v1888_v16 = vld [vmem:[#allocation2 + $0x3f8] sm:$0xff] }
 0x4b2   : >> { %v5677_v14 = vsel %vm2166_vm11, %v2159_v19, %v5562_v10  ;;  %v2047_v0 = vadd.f32 %v2039_v21, %v1998_v11  ;;  %v5685_v60 = vsel %vm2068_vm4, %v5377_v13, %v5270_v50  ;;  %v2135_v37 = vmul.f32 %v2127_v27, %v5655_v30  ;;  %v2176_v11 = vld [vmem:[#allocation2 + $0x320] sm:$0xff]  ;;  %v2712_v30 = vld [vmem:[#allocation2 + $0x2e8] sm:$0xff] }
 0x4b3   : >> { %2156 = vrot.lane.b32.xlu1 %v5367_v45, %s7035_s26  ;;  %7080 = vst [vmem:[#allocation59_spill] sm:$0xff] %v5677_v14  ;;  %2360 = vrot.lane.b32.xlu0 %v5194_v48, %s7042_s4  ;;  %7081 = vst [vmem:[#allocation60_spill] sm:$0xff] %v5685_v60  ;;  %v2137_v20 = vmul.f32 %v2129_v40, %v5661_v7  ;;  %v2095_v19 = vadd.f32 %v2087_v35, %v2046_v39  ;;  %v2225_v7 = vld [vmem:[#allocation2 + $0x5f0] sm:$0xff] }
 0x4b4   : >> { %v5695_v21 = vsel %vm2117_vm2, %v5421_v61, %v5278_v52  ;;  %v5701_v50 = vsel %vm2166_vm11, %v5286_v23, %v5505_v18  ;;  %v2185_v13 = vmul.f32 %v2177_v57, %v5668_v41  ;;  %v2094_v27 = vadd.f32 %v2086_v22, %v2045_v62  ;;  %v2226_v22 = vld [vmem:[#allocation2 + $0x70] sm:$0xff] }
 0x4b5   : >> { %v2212_v34 = vpop.permute.xlu1 %2211  ;;  %v5689_v38 = vpop.permute.xlu0 %1907  ;;  %7082 = vst [vmem:[#allocation61_spill] sm:$0xff] %v5695_v21  ;;  %7083 = vst [vmem:[#allocation62_spill] sm:$0xff] %v5701_v50  ;;  %v2096_v40 = vadd.f32 %v2088_v59, %v2047_v0  ;;  %v2186_v39 = vmul.f32 %v2178_v55, %v5677_v14  ;;  %v2044_v61 = vadd.f32 %v2036_v15, %v1995_v5  ;;  %v2227_v62 = vld [vmem:[#allocation2 + $0x310] sm:$0xff] }
 0x4b6   : >> { %v2085_v52 = vmul.f32 %v2077_v28, %v5685_v60  ;;  %v2144_v35 = vadd.f32 %v2136_v58, %v2095_v19  ;;  %v2220_v18 = vsel %vm2215_vm12, %v5294_v9, %v2204_v24  ;;  %v2143_v55 = vadd.f32 %v2135_v37, %v2094_v27  ;;  %v2175_v58 = vld [vmem:[#allocation2 + $0xa0] sm:$0xff] }
 0x4b7   : >> { %2205 = vrot.lane.b32.xlu1 %v5367_v45, %s7037_s18  ;;  %2356 = vrot.lane.b32.xlu0 %v5181_v29, %s7042_s4  ;;  %v2134_v59 = vmul.f32 %v2126_v12, %v5695_v21  ;;  %v2145_v57 = vadd.f32 %v2137_v20, %v2096_v40  ;;  %v2184_v0 = vmul.f32 %v2176_v11, %v5701_v50  ;;  %v2224_v50 = vld [vmem:[#allocation2 + $0x1e8] sm:$0xff]  ;;  %v7107_v60 = vld [vmem:[#allocation30_spill] sm:$0xff] }
 0x4b8   : >> { %v5722_v28 = vsel %vm2166_vm11, %v5562_v10, %v5286_v23  ;;  %v2193_v19 = vadd.f32 %v2185_v13, %v2144_v35  ;;  %v2233_v20 = vmul.f32 %v2225_v7, %v2220_v18  ;;  %v2093_v40 = vadd.f32 %v2085_v52, %v2044_v61  ;;  %v2274_v10 = vld [vmem:[#allocation2 + $0x3e0] sm:$0xff] }
 0x4b9   : >> { %v2208_v5 = vpop.permute.xlu1 %2207  ;;  %v5716_v15 = vpop.permute.xlu0 %1919  ;;  %7084 = vst [vmem:[#allocation63_spill] sm:$0xff] %v5722_v28  ;;  %v2194_v37 = vadd.f32 %v2186_v39, %v2145_v57  ;;  %v2222_v23 = vsel %vm2215_vm12, %v2212_v34, %v5294_v9  ;;  %v2192_v13 = vadd.f32 %v2184_v0, %v2143_v55 }
 0x4ba   : >> { %v2216_v14 = vsel %vm2215_vm12, %v2208_v5, %v2212_v34  ;;  %v2218_v12 = vsel %vm2215_vm12, %v2204_v24, %v2208_v5  ;;  %v2183_v24 = vmul.f32 %v2175_v58, %v5722_v28  ;;  %v2142_v52 = vadd.f32 %v2134_v59, %v2093_v40  ;;  %v2273_v34 = vld [vmem:[#allocation2 + $0x388] sm:$0xff] }
 0x4bb   : >> { %v2234_v11 = vmul.f32 %v2226_v22, %v2218_v12  ;;  %v2235_v27 = vmul.f32 %v2227_v62, %v2216_v14  ;;  %2254 = vrot.lane.b32.xlu1 %v5367_v45, %s7039_s1  ;;  %2397 = vrot.lane.b32.xlu0 %v5188_v26, %s7043_s5  ;;  %v2241_v18 = vadd.f32 %v2233_v20, %v2192_v13  ;;  %v2688_v28 = vld [vmem:[#allocation2 + $0x548] sm:$0xff]  ;;  %s7260_s1 = scalar_lea.vmem [#allocation3], %s4246_s11 }
 0x4bc   : >> { %v2232_v22 = vmul.f32 %v2224_v50, %v2222_v23  ;;  %v2191_v62 = vadd.f32 %v2183_v24, %v2142_v52  ;;  %v2275_v50 = vld [vmem:[#allocation2 + $0x630] sm:$0xff]  ;;  %v2323_v23 = vld [vmem:[#allocation2 + $0x2e0] sm:$0xff]  ;;  %s3107_s2 = scalar_lea.vmem %s7260_s1, %s7259_s0 [#allocation3] }
 0x4bd   : >> { %v2242_v39 = vadd.f32 %v2234_v11, %v2193_v19  ;;  %v2243_v7 = vadd.f32 %v2235_v27, %v2194_v37  ;;  %v2253_v35 = vpop.permute.xlu1 %2252  ;;  %v5736_v14 = vpop.permute.xlu0 %1915  ;;  %v2276_v19 = vld [vmem:[#allocation2 + $0x560] sm:$0xff] }
 0x4be   : >> { %v2269_v61 = vsel %vm2264_vm5, %v5302_v4, %v2253_v35  ;;  %v2240_v59 = vadd.f32 %v2232_v22, %v2191_v62  ;;  %v2324_v62 = vld [vmem:[#allocation2 + $0x1b0] sm:$0xff] }
 0x4bf   : >> { %v2282_v9 = vmul.f32 %v2274_v10, %v2269_v61  ;;  %2303 = vrot.lane.b32.xlu1 %v5367_v45, %s7041_s3  ;;  %2405 = vrot.lane.b32.xlu0 %v5181_v29, %s7043_s5  ;;  %s3331_s3 = sshll.u32 (%p1467_p11), %s3685_s17, 9  ;;  %s3606_s17 = smov (%p1467_p11), [#allocation3]  }
 0x4c0   : > { %s6539_s6 = scalar_lea.hbm (%p1467_p11), %s6597_s10, %s3331_s3  ;;  %s3493_s28 = sshll.u32 (%p1467_p11), %s3606_s17, 4  ;;  %s3494_s28 = int_to_ptr.vmem [resolvable:$false] %s3493_s28 }
 0x4c1   : >> { %v2290_v55 = vadd.f32 %v2282_v9, %v2241_v18  ;;  %v2261_v57 = vpop.permute.xlu1 %2260  ;;  %v5748_v5 = vpop.permute.xlu0 %1956  ;;  %v2322_v18 = vld [vmem:[#allocation2 + $0x188] sm:$0xff]  ;;  %s3495_s29 = scalar_lea.vmem (%p1467_p11), %s3494_s28, 1024 }
 0x4c2   : >> { %v2271_v0 = vsel %vm2264_vm5, %v2261_v57, %v5302_v4 }
 0x4c3   : >> { %v2281_v58 = vmul.f32 %v2273_v34, %v2271_v0  ;;  %2352 = vrot.lane.b32.xlu1 %v5367_v45, %s7042_s4  ;;  %2446 = vrot.lane.b32.xlu0 %v5188_v26, %s7045_s7 }
 0x4c5   : >> { %v2289_v12 = vadd.f32 %v2281_v58, %v2240_v59  ;;  %v2257_v37 = vpop.permute.xlu1 %2256  ;;  %v5758_v11 = vpop.permute.xlu0 %1968 }
 0x4c6   : >> { %v2265_v20 = vsel %vm2264_vm5, %v2257_v37, %v2261_v57  ;;  %v2267_v4 = vsel %vm2264_vm5, %v2253_v35, %v2257_v37  ;;  %v2325_v57 = vld [vmem:[#allocation2 + $0x4c8] sm:$0xff] }
 0x4c7   : >> { %v2283_v27 = vmul.f32 %v2275_v50, %v2267_v4  ;;  %v2284_v40 = vmul.f32 %v2276_v19, %v2265_v20  ;;  %2401 = vrot.lane.b32.xlu1 %v5367_v45, %s7043_s5  ;;  %2454 = vrot.lane.b32.xlu0 %v5181_v29, %s7045_s7 }
 0x4c9   : >> { %v2291_v10 = vadd.f32 %v2283_v27, %v2242_v39  ;;  %v2292_v13 = vadd.f32 %v2284_v40, %v2243_v7  ;;  %v2302_v24 = vpop.permute.xlu1 %2301  ;;  %v5768_v61 = vpop.permute.xlu0 %1964 }
 0x4ca   : >> { %v2318_v35 = vsel %vm2313_vm0, %v5310_v2, %v2302_v24 }
 0x4cb   : >> { %v2331_v52 = vmul.f32 %v2323_v23, %v2318_v35  ;;  %2409 = vrot.lane.b32.xlu1 %v5194_v48, %s7043_s5  ;;  %2495 = vrot.lane.b32.xlu0 %v5188_v26, %s7046_s8 }
 0x4cd   : >> { %v2339_v22 = vadd.f32 %v2331_v52, %v2290_v55  ;;  %v2310_v9 = vpop.permute.xlu1 %2309  ;;  %v5777_v7 = vpop.permute.xlu0 %2005 }
 0x4ce   : >> { %v2320_v39 = vsel %vm2313_vm0, %v2310_v9, %v5310_v2 }
 0x4cf   : >> { %v2330_v34 = vmul.f32 %v2322_v18, %v2320_v39  ;;  %2450 = vrot.lane.b32.xlu1 %v5367_v45, %s7045_s7  ;;  %2503 = vrot.lane.b32.xlu0 %v5181_v29, %s7046_s8  ;;  %v2374_v39 = vld [vmem:[#allocation2 + $0x448] sm:$0xff] }
 0x4d1   : >> { %v2338_v0 = vadd.f32 %v2330_v34, %v2289_v12  ;;  %v2306_v59 = vpop.permute.xlu1 %2305  ;;  %v5787_v2 = vpop.permute.xlu0 %2017  ;;  %v2372_v12 = vld [vmem:[#allocation2 + $0x4a0] sm:$0xff] }
 0x4d2   : >> { %v2314_v55 = vsel %vm2313_vm0, %v2306_v59, %v2310_v9  ;;  %v2316_v58 = vsel %vm2313_vm0, %v2302_v24, %v2306_v59  ;;  %v2371_v24 = vld [vmem:[#allocation2 + $0x650] sm:$0xff]  ;;  %v2373_v9 = vld [vmem:[#allocation2 + $0x4e0] sm:$0xff] }
 0x4d3   : >> { %v2332_v50 = vmul.f32 %v2324_v62, %v2316_v58  ;;  %v2333_v19 = vmul.f32 %v2325_v57, %v2314_v55  ;;  %2458 = vrot.lane.b32.xlu1 %v5194_v48, %s7045_s7  ;;  %2544 = vrot.lane.b32.xlu0 %v5188_v26, %s7047_s9  ;;  %s7261_s7 = scalar_lea.vmem (%p1467_p11), [#allocation3], %s4246_s11 }
 0x4d5   : >> { %v2340_v37 = vadd.f32 %v2332_v50, %v2291_v10  ;;  %v2341_v20 = vadd.f32 %v2333_v19, %v2292_v13  ;;  %v2351_v4 = vpop.permute.xlu1 %2350  ;;  %v5797_v40 = vpop.permute.xlu0 %2013 }
 0x4d6   : >> { %v2367_v27 = vsel %vm2362_vm13, %v5318_v49, %v2351_v4 }
 0x4d7   : >> { %v2380_v23 = vmul.f32 %v2372_v12, %v2367_v27  ;;  %2499 = vrot.lane.b32.xlu1 %v5367_v45, %s7046_s8  ;;  %2552 = vrot.lane.b32.xlu0 %v5181_v29, %s7047_s9 }
 0x4d9   : >> { %v2388_v35 = vadd.f32 %v2380_v23, %v2339_v22  ;;  %v2359_v52 = vpop.permute.xlu1 %2358  ;;  %v5806_v13 = vpop.permute.xlu0 %2054 }
 0x4da   : >> { %v2369_v10 = vsel %vm2362_vm13, %v2359_v52, %v5318_v49 }
 0x4db   : >> { %v2379_v18 = vmul.f32 %v2371_v24, %v2369_v10  ;;  %2507 = vrot.lane.b32.xlu1 %v5194_v48, %s7046_s8  ;;  %2554 = vrot.lane.b32.xlu0 %v5087_v32, %s7047_s9  ;;  %v2420_v32 = vld [vmem:[#allocation2 + $0x90] sm:$0xff]  ;;  %s3125_s8 = sshll.u32 (%p1467_p11), %s7261_s7, 4  ;;  %s6543_s8 = int_to_ptr.vmem [resolvable:$true] %s3125_s8 }
 0x4dc   : > { %s3489_s21 = scalar_lea.vmem (%p1467_p11), %s6543_s8, 512  ;;  %p3496_p1 = scmp.lt.s32.totalorder (%p1467_p11), %s6543_s8, %s3494_s28 }
 0x4dd   : >> { %v2387_v34 = vadd.f32 %v2379_v18, %v2338_v0  ;;  %v2355_v62 = vpop.permute.xlu1 %2354  ;;  %v2067_v49 = vpop.permute.xlu0 %2066  ;;  %v2421_v0 = vld [vmem:[#allocation2 + $0x290] sm:$0xff]  ;;  %p3490_p12 = scmp.ne.s32.totalorder (%p1467_p11), %s6543_s8, %s3489_s21  ;;  %p3497_p2 = scmp.lt.s32.totalorder (%p1467_p11), %s3495_s29, %s3489_s21 }
 0x4de   : >> { %v2363_v22 = vsel %vm2362_vm13, %v2355_v62, %v2359_v52  ;;  %v2365_v57 = vsel %vm2362_vm13, %v2351_v4, %v2355_v62  ;;  %v5819_v58 = vsel %vm2068_vm4, %v2067_v49, %v5806_v13 }
 0x4df   : >> { %v2381_v59 = vmul.f32 %v2373_v9, %v2365_v57  ;;  %v2382_v55 = vmul.f32 %v2374_v39, %v2363_v22  ;;  %2548 = vrot.lane.b32.xlu1 %v5367_v45, %s7047_s9  ;;  %p3491_p13 = pnand (%p1467_p11), %p3490_p12, %p3702_p5  ;;  %p3498_p3 = por (%p1467_p11), %p3497_p2, %p3496_p1 }
 0x4e1   : >> { %v2389_v50 = vadd.f32 %v2381_v59, %v2340_v37  ;;  %v2390_v19 = vadd.f32 %v2382_v55, %v2341_v20  ;;  %v2400_v12 = vpop.permute.xlu1 %2399  ;;  %v5830_v23 = vpop.permute.xlu0 %2062  ;;  %v2422_v37 = vld [vmem:[#allocation2 + $0x3d8] sm:$0xff]  ;;  %v2423_v20 = vld [vmem:[#allocation2 + $0x2f0] sm:$0xff]  ;;  %p3492_p0 = pneg (%p1467_p11), %p3491_p13 }
 0x4e2   : >> { %v2414_v4 = vsel %vm2411_vm10, %v2400_v12, %v5334_v51  ;;  %v2416_v27 = vsel %vm2411_vm10, %v5326_v44, %v2400_v12  ;;  %v5835_v10 = vsel %vm2068_vm4, %v5830_v23, %v2067_v49  ;;  %v2469_v55 = vld [vmem:[#allocation2 + $0x670] sm:$0xff] }
 0x4e3   : >> { %v2428_v24 = vmul.f32 %v2420_v32, %v2416_v27  ;;  %v2429_v52 = vmul.f32 %v2421_v0, %v2414_v4  ;;  %2556 = vrot.lane.b32.xlu1 %v5194_v48, %s7047_s9  ;;  %v2470_v32 = vld [vmem:[#allocation2 + $0x38] sm:$0xff]  ;;  %s7262_s9 = sand.u32 (%p1467_p11), 1, %s3545_s14   ;;  %p3499_p4 = pnand (%p1467_p11), %p3498_p3, %p3492_p0 }
 0x4e4   : > { %s6547_s27 = scalar_lea.sflag (%p1467_p11), [#allocation4], %s7262_s9 }
 0x4e5   : >> { %v2436_v18 = vadd.f32 %v2428_v24, %v2387_v34  ;;  %v2437_v9 = vadd.f32 %v2429_v52, %v2388_v35  ;;  %v2408_v39 = vpop.permute.xlu1 %2407  ;;  %v5845_v57 = vpop.permute.xlu0 %2103  ;;  %v2471_v52 = vld [vmem:[#allocation2 + $0x330] sm:$0xff] }
 0x4e6   : >> { %v2412_v62 = vsel %vm2411_vm10, %v5334_v51, %v2408_v39  ;;  %v2418_v22 = vsel %vm2411_vm10, %v2408_v39, %v5326_v44  ;;  %7085 = vst [vmem:[#allocation64_spill] sm:$0xff] %v5845_v57 }
 0x4e7   : >> { %v2430_v49 = vmul.f32 %v2422_v37, %v2412_v62  ;;  %v2431_v59 = vmul.f32 %v2423_v20, %v2418_v22 }
 0x4e9   : >> { %v2438_v0 = vadd.f32 %v2430_v49, %v2389_v50  ;;  %v2439_v34 = vadd.f32 %v2431_v59, %v2390_v19  ;;  %v2449_v35 = vpop.permute.xlu1 %2448  ;;  %v2116_v44 = vpop.permute.xlu0 %2115  ;;  %v2472_v50 = vld [vmem:[#allocation2 + $0x488] sm:$0xff] }
 0x4ea   : >> { %v2463_v12 = vsel %vm6699_vm7, %v2449_v35, %v5352_v31  ;;  %v2465_v51 = vsel %vm6699_vm7, %v5342_v25, %v2449_v35  ;;  %v5857_v24 = vsel %vm2117_vm2, %v2116_v44, %v5845_v57 }
 0x4eb   : >> { %v2477_v4 = vmul.f32 %v2469_v55, %v2465_v51  ;;  %v2478_v27 = vmul.f32 %v2470_v32, %v2463_v12  ;;  %7086 = vst [vmem:[#allocation65_spill] sm:$0xff] %v5857_v24 }
 0x4ed   : >> { %v2485_v19 = vadd.f32 %v2477_v4, %v2436_v18  ;;  %v2486_v37 = vadd.f32 %v2478_v27, %v2437_v9  ;;  %v2457_v20 = vpop.permute.xlu1 %2456  ;;  %v5865_v22 = vpop.permute.xlu0 %2111  ;;  %v2518_v18 = vld [vmem:[#allocation2 + $0x3a0] sm:$0xff]  ;;  %v2519_v9 = vld [vmem:[#allocation2 + $0x4e8] sm:$0xff] }
 0x4ee   : >> { %v2461_v39 = vsel %vm6699_vm7, %v5352_v31, %v2457_v20  ;;  %v2467_v62 = vsel %vm6699_vm7, %v2457_v20, %v5342_v25  ;;  %v5870_v55 = vsel %vm2117_vm2, %v5865_v22, %v2116_v44  ;;  %v2520_v27 = vld [vmem:[#allocation2 + $0x460] sm:$0xff]  ;;  %vm2558_vm7 = vcmp.lt.s32.totalorder %v7051_v47, 119 }
 0x4ef   : >> { %v2479_v49 = vmul.f32 %v2471_v52, %v2461_v39  ;;  %v2480_v59 = vmul.f32 %v2472_v50, %v2467_v62  ;;  %7087 = vst [vmem:[#allocation66_spill] sm:$0xff] %v5870_v55  ;;  %v2521_v52 = vld [vmem:[#allocation2 + $0x168] sm:$0xff] }
 0x4f1   : >> { %v2487_v32 = vadd.f32 %v2479_v49, %v2438_v0  ;;  %v2488_v35 = vadd.f32 %v2480_v59, %v2439_v34  ;;  %v2498_v31 = vpop.permute.xlu1 %2497  ;;  %v5879_v51 = vpop.permute.xlu0 %2152 }
 0x4f2   : >> { %v2512_v25 = vsel %vm2509_vm9, %v2498_v31, %v5371_v56  ;;  %v2514_v12 = vsel %vm2509_vm9, %v5361_v46, %v2498_v31  ;;  %7088 = vst [vmem:[#allocation67_spill] sm:$0xff] %v5879_v51 }
 0x4f3   : >> { %v2526_v4 = vmul.f32 %v2518_v18, %v2514_v12  ;;  %v2527_v44 = vmul.f32 %v2519_v9, %v2512_v25  ;;  %v2592_v25 = vld [vmem:[#allocation2 + $0x3c8] sm:$0xff]  ;;  %v7092_v12 = vld [vmem:[#allocation29_spill] sm:$0xff] }
 0x4f5   : >> { %v2534_v50 = vadd.f32 %v2526_v4, %v2485_v19  ;;  %v2535_v20 = vadd.f32 %v2527_v44, %v2486_v37  ;;  %v2506_v39 = vpop.permute.xlu1 %2505  ;;  %v2165_v62 = vpop.permute.xlu0 %2164  ;;  %v2567_v19 = vld [vmem:[#allocation2 + $0x5e0] sm:$0xff]  ;;  %v2568_v37 = vld [vmem:[#allocation2 + $0x4f0] sm:$0xff] }
 0x4f6   : >> { %v2510_v0 = vsel %vm2509_vm9, %v5371_v56, %v2506_v39  ;;  %v2516_v34 = vsel %vm2509_vm9, %v2506_v39, %v5361_v46  ;;  %v5890_v18 = vsel %vm2166_vm11, %v2165_v62, %v5879_v51  ;;  %v7093_v4 = vld [vmem:[#allocation28_spill] sm:$0xff] }
 0x4f7   : >> { %v2528_v49 = vmul.f32 %v2520_v27, %v2510_v0  ;;  %v2529_v59 = vmul.f32 %v2521_v52, %v2516_v34  ;;  %7089 = vst [vmem:[#allocation68_spill] sm:$0xff] %v5890_v18  ;;  %v7096_v0 = vld [vmem:[#allocation33_spill] sm:$0xff]  ;;  %v1937_v51 = vld [vmem:[#allocation2 + $0x50] sm:$0xff] }
 0x4f8   : >> { %v2600_v34 = vmul.f32 %v2592_v25, %v7096_v0  ;;  %v2696_v0 = vmul.f32 %v2688_v28, %v5572_v33  ;;  %v7104_v28 = vld [vmem:[#allocation44_spill] sm:$0xff] }
 0x4f9   : >> { %v5893_v9 = vadd.f32 %v2528_v49, %v2487_v32  ;;  %v5895_v31 = vadd.f32 %v2529_v59, %v2488_v35  ;;  %v2547_v56 = vpop.permute.xlu1 %2546  ;;  %v5903_v27 = vpop.permute.xlu0 %2160  ;;  %v2616_v35 = vld [vmem:[#allocation2 + $0x538] sm:$0xff] }
 0x4fa   : >> { %v2561_v46 = vsel %vm2558_vm7, %v2547_v56, %v7092_v12  ;;  %v2563_v44 = vsel %vm2558_vm7, %v7093_v4, %v2547_v56  ;;  %7094 = vst [vmem:[#allocation71_spill] sm:$0xff] %v5903_v27  ;;  %v5908_v32 = vsel %vm2166_vm11, %v5903_v27, %v2165_v62  ;;  %v7099_v56 = vld [vmem:[#allocation39_spill] sm:$0xff]  ;;  %v5987_v27 = vsel %vm1921_vm14, %v5736_v14, %v5716_v15 }
 0x4fb   : >> { %7090 = vst [vmem:[#allocation69_spill] sm:$0xff] %v5893_v9  ;;  %7091 = vst [vmem:[#allocation70_spill] sm:$0xff] %v5895_v31  ;;  %v2575_v52 = vmul.f32 %v2567_v19, %v2563_v44  ;;  %v2576_v39 = vmul.f32 %v2568_v37, %v2561_v46  ;;  %v2640_v9 = vld [vmem:[#allocation2 + $0x120] sm:$0xff]  ;;  %v2624_v4 = vmul.f32 %v2616_v35, %v7099_v56  ;;  %v7100_v46 = vld [vmem:[#allocation43_spill] sm:$0xff] }
 0x4fc   : >> { %7095 = vst [vmem:[#allocation72_spill] sm:$0xff] %v5908_v32  ;;  %v2664_v37 = vld [vmem:[#allocation2 + $0x60] sm:$0xff]  ;;  %v2648_v44 = vmul.f32 %v2640_v9, %v7100_v46  ;;  %v2736_v56 = vld [vmem:[#allocation2 + $0x578] sm:$0xff]  ;;  %7112 = vst [vmem:[#allocation30_spill] sm:$0xff] %v5987_v27 }
 0x4fd   : >> { %v5911_v49 = vadd.f32 %v2575_v52, %v2534_v50  ;;  %v2584_v59 = vadd.f32 %v2576_v39, %v2535_v20  ;;  %v5913_v31 = vpop.permute.xlu1 %1760  ;;  %v5915_v12 = vpop.permute.xlu0 %2201  ;;  %v2672_v50 = vmul.f32 %v2664_v37, %v5533_v63  ;;  %v7101_v52 = vld [vmem:[#allocation27_spill] sm:$0xff]  ;;  %v1790_v63 = vld [vmem:[#allocation2 + $0x3b8] sm:$0xff]  ;;  %v7103_v37 = vld [vmem:[#allocation38_spill] sm:$0xff] }
 0x4fe   : >> { %7098 = vst [vmem:[#allocation73_spill] sm:$0xff] %v5915_v12  ;;  %v5924_v39 = vmul.f32 %v7101_v52, %v5367_v45  ;;  %v1754_v9 = vmul.f32 %v7101_v52, %v5188_v26  ;;  %v2760_v45 = vld [vmem:[#allocation2 + $0x230] sm:$0xff]  ;;  %v5947_v26 = vsel %vm1823_vm8, %v7104_v28, %v7103_v37 }
 0x4ff   : >> { %7097 = vst [vmem:[#allocation33_spill] sm:$0xff] %v5911_v49  ;;  %v2608_v19 = vadd.f32 %v2600_v34, %v2584_v59  ;;  %v1787_v34 = vld [vmem:[#allocation2 + $0x490] sm:$0xff]  ;;  %v2720_v59 = vmul.f32 %v2712_v30, %v5599_v3  ;;  %v5953_v3 = vsel %vm1872_vm1, %v5601_v43, %v5564_v17  ;;  %v5959_v30 = vsel %vm1872_vm1, %v5648_v53, %v5601_v43 }
 0x500   : >> { %7105 = vst [vmem:[#allocation39_spill] sm:$0xff] %v5953_v3  ;;  %7106 = vst [vmem:[#allocation43_spill] sm:$0xff] %v5959_v30  ;;  %v5977_v43 = vsel %vm1921_vm14, %v5716_v15, %v5689_v38 }
 0x501   : >> { %v2632_v62 = vadd.f32 %v2624_v4, %v2608_v19  ;;  %v5919_v21 = vpop.permute.xlu1 %1764  ;;  %v2214_v25 = vpop.permute.xlu0 %2213  ;;  %v1757_v4 = vmul.f32 %v7101_v52, %v5194_v48  ;;  %v7102_v19 = vld [vmem:[#allocation34_spill] sm:$0xff]  ;;  %7111 = vst [vmem:[#allocation44_spill] sm:$0xff] %v5977_v43 }
 0x502   : >> { %v5930_v35 = vsel %vm2215_vm12, %v2214_v25, %v5915_v12  ;;  %v5941_v33 = vsel %vm1823_vm8, %v7103_v37, %v7102_v19  ;;  %v2744_v12 = vmul.f32 %v2736_v56, %v5616_v8 }
 0x503   : >> { %v2656_v20 = vadd.f32 %v2648_v44, %v2632_v62  ;;  %v1836_v44 = vld [vmem:[#allocation2 + $0x588] sm:$0xff]  ;;  %v1839_v62 = vld [vmem:[#allocation2 + $0x2b8] sm:$0xff] }
 0x505   : >> { %v2680_v46 = vadd.f32 %v2672_v50, %v2656_v20  ;;  %v1773_v48 = vpop.permute.xlu1 %1772  ;;  %v5971_v20 = vpop.permute.xlu0 %2209 }
 0x506   : >> { %v5964_v37 = vsel %vm1774_vm15, %v7107_v60, %v1773_v48  ;;  %v5969_v50 = vsel %vm1774_vm15, %v1773_v48, %v5913_v31  ;;  %7110 = vst [vmem:[#allocation38_spill] sm:$0xff] %v5971_v20  ;;  %v2768_v48 = vmul.f32 %v2760_v45, %v5646_v1  ;;  %v5992_v57 = vsel %vm2215_vm12, %v5971_v20, %v2214_v25  ;;  %v1983_v20 = vld [vmem:[#allocation2] sm:$0xff] }
 0x507   : >> { %7108 = vst [vmem:[#allocation27_spill] sm:$0xff] %v5964_v37  ;;  %7109 = vst [vmem:[#allocation34_spill] sm:$0xff] %v5969_v50  ;;  %v2704_v36 = vadd.f32 %v2696_v0, %v2680_v46  ;;  %v1795_v6 = vmul.f32 %v1787_v34, %v5969_v50  ;;  %v1798_v49 = vmul.f32 %v1790_v63, %v5964_v37  ;;  %v2784_v37 = vld [vmem:[#allocation2 + $0x688] sm:$0xff] }
 0x508   : >> { %v1844_v0 = vmul.f32 %v1836_v44, %v5941_v33  ;;  %v1847_v34 = vmul.f32 %v1839_v62, %v5947_v26  ;;  %v1893_v1 = vmul.f32 %v1885_v42, %v5953_v3  ;;  %v1896_v45 = vmul.f32 %v1888_v16, %v5959_v30  ;;  %v1986_v42 = vld [vmem:[#allocation2 + $0x5f8] sm:$0xff]  ;;  %v2081_v44 = vld [vmem:[#allocation2 + $0x508] sm:$0xff]  ;;  %v2084_v3 = vld [vmem:[#allocation2 + $0x170] sm:$0xff] }
 0x509   : >> { %v1803_v63 = vadd.f32 %v1795_v6, %v1754_v9  ;;  %v1806_v8 = vadd.f32 %v1798_v49, %v1757_v4  ;;  %v1814_v56 = vpop.permute.xlu1 %1813  ;;  %v1942_v46 = vmul.f32 %v1934_v54, %v5977_v43  ;;  %v5999_v15 = vpop.permute.xlu0 %2250  ;;  %v2728_v50 = vadd.f32 %v2720_v59, %v2704_v36  ;;  %v2032_v36 = vld [vmem:[#allocation2 + $0x418] sm:$0xff]  ;;  %v1788_v62 = vld [vmem:[#allocation2 + $0x328] sm:$0xff] }
 0x50a   : >> { %7113 = vst [vmem:[#allocation74_spill] sm:$0xff] %v5999_v15  ;;  %v1945_v25 = vmul.f32 %v1937_v51, %v5987_v27  ;;  %v6006_v6 = vsel %vm1970_vm6, %v5758_v11, %v5748_v5  ;;  %v6012_v54 = vsel %vm1970_vm6, %v5768_v61, %v5758_v11  ;;  %v6018_v16 = vsel %vm2019_vm3, %v5787_v2, %v5777_v7  ;;  %v2035_v51 = vld [vmem:[#allocation2 + $0x390] sm:$0xff] }
 0x50b   : >> { %v1852_v49 = vadd.f32 %v1844_v0, %v1803_v63  ;;  %v1855_v9 = vadd.f32 %v1847_v34, %v1806_v8  ;;  %v6024_v4 = vsel %vm2019_vm3, %v5797_v40, %v5787_v2  ;;  %v2752_v59 = vadd.f32 %v2744_v12, %v2728_v50  ;;  %v1789_v0 = vld [vmem:[#allocation2 + $0x480] sm:$0xff] }
 0x50c   : >> { %v6030_v11 = vsel %vm1774_vm15, %v5919_v21, %v7107_v60  ;;  %v6036_v34 = vsel %vm1774_vm15, %v5913_v31, %v5919_v21  ;;  %v2792_v12 = vmul.f32 %v2784_v37, %v5668_v41  ;;  %v1991_v50 = vmul.f32 %v1983_v20, %v6006_v6  ;;  %v2130_v21 = vld [vmem:[#allocation2 + $0x28] sm:$0xff]  ;;  %v2133_v31 = vld [vmem:[#allocation2 + $0xe0] sm:$0xff] }
 0x50d   : >> { %v1901_v63 = vadd.f32 %v1893_v1, %v1852_v49  ;;  %v1904_v8 = vadd.f32 %v1896_v45, %v1855_v9  ;;  %v1863_v2 = vpop.permute.xlu1 %1862  ;;  %v1756_v15 = vmul.f32 %v7101_v52, %v5181_v29  ;;  %v6042_v27 = vpop.permute.xlu0 %2262  ;;  %v2776_v60 = vadd.f32 %v2768_v48, %v2752_v59  ;;  %v2179_v37 = vld [vmem:[#allocation2 + $0x1a8] sm:$0xff]  ;;  %v1838_v59 = vld [vmem:[#allocation2 + $0x58] sm:$0xff] }
 0x50e   : >> { %v1994_v43 = vmul.f32 %v1986_v42, %v6012_v54  ;;  %v2040_v30 = vmul.f32 %v2032_v36, %v6018_v16  ;;  %v2043_v49 = vmul.f32 %v2035_v51, %v6024_v4  ;;  %v2089_v41 = vmul.f32 %v2081_v44, %v5819_v58  ;;  %v2182_v52 = vld [vmem:[#allocation2 + $0x648] sm:$0xff]  ;;  %v1837_v42 = vld [vmem:[#allocation2 + $0x540] sm:$0xff] }
 0x50f   : >> { %v1950_v1 = vadd.f32 %v1942_v46, %v1901_v63  ;;  %v1953_v45 = vadd.f32 %v1945_v25, %v1904_v8  ;;  %v1796_v20 = vmul.f32 %v1788_v62, %v6036_v34  ;;  %v1797_v29 = vmul.f32 %v1789_v0, %v6030_v11  ;;  %v1886_v8 = vld [vmem:[#allocation2 + $0x338] sm:$0xff] }
 0x510   : >> { %v6053_v36 = vsel %vm1823_vm8, %v1814_v56, %v7104_v28  ;;  %v6058_v46 = vsel %vm1823_vm8, %v7102_v19, %v1814_v56  ;;  %v2092_v51 = vmul.f32 %v2084_v3, %v5835_v10  ;;  %v2138_v44 = vmul.f32 %v2130_v21, %v5857_v24  ;;  %v1887_v28 = vld [vmem:[#allocation2 + $0x40] sm:$0xff]  ;;  %v2714_v24 = vld [vmem:[#allocation2 + $0x1f8] sm:$0xff] }
 0x511   : >> { %v1999_v48 = vadd.f32 %v1991_v50, %v1950_v1  ;;  %v2002_v9 = vadd.f32 %v1994_v43, %v1953_v45  ;;  %v1912_v25 = vpop.permute.xlu1 %1911  ;;  %v2141_v62 = vmul.f32 %v2133_v31, %v5870_v55  ;;  %v6063_v43 = vpop.permute.xlu0 %2258  ;;  %v6065_v0 = vadd.f32 %v2792_v12, %v2776_v60  ;;  %v2228_v12 = vld [vmem:[#allocation2 + $0x200] sm:$0xff] }
 0x512   : >> { %v6070_v50 = vsel %vm1872_vm1, %v1863_v2, %v5648_v53  ;;  %v6075_v19 = vsel %vm1872_vm1, %v5564_v17, %v1863_v2  ;;  %v2187_v56 = vmul.f32 %v2179_v37, %v5890_v18  ;;  %v2190_v21 = vmul.f32 %v2182_v52, %v5908_v32  ;;  %v2231_v60 = vld [vmem:[#allocation2 + $0x1e0] sm:$0xff]  ;;  %v1935_v2 = vld [vmem:[#allocation2 + $0x8] sm:$0xff]  ;;  %v2642_v18 = vld [vmem:[#allocation2 + $0x278] sm:$0xff] }
 0x513   : >> { %7114 = vst [vmem:[#allocation75_spill] sm:$0xff] %v6065_v0  ;;  %v2051_v63 = vadd.f32 %v2043_v49, %v2002_v9  ;;  %7115 = vst [vmem:[#allocation76_spill] sm:$0xff] %v6070_v50  ;;  %v2048_v3 = vadd.f32 %v2040_v30, %v1999_v48  ;;  %v1845_v31 = vmul.f32 %v1837_v42, %v6058_v46  ;;  %v1936_v37 = vld [vmem:[#allocation2 + $0x628] sm:$0xff]  ;;  %v2713_v0 = vld [vmem:[#allocation2 + $0x1f0] sm:$0xff]  ;;  %vm7192_vm15 = vcmp.lt.s32.totalorder %v7051_v47, 121 }
 0x514   : >> { %7116 = vst [vmem:[#allocation77_spill] sm:$0xff] %v6075_v19  ;;  %v1846_v1 = vmul.f32 %v1838_v59, %v6053_v36  ;;  %v1804_v45 = vadd.f32 %v1796_v20, %v5924_v39  ;;  %v1805_v53 = vadd.f32 %v1797_v29, %v1756_v15  ;;  %v1894_v17 = vmul.f32 %v1886_v8, %v6075_v19  ;;  %v2617_v32 = vld [vmem:[#allocation2 + $0xa8] sm:$0xff]  ;;  %vm7193_vm8 = vmmov %vm7192_vm15 }
 0x515   : >> { %v2100_v49 = vadd.f32 %v2092_v51, %v2051_v63  ;;  %v2097_v9 = vadd.f32 %v2089_v41, %v2048_v3  ;;  %v1961_v55 = vpop.permute.xlu1 %1960  ;;  %v1895_v30 = vmul.f32 %v1887_v28, %v6070_v50  ;;  %v6087_v52 = vsel %vm1921_vm14, %v1912_v25, %v5736_v14  ;;  %v6094_v39 = vpop.permute.xlu0 %2299  ;;  %v1984_v51 = vld [vmem:[#allocation2 + $0x80] sm:$0xff]  ;;  %v1985_v63 = vld [vmem:[#allocation2 + $0x5e8] sm:$0xff]  ;;  %v2033_v3 = vld [vmem:[#allocation2 + $0x610] sm:$0xff] }
 0x516   : >> { %7117 = vst [vmem:[#allocation78_spill] sm:$0xff] %v6087_v52  ;;  %v6092_v48 = vsel %vm1921_vm14, %v5689_v38, %v1912_v25  ;;  %v2236_v15 = vmul.f32 %v2228_v12, %v5930_v35  ;;  %v2239_v20 = vmul.f32 %v2231_v60, %v5992_v57  ;;  %v1853_v42 = vadd.f32 %v1845_v31, %v1804_v45  ;;  %v2034_v12 = vld [vmem:[#allocation2 + $0x698] sm:$0xff]  ;;  %v2083_v45 = vld [vmem:[#allocation2 + $0x528] sm:$0xff]  ;;  %vm7194_vm1 = vmmov %vm7193_vm8 }
 0x517   : >> { %7118 = vst [vmem:[#allocation79_spill] sm:$0xff] %v6092_v48  ;;  %v2149_v41 = vadd.f32 %v2141_v62, %v2100_v49  ;;  %v2146_v29 = vadd.f32 %v2138_v44, %v2097_v9  ;;  %v1854_v59 = vadd.f32 %v1846_v1, %v1805_v53  ;;  %v6101_v14 = vsel %vm1970_vm6, %v1961_v55, %v5768_v61  ;;  %v2082_v1 = vld [vmem:[#allocation2 + $0x380] sm:$0xff]  ;;  %v7151_v50 = vld [vmem:[#allocation47_spill] sm:$0xff]  ;;  %vm7195_vm14 = vmmov %vm7194_vm1 }
 0x518   : >> { %7119 = vst [vmem:[#allocation80_spill] sm:$0xff] %v6101_v14  ;;  %v6106_v38 = vsel %vm1970_vm6, %v5748_v5, %v1961_v55  ;;  %v1943_v62 = vmul.f32 %v1935_v2, %v6092_v48  ;;  %v1944_v57 = vmul.f32 %v1936_v37, %v6087_v52  ;;  %v1902_v8 = vadd.f32 %v1894_v17, %v1853_v42  ;;  %v2132_v42 = vld [vmem:[#allocation2 + $0x88] sm:$0xff]  ;;  %v7148_v52 = vld [vmem:[#allocation46_spill] sm:$0xff] }
 0x519   : >> { %7120 = vst [vmem:[#allocation81_spill] sm:$0xff] %v6106_v38  ;;  %v2198_v25 = vadd.f32 %v2190_v21, %v2149_v41  ;;  %v2195_v35 = vadd.f32 %v2187_v56, %v2146_v29  ;;  %v2010_v44 = vpop.permute.xlu1 %2009  ;;  %v1903_v28 = vadd.f32 %v1895_v30, %v1854_v59  ;;  %v6120_v55 = vpop.permute.xlu0 %2311  ;;  %v1992_v60 = vmul.f32 %v1984_v51, %v6106_v38  ;;  %v2131_v29 = vld [vmem:[#allocation2 + $0x298] sm:$0xff] }
 0x51a   : >> { %v6113_v61 = vsel %vm2019_vm3, %v2010_v44, %v5797_v40  ;;  %v6118_v5 = vsel %vm2019_vm3, %v5777_v7, %v2010_v44  ;;  %v1993_v31 = vmul.f32 %v1985_v63, %v6101_v14  ;;  %v1951_v53 = vadd.f32 %v1943_v62, %v1902_v8  ;;  %v7146_v14 = vld [vmem:[#allocation42_spill] sm:$0xff] }
 0x51b   : >> { %7121 = vst [vmem:[#allocation82_spill] sm:$0xff] %v6113_v61  ;;  %7122 = vst [vmem:[#allocation83_spill] sm:$0xff] %v6118_v5  ;;  %v6122_v56 = vadd.f32 %v2239_v20, %v2198_v25  ;;  %v6124_v21 = vadd.f32 %v2236_v15, %v2195_v35  ;;  %v1952_v40 = vadd.f32 %v1944_v57, %v1903_v28  ;;  %v2180_v28 = vld [vmem:[#allocation2 + $0x5a0] sm:$0xff]  ;;  %vm7247_vm6 = vcmask 1043456  }
 0x51c   : >> { %v2041_v49 = vmul.f32 %v2033_v3, %v6118_v5  ;;  %v2042_v9 = vmul.f32 %v2034_v12, %v6113_v61  ;;  %v2000_v37 = vadd.f32 %v1992_v60, %v1951_v53  ;;  %v2181_v3 = vld [vmem:[#allocation2 + $0x5d8] sm:$0xff]  ;;  %v7130_v53 = vld [vmem:[#allocation67_spill] sm:$0xff]  ;;  %v7144_v61 = vld [vmem:[#allocation40_spill] sm:$0xff]  ;;  %v6209_v38 = vmul.f32 %v2642_v18, %v7146_v14 }
 0x51d   : >> { %v2059_v7 = vpop.permute.xlu1 %2058  ;;  %v6140_v2 = vpop.permute.xlu0 %2307  ;;  %v2001_v15 = vadd.f32 %v1993_v31, %v1952_v40  ;;  %v6206_v5 = vmul.f32 %v2617_v32, %v7144_v61  ;;  %v7155_v32 = vld [vmem:[#allocation49_spill] sm:$0xff]  ;;  %v2622_v18 = vld [vmem:[#allocation2 + $0x1c8] sm:$0xff]  ;;  %v2783_v14 = vld [vmem:[#allocation2 + $0x500] sm:$0xff] }
 0x51e   : >> { %v6133_v17 = vsel %vm2068_vm4, %v2059_v7, %v5830_v23  ;;  %v6138_v30 = vsel %vm2068_vm4, %v5806_v13, %v2059_v7  ;;  %v2049_v59 = vadd.f32 %v2041_v49, %v2000_v37  ;;  %v7126_v13 = vld [vmem:[#allocation64_spill] sm:$0xff]  ;;  %v2229_v37 = vld [vmem:[#allocation2 + $0x440] sm:$0xff]  ;;  %vm7248_vm3 = vmmov %vm7247_vm6 }
 0x51f   : >> { %7123 = vst [vmem:[#allocation84_spill] sm:$0xff] %v6133_v17  ;;  %7124 = vst [vmem:[#allocation85_spill] sm:$0xff] %v6138_v30  ;;  %v2090_v41 = vmul.f32 %v2082_v1, %v6138_v30  ;;  %v2091_v20 = vmul.f32 %v2083_v45, %v6133_v17  ;;  %v2050_v51 = vadd.f32 %v2042_v9, %v2001_v15  ;;  %v7128_v1 = vld [vmem:[#allocation71_spill] sm:$0xff]  ;;  %v7142_v17 = vld [vmem:[#allocation37_spill] sm:$0xff] }
 0x520   : >> { %v2230_v15 = vld [vmem:[#allocation2 + $0x248] sm:$0xff]  ;;  %vm7249_vm4 = vmmov %vm7248_vm3 }
 0x521   : >> { %v2108_v63 = vpop.permute.xlu1 %2107  ;;  %v6154_v35 = vpop.permute.xlu0 %2348  ;;  %v2098_v62 = vadd.f32 %v2090_v41, %v2049_v59  ;;  %v2099_v57 = vadd.f32 %v2091_v20, %v2050_v51  ;;  %v7132_v41 = vld [vmem:[#allocation31_spill] sm:$0xff]  ;;  %v2615_v51 = vld [vmem:[#allocation2 + $0x510] sm:$0xff] }
 0x522   : >> { %v6147_v23 = vsel %vm2117_vm2, %v2108_v63, %v5865_v22  ;;  %v6152_v25 = vsel %vm2117_vm2, %v7126_v13, %v2108_v63  ;;  %v2591_v22 = vld [vmem:[#allocation2 + $0x110] sm:$0xff]  ;;  %v7133_v63 = vld [vmem:[#allocation38_spill] sm:$0xff]  ;;  %vm7250_vm2 = vmmov %vm7248_vm3 }
 0x523   : >> { %7125 = vst [vmem:[#allocation86_spill] sm:$0xff] %v6147_v23  ;;  %7127 = vst [vmem:[#allocation64_spill] sm:$0xff] %v6152_v25  ;;  %v2139_v44 = vmul.f32 %v2131_v29, %v6152_v25  ;;  %v2140_v8 = vmul.f32 %v2132_v42, %v6147_v23  ;;  %v2599_v20 = vmul.f32 %v2591_v22, %v7132_v41  ;;  %v2594_v41 = vld [vmem:[#allocation2 + $0x640] sm:$0xff]  ;;  %v2738_v23 = vld [vmem:[#allocation2 + $0x178] sm:$0xff] }
 0x524   : >> { %v2737_v25 = vld [vmem:[#allocation2 + $0x3a8] sm:$0xff] }
 0x525   : >> { %v2147_v12 = vadd.f32 %v2139_v44, %v2098_v62  ;;  %v2148_v60 = vadd.f32 %v2140_v8, %v2099_v57  ;;  %v2157_v31 = vpop.permute.xlu1 %2156  ;;  %v6168_v49 = vpop.permute.xlu0 %2360  ;;  %v7134_v62 = vld [vmem:[#allocation73_spill] sm:$0xff] }
 0x526   : >> { %v6161_v45 = vsel %vm2166_vm11, %v2157_v31, %v7128_v1  ;;  %v6166_v40 = vsel %vm2166_vm11, %v7130_v53, %v2157_v31  ;;  %v7135_v8 = vld [vmem:[#allocation33_spill] sm:$0xff]  ;;  %v7136_v1 = vld [vmem:[#allocation36_spill] sm:$0xff]  ;;  %vm7252_vm11 = vmmov %vm7250_vm2 }
 0x527   : >> { %7129 = vst [vmem:[#allocation71_spill] sm:$0xff] %v6161_v45  ;;  %7131 = vst [vmem:[#allocation67_spill] sm:$0xff] %v6166_v40  ;;  %v2188_v9 = vmul.f32 %v2180_v28, %v6166_v40  ;;  %v2189_v7 = vmul.f32 %v2181_v3, %v6161_v45  ;;  %v2607_v28 = vadd.f32 %v2599_v20, %v7135_v8  ;;  %v7137_v20 = vld [vmem:[#allocation41_spill] sm:$0xff]  ;;  %v2690_v8 = vld [vmem:[#allocation2 + $0x570] sm:$0xff] }
 0x528   : >> { %v2623_v22 = vmul.f32 %v2615_v51, %v7136_v1  ;;  %v2666_v51 = vld [vmem:[#allocation2 + $0x5b8] sm:$0xff]  ;;  %v2711_v1 = vld [vmem:[#allocation2 + $0x468] sm:$0xff]  ;;  %7145 = vst [vmem:[#allocation33_spill] sm:$0xff] %v6206_v5  ;;  %7147 = vst [vmem:[#allocation36_spill] sm:$0xff] %v6209_v38 }
 0x529   : >> { %v2196_v29 = vadd.f32 %v2188_v9, %v2147_v12  ;;  %v2197_v42 = vadd.f32 %v2189_v7, %v2148_v60  ;;  %v2206_v59 = vpop.permute.xlu1 %2205  ;;  %v6179_v44 = vpop.permute.xlu0 %2356  ;;  %v2639_v9 = vld [vmem:[#allocation2 + $0x5b0] sm:$0xff]  ;;  %v7140_v40 = vld [vmem:[#allocation35_spill] sm:$0xff]  ;;  %v2621_v38 = vld [vmem:[#allocation2 + $0x1b8] sm:$0xff] }
 0x52a   : >> { %v2219_v13 = vsel %vm2215_vm12, %v2206_v59, %v7133_v63  ;;  %v2221_v57 = vsel %vm2215_vm12, %v7134_v62, %v2206_v59  ;;  %v2593_v63 = vld [vmem:[#allocation2 + $0x6a8] sm:$0xff]  ;;  %v2631_v59 = vadd.f32 %v2623_v22, %v2607_v28  ;;  %v2618_v62 = vld [vmem:[#allocation2 + $0x478] sm:$0xff]  ;;  %v7138_v22 = vld [vmem:[#allocation32_spill] sm:$0xff] }
 0x52b   : >> { %v2237_v3 = vmul.f32 %v2229_v37, %v2221_v57  ;;  %v2238_v31 = vmul.f32 %v2230_v15, %v2219_v13  ;;  %v2647_v37 = vmul.f32 %v2639_v9, %v7137_v20  ;;  %v2641_v15 = vld [vmem:[#allocation2 + $0xc0] sm:$0xff]  ;;  %v2663_v13 = vld [vmem:[#allocation2 + $0x6b8] sm:$0xff]  ;;  %v6197_v45 = vmul.f32 %v2594_v41, %v7138_v22  ;;  %v2735_v20 = vld [vmem:[#allocation2 + $0x268] sm:$0xff] }
 0x52c   : >> { %v6200_v9 = vmul.f32 %v2593_v63, %v7140_v40  ;;  %v6203_v30 = vmul.f32 %v2618_v62, %v7142_v17  ;;  %v2762_v41 = vld [vmem:[#allocation2 + $0x118] sm:$0xff]  ;;  %v7153_v17 = vld [vmem:[#allocation48_spill] sm:$0xff]  ;;  %v7158_v5 = vld [vmem:[#allocation51_spill] sm:$0xff] }
 0x52d   : >> { %v6183_v12 = vadd.f32 %v2237_v3, %v2196_v29  ;;  %v6185_v60 = vadd.f32 %v2238_v31, %v2197_v42  ;;  %v6187_v53 = vpop.permute.xlu1 %2254  ;;  %v6189_v7 = vpop.permute.xlu0 %2397  ;;  %v2665_v29 = vld [vmem:[#allocation2 + $0x520] sm:$0xff]  ;;  %v2687_v42 = vld [vmem:[#allocation2 + $0x690] sm:$0xff]  ;;  %v2655_v28 = vadd.f32 %v2647_v37, %v2631_v59  ;;  %7139 = vst [vmem:[#allocation31_spill] sm:$0xff] %v6197_v45  ;;  %v2671_v59 = vmul.f32 %v2663_v13, %v7148_v52  ;;  %v2759_v37 = vld [vmem:[#allocation2 + $0x228] sm:$0xff] }
 0x52e   : >> { %v2689_v3 = vld [vmem:[#allocation2 + $0x530] sm:$0xff]  ;;  %7141 = vst [vmem:[#allocation38_spill] sm:$0xff] %v6200_v9  ;;  %7143 = vst [vmem:[#allocation73_spill] sm:$0xff] %v6203_v30  ;;  %v2761_v22 = vld [vmem:[#allocation2 + $0x258] sm:$0xff]  ;;  %v6218_v45 = vmul.f32 %v2666_v51, %v7151_v50  ;;  %v6221_v62 = vmul.f32 %v2665_v29, %v7153_v17  ;;  %v2695_v61 = vmul.f32 %v2687_v42, %v7155_v32 }
 0x52f   : >> { %v7149_v40 = vld [vmem:[#allocation45_spill] sm:$0xff]  ;;  %v7156_v13 = vld [vmem:[#allocation50_spill] sm:$0xff]  ;;  %v6230_v9 = vmul.f32 %v2689_v3, %v7158_v5  ;;  %v2679_v29 = vadd.f32 %v2671_v59, %v2655_v28  ;;  %v7161_v17 = vld [vmem:[#allocation56_spill] sm:$0xff] }
 0x530   : >> { %v6215_v63 = vmul.f32 %v2641_v15, %v7149_v40  ;;  %7152 = vst [vmem:[#allocation32_spill] sm:$0xff] %v6218_v45  ;;  %7154 = vst [vmem:[#allocation35_spill] sm:$0xff] %v6221_v62  ;;  %v6227_v30 = vmul.f32 %v2690_v8, %v7156_v13  ;;  %v7160_v15 = vld [vmem:[#allocation52_spill] sm:$0xff]  ;;  %v2786_v50 = vld [vmem:[#allocation2 + $0x260] sm:$0xff]  ;;  %v6234_v62 = vmul.f32 %v2714_v24, %v7161_v17 }
 0x531   : >> { %v6192_v57 = vpop.permute.xlu1 %2303  ;;  %v6194_v31 = vpop.permute.xlu0 %2405  ;;  %7159 = vst [vmem:[#allocation40_spill] sm:$0xff] %v6230_v9  ;;  %v2719_v40 = vmul.f32 %v2711_v1, %v7160_v15  ;;  %v2785_v51 = vld [vmem:[#allocation2 + $0x280] sm:$0xff]  ;;  %v2646_v45 = vld [vmem:[#allocation2 + $0x2a8] sm:$0xff]  ;;  %v7163_v42 = vld [vmem:[#allocation53_spill] sm:$0xff] }
 0x532   : >> { %7150 = vst [vmem:[#allocation41_spill] sm:$0xff] %v6215_v63  ;;  %7157 = vst [vmem:[#allocation37_spill] sm:$0xff] %v6227_v30  ;;  %v6237_v32 = vmul.f32 %v2713_v0, %v7163_v42  ;;  %v7165_v63 = vld [vmem:[#allocation54_spill] sm:$0xff]  ;;  %v7166_v8 = vld [vmem:[#allocation60_spill] sm:$0xff] }
 0x533   : >> { %7162 = vst [vmem:[#allocation42_spill] sm:$0xff] %v6234_v62  ;;  %v6240_v19 = vmul.f32 %v2735_v20, %v7165_v63  ;;  %v6243_v13 = vmul.f32 %v2738_v23, %v7166_v8  ;;  %v2645_v5 = vld [vmem:[#allocation2 + $0x5c8] sm:$0xff]  ;;  %v2670_v3 = vld [vmem:[#allocation2 + $0x1c0] sm:$0xff]  ;;  %v7170_v9 = vld [vmem:[#allocation57_spill] sm:$0xff]  ;;  %v6260_v8 = vmul.f32 %v2622_v18, %v5941_v33 }
 0x534   : >> { %7164 = vst [vmem:[#allocation46_spill] sm:$0xff] %v6237_v32  ;;  %v2669_v30 = vld [vmem:[#allocation2 + $0x148] sm:$0xff]  ;;  %v6249_v28 = vmul.f32 %v2759_v37, %v7170_v9  ;;  %v7171_v24 = vld [vmem:[#allocation61_spill] sm:$0xff]  ;;  %v7173_v0 = vld [vmem:[#allocation58_spill] sm:$0xff]  ;;  %v6266_v9 = vmul.f32 %v2621_v38, %v5947_v26 }
 0x535   : >> { %v6212_v48 = vpop.permute.xlu1 %2352  ;;  %v6224_v52 = vpop.permute.xlu0 %2446  ;;  %7167 = vst [vmem:[#allocation45_spill] sm:$0xff] %v6243_v13  ;;  %v7168_v1 = vld [vmem:[#allocation55_spill] sm:$0xff]  ;;  %v6252_v59 = vmul.f32 %v2762_v41, %v7171_v24  ;;  %v6255_v17 = vmul.f32 %v2761_v22, %v7173_v0  ;;  %v2694_v20 = vld [vmem:[#allocation2 + $0x398] sm:$0xff]  ;;  %v2693_v63 = vld [vmem:[#allocation2 + $0x3c0] sm:$0xff] }
 0x536   : >> { %v6246_v15 = vmul.f32 %v2737_v25, %v7168_v1  ;;  %v2718_v42 = vld [vmem:[#allocation2 + $0x458] sm:$0xff]  ;;  %7175 = vst [vmem:[#allocation50_spill] sm:$0xff] %v6260_v8  ;;  %v7176_v13 = vld [vmem:[#allocation62_spill] sm:$0xff]  ;;  %v7177_v37 = vld [vmem:[#allocation63_spill] sm:$0xff]  ;;  %v6289_v8 = vmul.f32 %v2694_v20, %v6006_v6 }
 0x537   : >> { %7172 = vst [vmem:[#allocation48_spill] sm:$0xff] %v6252_v59  ;;  %7174 = vst [vmem:[#allocation49_spill] sm:$0xff] %v6255_v17  ;;  %v6263_v25 = vmul.f32 %v2783_v14, %v7176_v13  ;;  %v6269_v41 = vmul.f32 %v2786_v50, %v7177_v37  ;;  %v2717_v1 = vld [vmem:[#allocation2 + $0x2a0] sm:$0xff]  ;;  %v2742_v22 = vld [vmem:[#allocation2 + $0x130] sm:$0xff]  ;;  %v2703_v13 = vadd.f32 %v2695_v61, %v2679_v29 }
 0x538   : >> { %7169 = vst [vmem:[#allocation47_spill] sm:$0xff] %v6246_v15  ;;  %v2741_v24 = vld [vmem:[#allocation2 + $0x1d0] sm:$0xff]  ;;  %v7179_v59 = vld [vmem:[#allocation59_spill] sm:$0xff]  ;;  %v2595_v26 = vld [vmem:[#allocation2 + $0xb8] sm:$0xff]  ;;  %v6298_v61 = vmul.f32 %v2717_v1, %v6024_v4  ;;  %v6301_v29 = vmul.f32 %v2742_v22, %v5819_v58 }
 0x539   : >> { %v6257_v23 = vpop.permute.xlu1 %2401  ;;  %7178 = vst [vmem:[#allocation51_spill] sm:$0xff] %v6269_v41  ;;  %v6271_v0 = vpop.permute.xlu0 %2454  ;;  %v6274_v17 = vmul.f32 %v2785_v51, %v7179_v59  ;;  %v7181_v15 = vld [vmem:[#allocation39_spill] sm:$0xff]  ;;  %v2597_v62 = vld [vmem:[#allocation2 + $0x450] sm:$0xff]  ;;  %v7184_v41 = vld [vmem:[#allocation30_spill] sm:$0xff]  ;;  %v6292_v51 = vmul.f32 %v2693_v63, %v6012_v54  ;;  %v6307_v59 = vmul.f32 %v2595_v26, %v6036_v34  ;;  %v2727_v22 = vadd.f32 %v2719_v40, %v2703_v13 }
 0x53a   : >> { %v6277_v33 = vmul.f32 %v2646_v45, %v7181_v15  ;;  %v7182_v18 = vld [vmem:[#allocation43_spill] sm:$0xff]  ;;  %v7183_v50 = vld [vmem:[#allocation44_spill] sm:$0xff]  ;;  %v6286_v32 = vmul.f32 %v2669_v30, %v7184_v41  ;;  %7186 = vst [vmem:[#allocation53_spill] sm:$0xff] %v6298_v61  ;;  %7187 = vst [vmem:[#allocation54_spill] sm:$0xff] %v6301_v29  ;;  %v2317_v13 = vsel %vm2313_vm0, %v6192_v57, %v6140_v2 }
 0x53b   : >> { %7180 = vst [vmem:[#allocation52_spill] sm:$0xff] %v6274_v17  ;;  %v6280_v14 = vmul.f32 %v2645_v5, %v7182_v18  ;;  %v2596_v38 = vld [vmem:[#allocation2 + $0x68] sm:$0xff]  ;;  %v6283_v37 = vmul.f32 %v2670_v3, %v7183_v50  ;;  %v2598_v45 = vld [vmem:[#allocation2 + $0xb0] sm:$0xff]  ;;  %v6295_v5 = vmul.f32 %v2718_v42, %v6018_v16  ;;  %v6304_v3 = vmul.f32 %v2741_v24, %v5835_v10  ;;  %v2619_v30 = vld [vmem:[#allocation2 + $0x2f8] sm:$0xff] }
 0x53c   : >> { %v2620_v15 = vld [vmem:[#allocation2 + $0x128] sm:$0xff]  ;;  %v6310_v54 = vmul.f32 %v2596_v38, %v6030_v11  ;;  %v2277_v4 = vld [vmem:[#allocation2 + $0x558] sm:$0xff]  ;;  %v7190_v63 = vld [vmem:[#allocation74_spill] sm:$0xff]  ;;  %v2268_v11 = vsel %vm2264_vm5, %v6187_v53, %v6063_v43  ;;  %v6333_v24 = vmul.f32 %v2619_v30, %v6058_v46  ;;  %v2266_v38 = vsel %vm2264_vm5, %v6063_v43, %v6042_v27 }
 0x53d   : >> { %7185 = vst [vmem:[#allocation56_spill] sm:$0xff] %v6295_v5  ;;  %7188 = vst [vmem:[#allocation60_spill] sm:$0xff] %v6304_v3  ;;  %v2410_v6 = vpop.permute.xlu1 %2409  ;;  %v7189_v16 = vld [vmem:[#allocation27_spill] sm:$0xff]  ;;  %v2272_v58 = vsel %vm2264_vm5, %v6042_v27, %v7190_v63  ;;  %v6319_v10 = vpop.permute.xlu0 %2495  ;;  %v7191_v42 = vld [vmem:[#allocation34_spill] sm:$0xff]  ;;  %v6336_v18 = vmul.f32 %v2620_v15, %v6053_v36  ;;  %v2321_v46 = vsel %vm2313_vm0, %v6120_v55, %v6094_v39 }
 0x53e   : >> { %v6313_v20 = vmul.f32 %v2597_v62, %v7189_v16  ;;  %v6322_v41 = vmul.f32 %v2598_v45, %v7191_v42  ;;  %v2278_v1 = vld [vmem:[#allocation2 + $0xd8] sm:$0xff]  ;;  %v2279_v34 = vld [vmem:[#allocation2 + $0x680] sm:$0xff]  ;;  %v2270_v62 = vsel %vm2264_vm5, %v7190_v63, %v6187_v53  ;;  %v2329_v50 = vld [vmem:[#allocation2 + $0x590] sm:$0xff]  ;;  %v2315_v45 = vsel %vm2313_vm0, %v6140_v2, %v6120_v55 }
 0x53f   : >> { %v2280_v26 = vld [vmem:[#allocation2 + $0x498] sm:$0xff]  ;;  %v2285_v53 = vmul.f32 %v2277_v4, %v2272_v58  ;;  %v2328_v40 = vld [vmem:[#allocation2 + $0x4a8] sm:$0xff]  ;;  %v2319_v27 = vsel %vm2313_vm0, %v6094_v39, %v6192_v57  ;;  %v2326_v30 = vld [vmem:[#allocation2 + $0x180] sm:$0xff]  ;;  %v2370_v55 = vsel %vm2362_vm13, %v6168_v49, %v6154_v35  ;;  %v2364_v4 = vsel %vm2362_vm13, %v6179_v44, %v6168_v49 }
 0x540   : >> { %v2327_v36 = vld [vmem:[#allocation2 + $0x658] sm:$0xff]  ;;  %v2375_v15 = vld [vmem:[#allocation2 + $0x620] sm:$0xff]  ;;  %v2378_v16 = vld [vmem:[#allocation2 + $0x428] sm:$0xff]  ;;  %v2286_v2 = vmul.f32 %v2278_v1, %v2270_v62  ;;  %v2287_v63 = vmul.f32 %v2279_v34, %v2268_v11  ;;  %v2288_v57 = vmul.f32 %v2280_v26, %v2266_v38  ;;  %v2337_v42 = vmul.f32 %v2329_v50, %v2315_v45 }
 0x541   : >> { %v2451_v43 = vpop.permute.xlu1 %2450  ;;  %v6366_v58 = vpop.permute.xlu0 %2503  ;;  %v2293_v39 = vadd.f32 %v2285_v53, %v6124_v21  ;;  %v6370_v29 = vadd.f32 %v6240_v19, %v2727_v22  ;;  %v2335_v3 = vmul.f32 %v2327_v36, %v2319_v27  ;;  %v2336_v5 = vmul.f32 %v2328_v40, %v2317_v13  ;;  %v2376_v61 = vld [vmem:[#allocation2 + $0xf0] sm:$0xff]  ;;  %v2377_v17 = vld [vmem:[#allocation2 + $0x220] sm:$0xff]  ;;  %v2424_v38 = vld [vmem:[#allocation2 + $0x618] sm:$0xff] }
 0x542   : >> { %v2366_v49 = vsel %vm2362_vm13, %v6212_v48, %v6179_v44  ;;  %v2368_v1 = vsel %vm2362_vm13, %v6154_v35, %v6212_v48  ;;  %v2296_v21 = vadd.f32 %v2288_v57, %v6122_v56  ;;  %v2334_v34 = vmul.f32 %v2326_v30, %v2321_v46  ;;  %v2425_v50 = vld [vmem:[#allocation2 + $0x138] sm:$0xff]  ;;  %v2426_v53 = vld [vmem:[#allocation2 + $0xc8] sm:$0xff]  ;;  %vm7253_vm12 = vmmov %vm7250_vm2 }
 0x543   : >> { %v2383_v11 = vmul.f32 %v2375_v15, %v2370_v55  ;;  %v2386_v19 = vmul.f32 %v2378_v16, %v2364_v4  ;;  %v2294_v22 = vadd.f32 %v2286_v2, %v6183_v12  ;;  %v2295_v26 = vadd.f32 %v2287_v63, %v6185_v60  ;;  %v2427_v12 = vld [vmem:[#allocation2 + $0x1d8] sm:$0xff]  ;;  %v2473_v15 = vld [vmem:[#allocation2 + $0x308] sm:$0xff]  ;;  %v2474_v55 = vld [vmem:[#allocation2 + $0x470] sm:$0xff] }
 0x544   : >> { %v2415_v44 = vsel %vm2411_vm10, %v6257_v23, %v6194_v31  ;;  %v2417_v48 = vsel %vm2411_vm10, %v6189_v7, %v6257_v23  ;;  %v2384_v35 = vmul.f32 %v2376_v61, %v2368_v1  ;;  %v2385_v45 = vmul.f32 %v2377_v17, %v2366_v49  ;;  %v2522_v1 = vld [vmem:[#allocation2 + $0x30] sm:$0xff]  ;;  %vm7254_vm5 = vmmov %vm7250_vm2 }
 0x545   : >> { %v2459_v62 = vpop.permute.xlu1 %2458  ;;  %v6391_v56 = vpop.permute.xlu0 %2544  ;;  %v2413_v60 = vsel %vm2411_vm10, %v6194_v31, %v2410_v6  ;;  %v2419_v46 = vsel %vm2411_vm10, %v2410_v6, %v6189_v7  ;;  %v2342_v36 = vadd.f32 %v2334_v34, %v2293_v39  ;;  %v2345_v40 = vadd.f32 %v2337_v42, %v2296_v21  ;;  %v2475_v7 = vld [vmem:[#allocation2 + $0x410] sm:$0xff]  ;;  %v2476_v6 = vld [vmem:[#allocation2 + $0x1a0] sm:$0xff]  ;;  %vm7255_vm0 = vmmov %vm7250_vm2 }
 0x546   : >> { %v2343_v13 = vadd.f32 %v2335_v3, %v2294_v22  ;;  %v2344_v27 = vadd.f32 %v2336_v5, %v2295_v26  ;;  %v2432_v30 = vmul.f32 %v2424_v38, %v2417_v48  ;;  %v2433_v23 = vmul.f32 %v2425_v50, %v2415_v44  ;;  %v2523_v21 = vld [vmem:[#allocation2 + $0x270] sm:$0xff]  ;;  %v2570_v38 = vld [vmem:[#allocation2 + $0x420] sm:$0xff] }
 0x547   : >> { %v2464_v17 = vsel %vm7192_vm15, %v2451_v43, %v6271_v0  ;;  %v2466_v31 = vsel %vm7193_vm8, %v6224_v52, %v2451_v43  ;;  %v2434_v16 = vmul.f32 %v2426_v53, %v2413_v60  ;;  %v2435_v4 = vmul.f32 %v2427_v12, %v2419_v46  ;;  %v2524_v48 = vld [vmem:[#allocation2 + $0x2d0] sm:$0xff] }
 0x548   : >> { %v2462_v5 = vsel %vm7194_vm1, %v6271_v0, %v2459_v62  ;;  %v2468_v3 = vsel %vm7195_vm14, %v2459_v62, %v6224_v52  ;;  %v2391_v63 = vadd.f32 %v2383_v11, %v2342_v36  ;;  %v2394_v39 = vadd.f32 %v2386_v19, %v2345_v40  ;;  %v2569_v19 = vld [vmem:[#allocation2 + $0x160] sm:$0xff]  ;;  %v7196_v36 = vld [vmem:[#allocation29_spill] sm:$0xff] }
 0x549   : >> { %v2500_v61 = vpop.permute.xlu1 %2499  ;;  %v6411_v2 = vpop.permute.xlu0 %2552  ;;  %v2392_v57 = vadd.f32 %v2384_v35, %v2343_v13  ;;  %v2393_v42 = vadd.f32 %v2385_v45, %v2344_v27  ;;  %v2481_v43 = vmul.f32 %v2473_v15, %v2466_v31  ;;  %v2482_v49 = vmul.f32 %v2474_v55, %v2464_v17  ;;  %v2525_v35 = vld [vmem:[#allocation2 + $0x158] sm:$0xff]  ;;  %v7197_v13 = vld [vmem:[#allocation28_spill] sm:$0xff]  ;;  %v2572_v17 = vld [vmem:[#allocation2 + $0x4c0] sm:$0xff] }
 0x54a   : >> { %v2513_v34 = vsel %vm2509_vm9, %v2500_v61, %v6366_v58  ;;  %v2515_v0 = vsel %vm2509_vm9, %v6319_v10, %v2500_v61  ;;  %v2440_v22 = vadd.f32 %v2432_v30, %v2391_v63  ;;  %v2483_v62 = vmul.f32 %v2475_v7, %v2462_v5  ;;  %v2643_v31 = vld [vmem:[#allocation2 + $0x198] sm:$0xff] }
 0x54b   : >> { %v2441_v52 = vadd.f32 %v2433_v23, %v2392_v57  ;;  %v2484_v26 = vmul.f32 %v2476_v6, %v2468_v3  ;;  %v2442_v50 = vadd.f32 %v2434_v16, %v2393_v42  ;;  %v2443_v44 = vadd.f32 %v2435_v4, %v2394_v39  ;;  %v7198_v6 = vld [vmem:[#allocation69_spill] sm:$0xff]  ;;  %v7199_v3 = vld [vmem:[#allocation70_spill] sm:$0xff] }
 0x54c   : >> { %v2530_v60 = vmul.f32 %v2522_v1, %v2515_v0  ;;  %v2531_v46 = vmul.f32 %v2523_v21, %v2513_v34  ;;  %v2489_v30 = vadd.f32 %v2481_v43, %v2440_v22  ;;  %v7200_v21 = vld [vmem:[#allocation77_spill] sm:$0xff]  ;;  %v7201_v0 = vld [vmem:[#allocation38_spill] sm:$0xff] }
 0x54d   : >> { %v2508_v11 = vpop.permute.xlu1 %2507  ;;  %v2555_v12 = vpop.permute.xlu0 %2554  ;;  %v2490_v23 = vadd.f32 %v2482_v49, %v2441_v52  ;;  %v2491_v61 = vadd.f32 %v2483_v62, %v2442_v50  ;;  %v2651_v34 = vmul.f32 %v2643_v31, %v7200_v21  ;;  %v7202_v52 = vld [vmem:[#allocation31_spill] sm:$0xff]  ;;  %v7207_v31 = vld [vmem:[#allocation36_spill] sm:$0xff] }
 0x54e   : >> { %v2511_v45 = vsel %vm2509_vm9, %v6366_v58, %v2508_v11  ;;  %v2517_v53 = vsel %vm2509_vm9, %v2508_v11, %v6319_v10  ;;  %v2559_v40 = vsel %vm2558_vm7, %v7196_v36, %v2555_v12  ;;  %v2565_v27 = vsel %vm2558_vm7, %v2555_v12, %v7197_v13  ;;  %v2571_v58 = vld [vmem:[#allocation2 + $0x598] sm:$0xff]  ;;  %v2574_v11 = vld [vmem:[#allocation2 + $0x210] sm:$0xff]  ;;  %v2667_v13 = vld [vmem:[#allocation2 + $0x240] sm:$0xff] }
 0x54f   : >> { %v2577_v15 = vmul.f32 %v2569_v19, %v2559_v40  ;;  %v2578_v55 = vmul.f32 %v2570_v38, %v2565_v27  ;;  %v2492_v10 = vadd.f32 %v2484_v26, %v2443_v44  ;;  %v2532_v16 = vmul.f32 %v2524_v48, %v2511_v45  ;;  %v2573_v26 = vld [vmem:[#allocation2 + $0x3b0] sm:$0xff] }
 0x550   : >> { %v2533_v4 = vmul.f32 %v2525_v35, %v2517_v53  ;;  %v2538_v42 = vadd.f32 %v2530_v60, %v2489_v30  ;;  %v2539_v43 = vadd.f32 %v2531_v46, %v2490_v23  ;;  %v2775_v19 = vadd.f32 %v6249_v28, %v6370_v29  ;;  %v2644_v38 = vld [vmem:[#allocation2 + $0x150] sm:$0xff]  ;;  %v7203_v53 = vld [vmem:[#allocation33_spill] sm:$0xff]  ;;  %v2668_v28 = vld [vmem:[#allocation2 + $0x288] sm:$0xff] }
 0x551   : >> { %v2549_v7 = vpop.permute.xlu1 %2548  ;;  %v2585_v5 = vadd.f32 %v2577_v15, %v7198_v6  ;;  %v2586_v63 = vadd.f32 %v2578_v55, %v7199_v3  ;;  %v2540_v50 = vadd.f32 %v2532_v16, %v2491_v61  ;;  %v7204_v60 = vld [vmem:[#allocation73_spill] sm:$0xff]  ;;  %v7205_v15 = vld [vmem:[#allocation76_spill] sm:$0xff]  ;;  %v2692_v16 = vld [vmem:[#allocation2 + $0xe8] sm:$0xff]  ;;  %vm2897_vm9 = vcmask 130048  }
 0x552   : >> { %v2562_v39 = vsel %vm2558_vm7, %v2549_v7, %v6411_v2  ;;  %v2564_v57 = vsel %vm2558_vm7, %v6391_v56, %v2549_v7  ;;  %v2541_v44 = vadd.f32 %v2533_v4, %v2492_v10  ;;  %v2652_v55 = vmul.f32 %v2644_v38, %v7205_v15  ;;  %v2691_v10 = vld [vmem:[#allocation2 + $0xf8] sm:$0xff]  ;;  %v2739_v38 = vld [vmem:[#allocation2 + $0x608] sm:$0xff] }
 0x553   : >> { %v2579_v49 = vmul.f32 %v2571_v58, %v2564_v57  ;;  %v2580_v1 = vmul.f32 %v2572_v17, %v2562_v39  ;;  %v2609_v22 = vadd.f32 %v7201_v0, %v2585_v5  ;;  %v2610_v62 = vadd.f32 %v7202_v52, %v2586_v63  ;;  %v7206_v58 = vld [vmem:[#allocation41_spill] sm:$0xff]  ;;  %v7209_v5 = vld [vmem:[#allocation78_spill] sm:$0xff]  ;;  %v7210_v63 = vld [vmem:[#allocation35_spill] sm:$0xff] }
 0x554   : >> { %v2676_v3 = vmul.f32 %v2668_v28, %v7209_v5  ;;  %v7211_v57 = vld [vmem:[#allocation32_spill] sm:$0xff]  ;;  %v7212_v0 = vld [vmem:[#allocation81_spill] sm:$0xff]  ;;  %v7226_v5 = vld [vmem:[#allocation86_spill] sm:$0xff] }
 0x555   : >> { %v2587_v48 = vadd.f32 %v2579_v49, %v2538_v42  ;;  %v2588_v35 = vadd.f32 %v2580_v1, %v2539_v43  ;;  %v2557_v45 = vpop.permute.xlu1 %2556  ;;  %v2633_v12 = vadd.f32 %v7203_v53, %v2609_v22  ;;  %v2634_v46 = vadd.f32 %v7204_v60, %v2610_v62  ;;  %v2715_v43 = vld [vmem:[#allocation2 + $0x2d8] sm:$0xff]  ;;  %v7213_v22 = vld [vmem:[#allocation80_spill] sm:$0xff]  ;;  %v7217_v53 = vld [vmem:[#allocation83_spill] sm:$0xff] }
 0x556   : >> { %v2560_v36 = vsel %vm2558_vm7, %v6411_v2, %v2557_v45  ;;  %v2566_v40 = vsel %vm2558_vm7, %v2557_v45, %v6391_v56  ;;  %v6458_v2 = vadd.f32 %v6263_v25, %v2775_v19  ;;  %v2716_v49 = vld [vmem:[#allocation2 + $0x4f8] sm:$0xff]  ;;  %v2700_v52 = vmul.f32 %v2692_v16, %v7213_v22  ;;  %v7214_v62 = vld [vmem:[#allocation40_spill] sm:$0xff]  ;;  %v7219_v60 = vld [vmem:[#allocation46_spill] sm:$0xff] }
 0x557   : >> { %v2611_v29 = vadd.f32 %v6307_v59, %v2587_v48  ;;  %v2612_v27 = vadd.f32 %v6310_v54, %v2588_v35  ;;  %v2581_v30 = vmul.f32 %v2573_v26, %v2560_v36  ;;  %v2582_v23 = vmul.f32 %v2574_v11, %v2566_v40  ;;  %v7208_v54 = vld [vmem:[#allocation79_spill] sm:$0xff]  ;;  %v7215_v11 = vld [vmem:[#allocation37_spill] sm:$0xff]  ;;  %v7220_v36 = vld [vmem:[#allocation42_spill] sm:$0xff] }
 0x558   : >> { %v2657_v17 = vadd.f32 %v7206_v58, %v2633_v12  ;;  %v2658_v61 = vadd.f32 %v7207_v31, %v2634_v46  ;;  %v2675_v6 = vmul.f32 %v2667_v13, %v7208_v54  ;;  %v7218_v12 = vld [vmem:[#allocation82_spill] sm:$0xff]  ;;  %v2764_v28 = vld [vmem:[#allocation2 + $0x4b0] sm:$0xff]  ;;  %v7221_v15 = vld [vmem:[#allocation85_spill] sm:$0xff] }
 0x559   : >> { %v2635_v56 = vadd.f32 %v6333_v24, %v2611_v29  ;;  %v2636_v4 = vadd.f32 %v6336_v18, %v2612_v27  ;;  %v2589_v59 = vadd.f32 %v2581_v30, %v2540_v50  ;;  %v2590_v7 = vadd.f32 %v2582_v23, %v2541_v44  ;;  %v2740_v50 = vld [vmem:[#allocation2 + $0x218] sm:$0xff]  ;;  %v2763_v13 = vld [vmem:[#allocation2 + $0x20] sm:$0xff]  ;;  %v2787_v16 = vld [vmem:[#allocation2 + $0x5a8] sm:$0xff] }
 0x55a   : >> { %v2681_v39 = vadd.f32 %v7210_v63, %v2657_v17  ;;  %v2682_v42 = vadd.f32 %v7211_v57, %v2658_v61  ;;  %v2699_v18 = vmul.f32 %v2691_v10, %v7212_v0  ;;  %v7223_v17 = vld [vmem:[#allocation47_spill] sm:$0xff]  ;;  %v7224_v61 = vld [vmem:[#allocation45_spill] sm:$0xff] }
 0x55b   : >> { %v2659_v25 = vadd.f32 %v2651_v34, %v2635_v56  ;;  %v2660_v1 = vadd.f32 %v2652_v55, %v2636_v4  ;;  %v2613_v21 = vadd.f32 %v6313_v20, %v2589_v59  ;;  %v2614_v24 = vadd.f32 %v6322_v41, %v2590_v7  ;;  %v7216_v34 = vld [vmem:[#allocation50_spill] sm:$0xff]  ;;  %v7222_v55 = vld [vmem:[#allocation84_spill] sm:$0xff]  ;;  %v2788_v56 = vld [vmem:[#allocation2 + $0x2c8] sm:$0xff] }
 0x55c   : >> { %v2705_v26 = vadd.f32 %v7214_v62, %v2681_v39  ;;  %v2706_v19 = vadd.f32 %v7215_v11, %v2682_v42  ;;  %v2723_v20 = vmul.f32 %v2715_v43, %v7217_v53  ;;  %v2724_v41 = vmul.f32 %v2716_v49, %v7218_v12  ;;  %v7228_v39 = vld [vmem:[#allocation48_spill] sm:$0xff]  ;;  %v2766_v42 = vld [vmem:[#allocation2 + $0x4b8] sm:$0xff]  ;;  %v2765_v43 = vld [vmem:[#allocation2 + $0x140] sm:$0xff] }
 0x55d   : >> { %v2683_v44 = vadd.f32 %v2675_v6, %v2659_v25  ;;  %v2684_v48 = vadd.f32 %v2676_v3, %v2660_v1  ;;  %v2637_v35 = vadd.f32 %v6266_v9, %v2613_v21  ;;  %v2638_v45 = vadd.f32 %v7216_v34, %v2614_v24  ;;  %v7225_v6 = vld [vmem:[#allocation64_spill] sm:$0xff]  ;;  %v7227_v3 = vld [vmem:[#allocation49_spill] sm:$0xff]  ;;  %v7229_v21 = vld [vmem:[#allocation67_spill] sm:$0xff] }
 0x55e   : >> { %v2729_v46 = vadd.f32 %v7219_v60, %v2705_v26  ;;  %v2730_v40 = vadd.f32 %v7220_v36, %v2706_v19  ;;  %v2747_v9 = vmul.f32 %v2739_v38, %v7221_v15  ;;  %v2748_v58 = vmul.f32 %v2740_v50, %v7222_v55  ;;  %v7230_v24 = vld [vmem:[#allocation71_spill] sm:$0xff]  ;;  %v7233_v26 = vld [vmem:[#allocation53_spill] sm:$0xff]  ;;  %v7234_v19 = vld [vmem:[#allocation56_spill] sm:$0xff] }
 0x55f   : >> { %v2707_v29 = vadd.f32 %v2699_v18, %v2683_v44  ;;  %v2708_v27 = vadd.f32 %v2700_v52, %v2684_v48  ;;  %v2661_v30 = vadd.f32 %v6280_v14, %v2637_v35  ;;  %v2662_v23 = vadd.f32 %v6277_v33, %v2638_v45  ;;  %v7231_v18 = vld [vmem:[#allocation52_spill] sm:$0xff]  ;;  %v7232_v52 = vld [vmem:[#allocation75_spill] sm:$0xff]  ;;  %v2790_v34 = vld [vmem:[#allocation2 + $0x238] sm:$0xff] }
 0x560   : >> { %v2753_v31 = vadd.f32 %v7223_v17, %v2729_v46  ;;  %v2754_v10 = vadd.f32 %v7224_v61, %v2730_v40  ;;  %v2771_v14 = vmul.f32 %v2763_v13, %v7225_v6  ;;  %v2772_v33 = vmul.f32 %v2764_v28, %v7226_v5  ;;  %v2789_v45 = vld [vmem:[#allocation2 + $0x78] sm:$0xff]  ;;  %v7237_v53 = vld [vmem:[#allocation51_spill] sm:$0xff]  ;;  %v7239_v46 = vld [vmem:[#allocation54_spill] sm:$0xff] }
 0x561   : >> { %v2685_v4 = vadd.f32 %v6286_v32, %v2661_v30  ;;  %v2686_v59 = vadd.f32 %v6283_v37, %v2662_v23  ;;  %v2731_v7 = vadd.f32 %v2723_v20, %v2707_v29  ;;  %v2732_v54 = vadd.f32 %v2724_v41, %v2708_v27  ;;  %v7238_v41 = vld [vmem:[#allocation60_spill] sm:$0xff] }
 0x562   : >> { %v2777_v63 = vadd.f32 %v7227_v3, %v2753_v31  ;;  %v2778_v57 = vadd.f32 %v7228_v39, %v2754_v10  ;;  %v2795_v37 = vmul.f32 %v2787_v16, %v7229_v21  ;;  %v2796_v0 = vmul.f32 %v2788_v56, %v7230_v24  ;;  %v7240_v29 = vld [vmem:[#allocation68_spill] sm:$0xff] }
 0x563   : >> { %v2709_v49 = vadd.f32 %v6292_v51, %v2685_v4  ;;  %v2710_v25 = vadd.f32 %v6289_v8, %v2686_v59  ;;  %v2755_v1 = vadd.f32 %v2747_v9, %v2731_v7  ;;  %v2756_v32 = vadd.f32 %v2748_v58, %v2732_v54  ;;  %v7235_v51 = vld [vmem:[#allocation65_spill] sm:$0xff]  ;;  %v7236_v8 = vld [vmem:[#allocation66_spill] sm:$0xff]  ;;  %v7241_v30 = vld [vmem:[#allocation72_spill] sm:$0xff] }
 0x564   : >> { %v2801_v22 = vadd.f32 %v7231_v18, %v2777_v63  ;;  %v2807_v62 = vadd.f32 %v7232_v52, %v6458_v2  ;;  %v2774_v48 = vmul.f32 %v2766_v42, %v7235_v51  ;;  %v2773_v35 = vmul.f32 %v2765_v43, %v7236_v8  ;;  %v7243_v51 = vld [vmem:[#allocation19_spill] sm:$0xff] }
 0x565   : >> { %v2733_v11 = vadd.f32 %v7233_v26, %v2709_v49  ;;  %v2734_v38 = vadd.f32 %v7234_v19, %v2710_v25  ;;  %v2779_v50 = vadd.f32 %v2771_v14, %v2755_v1  ;;  %v2780_v44 = vadd.f32 %v2772_v33, %v2756_v32 }
 0x566   : >> { %v2802_v20 = vadd.f32 %v7237_v53, %v2778_v57  ;;  %v2808_v12 = vadd.f32 %v2807_v62, %v2801_v22  ;;  %v2798_v27 = vmul.f32 %v2790_v34, %v7240_v29  ;;  %v2797_v23 = vmul.f32 %v2789_v45, %v7241_v30 }
 0x567   : >> { %v2757_v60 = vadd.f32 %v7238_v41, %v2733_v11  ;;  %v2758_v36 = vadd.f32 %v7239_v46, %v2734_v38  ;;  %v2803_v40 = vadd.f32 %v2795_v37, %v2779_v50  ;;  %v2804_v13 = vadd.f32 %v2796_v0, %v2780_v44  ;;  %v7242_v38 = vld [vmem:[#allocation16_spill] sm:$0xff] }
 0x568   : >> { %v2809_v28 = vadd.f32 %v2808_v12, %v2802_v20 }
 0x569   : >> { %v2781_v15 = vadd.f32 %v2773_v35, %v2757_v60  ;;  %v2782_v9 = vadd.f32 %v2774_v48, %v2758_v36  ;;  %v2812_v17 = vadd.f32 %v2804_v13, %v2803_v40  ;;  %v7244_v48 = vld [vmem:[#allocation17_spill] sm:$0xff]  ;;  %v7245_v35 = vld [vmem:[#allocation18_spill] sm:$0xff] }
 0x56a   : >> { %2810 = vadd.xlane.f32.xlu0 %v2809_v28 }
 0x56b   : >> { %v2805_v55 = vadd.f32 %v2797_v23, %v2781_v15  ;;  %v2806_v58 = vadd.f32 %v2798_v27, %v2782_v9 }
 0x56d   : >> { %v2813_v31 = vadd.f32 %v2812_v17, %v2805_v55 }
 0x56f   : >> { %v2814_v61 = vadd.f32 %v2813_v31, %v2806_v58 }
 0x571   : >> { %2815 = vadd.xlane.f32.xlu1 %v2814_v61 }
 0x5f3   : >> { %v2811_v10 = vpop.xlane.xlu0 %2810 }
 0x5f4   : >> { %v2817_v16 = vmul.f32 0.001953125, %v2811_v10 }
 0x5f6   : >> { %v2819_v56 = vsub.f32 %v6458_v2, %v2817_v16  ;;  %v2820_v4 = vsub.f32 %v7232_v52, %v2817_v16  ;;  %v2821_v59 = vsub.f32 %v2801_v22, %v2817_v16  ;;  %v2822_v7 = vsub.f32 %v2802_v20, %v2817_v16 }
 0x5f8   : >> { %v2827_v54 = vmul.f32 %v2819_v56, %v2819_v56  ;;  %v2828_v6 = vmul.f32 %v2820_v4, %v2820_v4  ;;  %v2829_v5 = vmul.f32 %v2821_v59, %v2821_v59  ;;  %v2830_v63 = vmul.f32 %v2822_v7, %v2822_v7 }
 0x5fa   : >> { %v2816_v14 = vpop.xlane.xlu1 %2815  ;;  %v2835_v33 = vadd.f32 %v2828_v6, %v2827_v54 }
 0x5fb   : >> { %v2818_v3 = vmul.f32 0.001953125, %v2816_v14 }
 0x5fc   : >> { %v2836_v39 = vadd.f32 %v2835_v33, %v2829_v5 }
 0x5fd   : >> { %v2823_v57 = vsub.f32 %v2803_v40, %v2818_v3  ;;  %v2824_v42 = vsub.f32 %v2804_v13, %v2818_v3  ;;  %v2825_v43 = vsub.f32 %v2805_v55, %v2818_v3  ;;  %v2826_v25 = vsub.f32 %v2806_v58, %v2818_v3 }
 0x5fe   : >> { %v2837_v49 = vadd.f32 %v2836_v39, %v2830_v63 }
 0x5ff   : >> { %v2831_v1 = vmul.f32 %v2823_v57, %v2823_v57  ;;  %v2832_v32 = vmul.f32 %v2824_v42, %v2824_v42  ;;  %v2833_v2 = vmul.f32 %v2825_v43, %v2825_v43  ;;  %v2834_v37 = vmul.f32 %v2826_v25, %v2826_v25 }
 0x600   : >> { %2838 = vadd.xlane.f32.xlu1 %v2837_v49  ;;  %v7251_v49 = vld [vmem:[#allocation21_spill] sm:$0xff] }
 0x601   : >> { %v2840_v21 = vadd.f32 %v2832_v32, %v2831_v1 }
 0x603   : >> { %v2841_v24 = vadd.f32 %v2840_v21, %v2833_v2 }
 0x605   : >> { %v2842_v0 = vadd.f32 %v2841_v24, %v2834_v37 }
 0x607   : >> { %2843 = vadd.xlane.f32.xlu0 %v2842_v0 }
 0x689   : >> { %v2839_v18 = vpop.xlane.xlu1 %2838 }
 0x68a   : >> { %v2845_v22 = vmul.f32 0.001953125, %v2839_v18 }
 0x68c   : >> { %v2847_v52 = vadd.f32 1e-05, %v2845_v22 }
 0x68e   : >> { %3481 = vrsqrt.f32 %v2847_v52 }
 0x690   : >> { %v2844_v62 = vpop.xlane.xlu0 %2843 }
 0x691   : >> { %v2846_v26 = vmul.f32 0.001953125, %v2844_v62 }
 0x693   : >> { %v2848_v11 = vadd.f32 1e-05, %v2846_v26 }
 0x695   : >> { %3483 = vrsqrt.f32 %v2848_v11 }
 0x69b   : >> { %v3482_v19 = vpop.eup %3481 }
 0x69c   : >> { %v2851_v50 = vmul.f32 %v3482_v19, %v7242_v38 }
 0x69e   : >> { %2855 = vperm.xlu1 %3473, %v2851_v50  }
 0x6a2   : >> { %v3484_v44 = vpop.eup %3483  ;;  %2878 = vperm.xlu1 %3473, %v7243_v51  }
 0x6a3   : >> { %v2852_v8 = vmul.f32 %v3484_v44, %v7244_v48 }
 0x6a5   : >> { %2860 = vperm.xlu0 %3474, %v2852_v8  }
 0x6a9   : >> { %2873 = vperm.xlu0 %3474, %v7245_v35   ;;  %v7256_v35 = vld [vmem:[#allocation20_spill] sm:$0xff] }
 0x719   : >> { %v2856_v34 = vpop.permute.xlu1 %2855 }
 0x71a   : >> { %v2863_v60 = vmul.f32 %v2856_v34, %v2819_v56  ;;  %v2865_v46 = vmul.f32 %v2856_v34, %v2821_v59  ;;  %v2864_v27 = vmul.f32 %v2856_v34, %v2820_v4  ;;  %v2866_v30 = vmul.f32 %v2856_v34, %v2822_v7  ;;  %v7246_v4 = vld [vmem:[#allocation11_spill] sm:$0xff] }
 0x71d   : >> { %v2879_v36 = vpop.permute.xlu1 %2878 }
 0x720   : >> { %v2861_v45 = vpop.permute.xlu0 %2860 }
 0x721   : >> { %v2867_v53 = vmul.f32 %v2861_v45, %v2823_v57  ;;  %v2868_v20 = vmul.f32 %v2861_v45, %v2824_v42  ;;  %v2869_v12 = vmul.f32 %v2861_v45, %v2825_v43  ;;  %v2870_v41 = vmul.f32 %v2861_v45, %v2826_v25 }
 0x723   : >> { %v2885_v40 = vadd.f32 %v2879_v36, %v2867_v53  ;;  %v2887_v13 = vadd.f32 %v2879_v36, %v2869_v12  ;;  %v2886_v28 = vadd.f32 %v2879_v36, %v2868_v20  ;;  %v2888_v29 = vadd.f32 %v2879_v36, %v2870_v41 }
 0x724   : >> { %v2874_v23 = vpop.permute.xlu0 %2873 }
 0x725   : >> { %v2881_v15 = vadd.f32 %v2874_v23, %v2863_v60  ;;  %v2883_v9 = vadd.f32 %v2874_v23, %v2865_v46  ;;  %v2894_v55 = vmax.f32 %v2886_v28, 0.0  ;;  %v2896_v58 = vmax.f32 %v2888_v29, 0.0  ;;  %v3487_v28 = vld [vmem:[%s5033_s12] sm:$0xff] }
 0x726   : >> { %v2893_v17 = vmax.f32 %v2885_v40, 0.0  ;;  %v2895_v31 = vmax.f32 %v2887_v13, 0.0  ;;  %v2882_v61 = vadd.f32 %v2874_v23, %v2864_v27  ;;  %v2884_v10 = vadd.f32 %v2874_v23, %v2866_v30  ;;  %v7257_v27 = vld [vmem:[#allocation25_spill] sm:$0xff]  ;;  %v3488_v23 = vld [vmem:[%s5033_s12 + $0x8] sm:$0xff] }
 0x727   : >> { %v2889_v16 = vmax.f32 %v2881_v15, 0.0  ;;  %v2891_v54 = vmax.f32 %v2883_v9, 0.0  ;;  %2929 = vmatprep.subr.mxu0 %v2894_v55  ;;  %3000 = vmatprep.subr.mxu1 %v2896_v58  ;;  %v7258_v9 = vld [vmem:[#allocation26_spill] sm:$0xff] }
 0x728   : >> { %2930 = vmatpush1.msra.mxu0 %v2893_v17  ;;  %3001 = vmatpush1.msra.mxu1 %v2895_v31  ;;  %v2890_v56 = vmax.f32 %v2882_v61, 0.0  ;;  %v2892_v59 = vmax.f32 %v2884_v10, 0.0 }
 0x72a   : >> { %2931 = vmatprep.subr.mxu0 %v2890_v56  ;;  %3002 = vmatprep.subr.mxu1 %v2892_v59 }
 0x72b   : >> { %2932 = vmatpush1.msra.mxu0 %v2889_v16  ;;  %3003 = vmatpush1.msra.mxu1 %v2891_v54 }
 0x72c   : >> { %3318 = vmatmul.mubr.msk.f32.vlgmr.msra.gmra.mxu0 %vm2897_vm9, %v7246_v4  ;;  %3319 = vmatmul.mubr.msk.f32.vlgmr.msra.gmra.mxu1 %vm2897_vm9, %v7246_v4 }
 0x7ec   : >> { %v2967_v7 = vpop.f32.mrf.mxu0  ;;  %v3038_v6 = vpop.f32.mrf.mxu1 }
 0x7ed   : >> { %v3043_v5 = vsel %vm7247_vm6, %v2967_v7, 0.0  ;;  %v3046_v3 = vsel %vm7249_vm4, %v3038_v6, 0.0 }
 0x7ee   : >> { %v2969_v14 = vpop.f32.mrf.mxu0  ;;  %v3040_v39 = vpop.f32.mrf.mxu1 }
 0x7ef   : >> { %v3044_v33 = vsel %vm7248_vm3, %v2969_v14, 0.0  ;;  %v3048_v42 = vsel %vm7250_vm2, %v3040_v39, 0.0 }
 0x7f0   : >> { %v3045_v63 = vadd.f32 %v3044_v33, %v3043_v5 }
 0x7f2   : >> { %v3047_v57 = vadd.f32 %v3046_v3, %v3045_v63 }
 0x7f4   : >> { %v3049_v43 = vadd.f32 %v3048_v42, %v3047_v57 }
 0x7f6   : >> { %3050 = vadd.xlane.f32.xlu1 %v3049_v43 }
 0x807   : >> { %3085 = vperm.xlu1 %3473, %v7251_v49  }
 0x87f   : >> { %v3051_v25 = vpop.xlane.xlu1 %3050 }
 0x880   : >> { %v3052_v1 = vmul.f32 0.001953125, %v3051_v25 }
 0x882   : >> { %v3053_v32 = vsub.f32 %v2967_v7, %v3052_v1  ;;  %v3054_v2 = vsub.f32 %v2969_v14, %v3052_v1  ;;  %v3055_v21 = vsub.f32 %v3038_v6, %v3052_v1  ;;  %v3056_v37 = vsub.f32 %v3040_v39, %v3052_v1 }
 0x883   : >> { %v3086_v60 = vpop.permute.xlu1 %3085 }
 0x884   : >> { %v3057_v24 = vmul.f32 %v3053_v32, %v3053_v32  ;;  %v3058_v0 = vmul.f32 %v3054_v2, %v3054_v2  ;;  %v3059_v18 = vmul.f32 %v3055_v21, %v3055_v21  ;;  %v3060_v22 = vmul.f32 %v3056_v37, %v3056_v37 }
 0x886   : >> { %v3061_v52 = vsel %vm7252_vm11, %v3057_v24, 0.0  ;;  %v3062_v62 = vsel %vm7253_vm12, %v3058_v0, 0.0  ;;  %v3064_v11 = vsel %vm7254_vm5, %v3059_v18, 0.0  ;;  %v3066_v38 = vsel %vm7255_vm0, %v3060_v22, 0.0 }
 0x887   : >> { %v3063_v26 = vadd.f32 %v3062_v62, %v3061_v52 }
 0x889   : >> { %v3065_v19 = vadd.f32 %v3064_v11, %v3063_v26 }
 0x88b   : >> { %v3067_v50 = vadd.f32 %v3066_v38, %v3065_v19 }
 0x88d   : >> { %3068 = vadd.xlane.f32.xlu0 %v3067_v50 }
 0x916   : >> { %v3069_v44 = vpop.xlane.xlu0 %3068 }
 0x917   : >> { %v3070_v51 = vmul.f32 0.001953125, %v3069_v44 }
 0x919   : >> { %v3071_v48 = vadd.f32 1e-05, %v3070_v51 }
 0x91b   : >> { %3485 = vrsqrt.f32 %v3071_v48 }
 0x928   : >> { %v3486_v8 = vpop.eup %3485 }
 0x929   : >> { %v3073_v34 = vmul.f32 %v3486_v8, %v7256_v35 }
 0x92b   : >> { %3076 = vperm.xlu0 %3474, %v3073_v34  }
 0x9a6   : >> { %v3077_v45 = vpop.permute.xlu0 %3076 }
 0x9a7   : >> { %v3079_v53 = vmul.f32 %v3077_v45, %v3053_v32  ;;  %v3080_v20 = vmul.f32 %v3077_v45, %v3054_v2  ;;  %v3081_v12 = vmul.f32 %v3077_v45, %v3055_v21  ;;  %v3082_v41 = vmul.f32 %v3077_v45, %v3056_v37 }
 0x9a9   : >> { %v3088_v46 = vadd.f32 %v3086_v60, %v3079_v53  ;;  %v3089_v36 = vadd.f32 %v3086_v60, %v3080_v20  ;;  %v3090_v40 = vadd.f32 %v3086_v60, %v3081_v12  ;;  %v3091_v13 = vadd.f32 %v3086_v60, %v3082_v41 }
 0x9ab   : >> { %v3094_v29 = vadd.f32 %v3487_v28, %v3088_v46  ;;  %v3095_v30 = vadd.f32 %v3089_v36, %v7257_v27  ;;  %v3096_v15 = vadd.f32 %v3488_v23, %v3090_v40  ;;  %v3097_v55 = vadd.f32 %v3091_v13, %v7258_v9  ;;  %1469 = sbr.rel (!%p1467_p11) target bundleno = 333 (0x14d), region = 129 }
 0x9ad   : >> { %v3102_v58 = vcombine.low %v3094_v29, %v3095_v30  ;;  %v3103_v17 = vcombine.low %v3096_v15, %v3097_v55 }
 0x9af   : >> { %3108 = vst [vmem:[%s3107_s2] sm:$0xff] %v3102_v58  ;;  %3109 = vst [vmem:[%s3107_s2 + $0x8] sm:$0xff] %v3103_v17 }
 0x9b0   : > { %3502 = shalt.err (!%p3499_p4)
}
 0x9b1   : > { %s3503_s11 = scalar_lea.hbm %s6539_s6, 512  ;;  %s3507_s20 = scalar_lea.hbm %s6597_s10, 1024 }
 0x9b2   : > { %p3504_p7 = scmp.ne.s32.totalorder %s6539_s6, %s3503_s11  ;;  %p3508_p10 = scmp.lt.s32.totalorder %s6539_s6, %s6597_s10 }
 0x9b3   : > { %p3509_p11 = scmp.lt.s32.totalorder %s3507_s20, %s3503_s11 }
 0x9b4   : > { %p3505_p8 = pnand %p3504_p7, %p3702_p5 }
 0x9b5   : > { %p3510_p12 = por %p3509_p11, %p3508_p10 }
 0x9b6   : > { %p3506_p9 = pneg %p3505_p8 }
 0x9b8   : > { %p3511_p13 = pnand %p3510_p12, %p3506_p9 }
 0x9ba   : > { %3514 = shalt.err (!%p3511_p13)
}
 0x9bb   : > { %s3607_s26 = smov 256   ;;  %s3608_s0 = smov 16  }
 0x9bc   : > { %3332 = dma.vmem_to_hbm [thread:$0]  (%p3702_p5), %s6543_s8, 512, %s6539_s6, %s6547_s27, %s3607_s26, %s3607_s26, %s3608_s0  }
 0x9bd PF: > { %p3338_p0 = scmp.ge.s32.totalorder %s3553_s16, 2  ;;  %s3140_s1 = sand.u32 1, %s3541_s13  }
 0x9be   : > { %s3141_s2 = scalar_lea.sflag [#allocation4], %s3140_s1 }
 0x9bf   : > { %p3335_p1 = pnand %p3338_p0, %p3706_p6 }
 0x9c1   : > { %p3336_p2 = pneg %p3335_p1 }
 0x9c3   : > { %3536 = dma.done.wait (%p3336_p2), %s3141_s2, 512  }
 0x9c4   : > { %3538 = vsyncadd (%p3336_p2), %s3141_s2, 4294966784  ;;  %p20_p3 = scmp.ge.s32.totalorder %s3689_s19, 4   ;;  %s7263_s13 = smov %s3545_s14 }
 0x9c5   : > { %s7264_s14 = smov %s3549_s15  ;;  %s7265_s15 = smov %s3700_s22 }
 0x9c6   : > { %s7266_s16 = smov %s3689_s19  ;;  %22 = sbr.rel (!%p20_p3) target bundleno = 14 (0xe), region = 140 }
 0x9cb   :  { %3146 = vsyncpa [#allocation4], 1 }
 0x9cc   :  { %3148 = vsyncpa [#allocation4 + $0x1], 1 }

</bundles_post_ra>
